<compile_context>
chip_gen: v7x
topology: tpu7x:2x2x1
jax: 0.10.0
libtpu: 0.0.40
codegen_flags: <defaults>
</compile_context>

<pallas_src>
import numpy as np
import jax
import jax.numpy as jnp
from jax.experimental import pallas as pl
from jax.experimental.pallas import tpu as pltpu


def _round_up(x, m):
    return ((x + m - 1) // m) * m


# ----------------------------------------------------------------------------
# Pallas kernel: one [TM, d] tile of the Fourier embedding per grid step.
#   params row 0 = duplicated freqs  [f, f][:d]
#   params row 1 = phase offsets     [0]*F + [pi/2]*(d-F)   (cos(x) == sin(x+pi/2))
# ----------------------------------------------------------------------------
def fourier_kernel(mz_ref, params_ref, out_ref):
    mz = mz_ref[...]                    # [TM, 1]  mz values (column)
    freqs = params_ref[0:1, :]          # [1, d]   duplicated freqs
    offs = params_ref[1:2, :]           # [1, d]   0 on sin lanes, pi/2 on cos lanes
    out_ref[...] = jnp.sin(mz * freqs + offs).astype(out_ref.dtype)


# ----------------------------------------------------------------------------
# Wrapper: layout plumbing (flatten, params row-pair, tile-size choice).
# ----------------------------------------------------------------------------
def fourier_embed_pallas(mz, freqs, d, *, block_rows=1024, out_dtype=jnp.float32):
    """mz: [B, L] float, freqs: [ceil(d/2)] float. Returns [B, L, d]."""
    B, L = mz.shape
    F = freqs.shape[0]
    M = B * L

    mz_col = mz.reshape(M, 1).astype(jnp.float32)

    # Resident params block: row 0 = freqs duplicated onto d lanes,
    # row 1 = +pi/2 offsets on the "cos" half of the lanes.
    freqs_cat = jnp.concatenate([freqs, freqs])[:d].astype(jnp.float32)
    offs = jnp.concatenate([jnp.zeros((F,), jnp.float32),
                            jnp.full((d - F,), jnp.pi / 2, jnp.float32)])
    params = jnp.stack([freqs_cat, offs])                     # [2, d]

    # Row-tile size: multiple of 8 (sublane), capped at block_rows, split so
    # the grid has >= 2 steps whenever possible (keeps both v7x TCs busy).
    m8 = max(8, _round_up(M, 8))
    tm = min(block_rows, max(8, _round_up(pl.cdiv(m8, 2), 8)))
    grid = (pl.cdiv(M, tm),)

    out = pl.pallas_call(
        fourier_kernel,
        out_shape=jax.ShapeDtypeStruct((M, d), out_dtype),
        grid_spec=pltpu.PrefetchScalarGridSpec(
            num_scalar_prefetch=0,
            grid=grid,
            in_specs=[
                pl.BlockSpec((tm, 1), lambda i: (i, 0)),   # mz rows for this tile
                pl.BlockSpec((2, d), lambda i: (0, 0)),    # freqs/offsets: resident
            ],
            out_specs=pl.BlockSpec((tm, d), lambda i: (i, 0)),
        ),
        compiler_params=pltpu.CompilerParams(
            dimension_semantics=("parallel",)),    # v7x: shard row tiles over 2 TCs
    )(mz_col, params)

    return out.reshape(B, L, d)


# ----------------------------------------------------------------------------
# Host-side parameter construction (the nn.Module __init__).
# ----------------------------------------------------------------------------
def make_freqs(d, logmin=-2.5, logmax=3.3):
    lambda_min = np.power(10.0, -logmin)
    lambda_max = np.power(10.0, logmax)
    index = np.arange(np.ceil(d / 2))
    exp = np.power(lambda_max / lambda_min, 2 * index / (d - 2))
    freqs = 2 * np.pi * (lambda_min * exp) ** (-1)
    return jnp.asarray(freqs, dtype=jnp.float32)


# ----------------------------------------------------------------------------
# Pure-JAX reference (exact PyTorch formulation) for verification.
# ----------------------------------------------------------------------------
def fourier_ref(mz, freqs, d):
    fi = jnp.einsum('bi,j->bij', mz, freqs)
    emb = jnp.concatenate([jnp.sin(fi), jnp.cos(fi)], axis=-1)
    return emb[:, :, :d]


if __name__ == "__main__":
    key = jax.random.PRNGKey(0)

    B = 2            # batch
    L = 200          # number of mz peaks (B*L = 400 rows -> 2 grid steps)
    d = 128          # spec_embed_dim (lane-dense output width)

    mz = jax.random.uniform(key, (B, L), minval=50.0, maxval=1000.0,
                            dtype=jnp.float32)
    freqs = make_freqs(d)                      # [ceil(d/2)] = [64]

    out = fourier_embed_pallas(mz, freqs, d)   # [B, L, d]
    out = jax.block_until_ready(out)

    ref = fourier_ref(mz, freqs, d)
    np.testing.assert_allclose(np.asarray(out), np.asarray(ref),
                               rtol=1e-5, atol=1e-4)
    print("KERNEL_OK")
</pallas_src>

<mosaic_0001>
module attributes {stable_mosaic.version = 11 : i64} {
  func.func @fourier_kernel(%arg0: i32, %arg1: memref<200x1xf32, #tpu.memory_space<vmem>>, %arg2: memref<2x128xf32, #tpu.memory_space<vmem>>, %arg3: memref<200x128xf32, #tpu.memory_space<vmem>>) attributes {dimension_semantics = [#tpu.dimension_semantics<parallel>], iteration_bounds = array<i64: 2>, scalar_prefetch = 0 : i64, scratch_operands = 0 : i64, tpu.core_type = #tpu.core_type<tc>, window_params = [{transform_indices = @transform_0, window_bounds = array<i64: 200, 1>}, {pipeline_mode = #tpu.pipeline_mode<synchronous>, transform_indices = @transform_1, window_bounds = array<i64: 2, 128>}, {transform_indices = @transform_2, window_bounds = array<i64: 200, 128>}]} {
    %c0 = arith.constant 0 : index
    %c0_0 = arith.constant 0 : index
    %0 = vector.load %arg1[%c0, %c0_0] : memref<200x1xf32, #tpu.memory_space<vmem>>, vector<200x1xf32>
    %c0_1 = arith.constant 0 : index
    %c0_2 = arith.constant 0 : index
    %1 = vector.load %arg2[%c0_1, %c0_2] : memref<2x128xf32, #tpu.memory_space<vmem>>, vector<1x128xf32>
    %c1 = arith.constant 1 : index
    %c0_3 = arith.constant 0 : index
    %2 = vector.load %arg2[%c1, %c0_3] : memref<2x128xf32, #tpu.memory_space<vmem>>, vector<1x128xf32>
    %3 = vector.broadcast %0 : vector<200x1xf32> to vector<200x128xf32>
    %4 = vector.broadcast %1 : vector<1x128xf32> to vector<200x128xf32>
    %5 = arith.mulf %3, %4 : vector<200x128xf32>
    %6 = vector.broadcast %2 : vector<1x128xf32> to vector<200x128xf32>
    %7 = arith.addf %5, %6 : vector<200x128xf32>
    %8 = math.sin %7 : vector<200x128xf32>
    %c0_4 = arith.constant 0 : index
    %c0_5 = arith.constant 0 : index
    %9 = vector.load %arg3[%c0_4, %c0_5] : memref<200x128xf32, #tpu.memory_space<vmem>>, vector<200x128xf32>
    tpu.vector_store %arg3[%c0_4, %c0_5], %8 {strides = array<i32>} : memref<200x128xf32, #tpu.memory_space<vmem>>, vector<200x128xf32>,
    return
  }
  func.func @transform_0(%arg0: i32) -> (i32, i32) {
    %c0_i32 = arith.constant 0 : i32
    %c0_i32_0 = arith.constant 0 : i32
    return %arg0, %c0_i32 : i32, i32
  }
  func.func @transform_1(%arg0: i32) -> (i32, i32) {
    %c0_i32 = arith.constant 0 : i32
    %c0_i32_0 = arith.constant 0 : i32
    %c0_i32_1 = arith.constant 0 : i32
    return %c0_i32, %c0_i32_0 : i32, i32
  }
  func.func @transform_2(%arg0: i32) -> (i32, i32) {
    %c0_i32 = arith.constant 0 : i32
    %c0_i32_0 = arith.constant 0 : i32
    return %arg0, %c0_i32 : i32, i32
  }
}

</mosaic_0001>

<bundles_post_ra>
// kernel: tpu_custom_call.1
= control target key start
LH: loop header
LB: loop body
LE: loop exit
PB: predicated region body
PF: predicated region fallthrough
CT: control target
= control target key end

     0   :  { %7 = vsyncpa [#allocation3], 0  ;;  %s5671_s0 = inlined_call_operand.vmem [shape: f32[400,1], index: 0, kind: input, shape index: {}]   ;;  %s5672_s1 = inlined_call_operand.vmem [shape: f32[2,128], index: 1, kind: input, shape index: {}]   ;;  %s5673_s2 = inlined_call_operand.hbm [shape: f32[400,128], index: 2, kind: output, shape index: {}]  }
   0x1   :  { %9 = vsyncpa [#allocation3 + $0x1], 0  ;;  %s3515_s9 = smov 0   ;;  %s3517_s10 = smov 0  }
   0x2   :  { %s3519_s11 = smov 0   ;;  %s3521_s12 = smov 0  }
   0x3 LB: > { %s3536_s13 = sadd.s32 4294967295, %s3488_s12   ;;  %s3056_s14 = sadd.s32 4294967294, %s3488_s12   ;;  %s3488_s12 = sphi %s3521_s12, %s5725_s12   ;;  %s3484_s11 = sphi %s3519_s11, %s5724_s11   ;;  %s3480_s10 = sphi %s3517_s10, %s5723_s10   ;;  %s3476_s9 = sphi %s3515_s9, %s5722_s9  }
   0x4   : > { %s3540_s15 = sadd.s32 1, %s3488_s12   ;;  %s69_s16 = sadd.s32 1, %s3484_s11 }
   0x5   : > { %s66_s17 = ssub.s32 %s3488_s12, %s3540_s15  ;;  %p79_p0 = scmp.ne.s32.totalorder %s3484_s11, %s3480_s10 }
   0x6   : > { %p67_p1 = scmp.eq.s32.totalorder %s66_s17, 0  ;;  %p80_p2 = scmp.eq.s32.totalorder %s3536_s13, 1 }
   0x7   : > { %p85_p3 = scmp.ne.s32.totalorder %s3480_s10, %s3476_s9  ;;  %p86_p4 = scmp.eq.s32.totalorder %s3056_s14, 1 }
   0x8   : > { %s3551_s18 = scalar_select %p67_p1, %s3484_s11, %s69_s16  }
   0x9   : > { %p3553_p5 = por %p80_p2, %p79_p0  ;;  %p3557_p6 = por %p86_p4, %p85_p3 }
   0xa   : > { %p3059_p7 = scmp.ge.s32.totalorder %s3488_s12, 1  ;;  %p116_p8 = scmp.lt.s32.totalorder %s3488_s12, 3 }
   0xc   : > { %p117_p9 = pnand %p3059_p7, %p116_p8 }
   0xd   : > { %s138_s21 = smul.u32 (!%p117_p9), 25, %s3536_s13  ;;  %v3490_v0 = vmov (!%p117_p9), 0   ;;  %v3597_v26 = vld [vmem:[%s5672_s1] ss:$0 sm:$0xff] (!%p117_p9)  ;;  %v3602_v27 = vld [vmem:[%s5672_s1 + $0x1] ss:$0 sm:$0xff] (!%p117_p9) }
   0xe   : > { %120 = sbr.rel (%p117_p9) target bundleno = 833 (0x341), region = 28  ;;  %3317 = vset.pattern.permute.xlu1 (!%p117_p9), %v3490_v0  ;;  %3316 = vset.pattern.permute.xlu0 (!%p117_p9), %v3490_v0  ;;  %v3491_v0 = vmov (!%p117_p9), 683565275   ;;  %s135_s30 = sand.u32 (!%p117_p9), 1, %s3480_s10  }
   0xf   : > { %p139_p10 = scmp.lt.s32.totalorder (!%p117_p9), %s138_s21, 49  ;;  %s3857_s3 = smul.u32 (!%p117_p9), 200, %s135_s30 }
  0x10   : > { %s3497_s16 = smov (!%p117_p9), [#allocation2]  }
  0x11   : > { %s3893_s4 = scalar_lea.vmem (!%p117_p9), [#allocation2], %s3857_s3  ;;  %s3166_s3 = smul.u32 (!%p117_p9), 3200, %s3536_s13 }
  0x12   : > { %s2994_s5 = sshll.u32 (!%p117_p9), %s3893_s4, 4  ;;  %s5630_s13 = scalar_lea.sflag (!%p117_p9), [#allocation3], %s135_s30  ;;  %s5625_s5 = int_to_ptr.vmem [resolvable:$true] %s2994_s5 }
  0x13   : > { %s5622_s8 = scalar_lea.hbm (!%p117_p9), %s5673_s2, %s3166_s3  ;;  %s3426_s14 = scalar_lea.vmem (!%p117_p9), %s5625_s5, 3200 }
  0x14   : > { %p3427_p11 = scmp.ne.s32.totalorder (!%p117_p9), %s5625_s5, %s3426_s14  ;;  %s3430_s17 = sshll.u32 (!%p117_p9), %s3497_s16, 4  ;;  %s3431_s17 = int_to_ptr.vmem [resolvable:$false] %s3430_s17 }
  0x15   : > { %s5727_s21 = smov (!%p139_p10, %s138_s21), 49  ;;  %p3433_p0 = scmp.lt.s32.totalorder %s5625_s5, %s3431_s17 }
  0x16   : > { %s3060_s22 = sshll.u32 %s5727_s21, 3  ;;  %p3428_p12 = pnand %p3427_p11, %p3553_p5 }
  0x17   : > { %s3567_s25 = scalar_lea.vmem %s5671_s0, %s3060_s22  ;;  %s3432_s21 = scalar_lea.vmem %s3431_s17, 6400 }
  0x18   : > { %v147_v1 = vld [vmem:[%s3567_s25 + $0x10] sm:$0xff]  ;;  %v145_v2 = vld [vmem:[%s3567_s25] sm:$0xff]  ;;  %v148_v3 = vld [vmem:[%s3567_s25 + $0x18] sm:$0xff]  ;;  %p3429_p13 = pneg %p3428_p12  ;;  %p3434_p1 = scmp.lt.s32.totalorder %s3432_s21, %s3426_s14 }
  0x19   : > { %184 = vperm.xlu1 %3317, %v147_v1   ;;  %174 = vperm.xlu0 %3316, %v145_v2   ;;  %v146_v4 = vld [vmem:[%s3567_s25 + $0x8] sm:$0xff]  ;;  %v149_v6 = vld [vmem:[%s3567_s25 + $0x20] sm:$0xff]  ;;  %v152_v7 = vld [vmem:[%s3567_s25 + $0x38] sm:$0xff]  ;;  %v3492_v2 = vmov 2475754826  }
  0x1a   : > { %v150_v5 = vld [vmem:[%s3567_s25 + $0x28] sm:$0xff]  ;;  %v151_v8 = vld [vmem:[%s3567_s25 + $0x30] sm:$0xff]  ;;  %v153_v10 = vld [vmem:[%s3567_s25 + $0x40] sm:$0xff]  ;;  %p3435_p2 = por %p3434_p1, %p3433_p0 }
  0x1b   : > { %v154_v9 = vld [vmem:[%s3567_s25 + $0x48] sm:$0xff]  ;;  %v156_v11 = vld [vmem:[%s3567_s25 + $0x58] sm:$0xff]  ;;  %v155_v12 = vld [vmem:[%s3567_s25 + $0x50] sm:$0xff] }
  0x1c   : > { %v158_v13 = vld [vmem:[%s3567_s25 + $0x68] sm:$0xff]  ;;  %v157_v14 = vld [vmem:[%s3567_s25 + $0x60] sm:$0xff]  ;;  %v160_v15 = vld [vmem:[%s3567_s25 + $0x78] sm:$0xff]  ;;  %p3436_p3 = pnand %p3435_p2, %p3429_p13 }
  0x1d   : > { %189 = vperm.xlu1 %3317, %v148_v3   ;;  %179 = vperm.xlu0 %3316, %v146_v4   ;;  %v159_v16 = vld [vmem:[%s3567_s25 + $0x70] sm:$0xff]  ;;  %v162_v17 = vld [vmem:[%s3567_s25 + $0x88] sm:$0xff]  ;;  %v161_v18 = vld [vmem:[%s3567_s25 + $0x80] sm:$0xff]  ;;  %v3493_v4 = vmov 2131351028  }
  0x1e   : > { %v164_v19 = vld [vmem:[%s3567_s25 + $0x98] sm:$0xff]  ;;  %v163_v20 = vld [vmem:[%s3567_s25 + $0x90] sm:$0xff]  ;;  %v166_v21 = vld [vmem:[%s3567_s25 + $0xa8] sm:$0xff] }
  0x1f   : > { %v165_v22 = vld [vmem:[%s3567_s25 + $0xa0] sm:$0xff]  ;;  %v168_v23 = vld [vmem:[%s3567_s25 + $0xb8] sm:$0xff]  ;;  %v167_v24 = vld [vmem:[%s3567_s25 + $0xb0] sm:$0xff] }
  0x20   : > { %v169_v25 = vld [vmem:[%s3567_s25 + $0xc0] sm:$0xff] }
  0x21   : > { %199 = vperm.xlu1 %3317, %v150_v5   ;;  %194 = vperm.xlu0 %3316, %v149_v6   ;;  %v3494_v6 = vmov 2102212464  }
  0x25   : > { %209 = vperm.xlu1 %3317, %v152_v7   ;;  %204 = vperm.xlu0 %3316, %v151_v8   ;;  %v3495_v8 = vmov 920167782  }
  0x29   : > { %219 = vperm.xlu1 %3317, %v154_v9   ;;  %214 = vperm.xlu0 %3316, %v153_v10  }
  0x2d   : > { %229 = vperm.xlu1 %3317, %v156_v11   ;;  %224 = vperm.xlu0 %3316, %v155_v12  }
  0x31   : > { %239 = vperm.xlu1 %3317, %v158_v13   ;;  %234 = vperm.xlu0 %3316, %v157_v14  }
  0x35   : > { %249 = vperm.xlu1 %3317, %v160_v15   ;;  %244 = vperm.xlu0 %3316, %v159_v16  }
  0x39   : > { %259 = vperm.xlu1 %3317, %v162_v17   ;;  %254 = vperm.xlu0 %3316, %v161_v18   ;;  %v3496_v17 = vmov 1326507024  }
  0x3d   : > { %269 = vperm.xlu1 %3317, %v164_v19   ;;  %264 = vperm.xlu0 %3316, %v163_v20  }
  0x41   : > { %279 = vperm.xlu1 %3317, %v166_v21   ;;  %274 = vperm.xlu0 %3316, %v165_v22  }
  0x45   : > { %289 = vperm.xlu1 %3317, %v168_v23   ;;  %284 = vperm.xlu0 %3316, %v167_v24  }
  0x49   : > { %294 = vperm.xlu0 %3316, %v169_v25  }
  0x98   : > { %v185_v28 = vpop.permute.xlu1 %184  ;;  %v175_v29 = vpop.permute.xlu0 %174 }
  0x99   : > { %v303_v30 = vmul.f32 %v3597_v26, %v185_v28  ;;  %v301_v31 = vmul.f32 %v3597_v26, %v175_v29 }
  0x9b   : > { %v3607_v32 = vadd.f32 %v3602_v27, %v303_v30  ;;  %v3610_v33 = vadd.f32 %v3602_v27, %v301_v31 }
  0x9c   : > { %v190_v34 = vpop.permute.xlu1 %189  ;;  %v180_v52 = vpop.permute.xlu0 %179 }
  0x9d   : > { %v563_v35 = vand.u32 2147483647, %v3607_v32  ;;  %v566_v36 = vand.u32 2139095040, %v3607_v32  ;;  %v355_v37 = vand.u32 2147483647, %v3610_v33  ;;  %v358_v38 = vand.u32 2139095040, %v3610_v33 }
  0x9e   : > { %v304_v41 = vmul.f32 %v3597_v26, %v190_v34  ;;  %v3628_v58 = vmul.f32 %v3597_v26, %v180_v52  ;;  %vm565_vm13 = vcmp.lt.s32.totalorder %v3607_v32, 0  ;;  %vm357_vm14 = vcmp.lt.s32.totalorder %v3610_v33, 0 }
  0x9f   : > { %v567_v39 = vshrl.u32 %v566_v36, 23  ;;  %v570_v40 = vand.u32 8388607, %v563_v35  ;;  %v359_v42 = vshrl.u32 %v358_v38, 23  ;;  %v362_v43 = vand.u32 8388607, %v355_v37 }
  0xa0   : > { %v3622_v45 = vadd.f32 %v3602_v27, %v304_v41 }
  0xa1   : > { %v3071_v44 = vadd.s32 4294967169, %v567_v39  ;;  %v3063_v46 = vadd.s32 4294967169, %v359_v42  ;;  %v571_v47 = vor.u32 8388608, %v570_v40  ;;  %v363_v49 = vor.u32 8388608, %v362_v43 }
  0xa2   : > { %v670_v51 = vand.u32 2139095040, %v3622_v45  ;;  %v667_v62 = vand.u32 2147483647, %v3622_v45 }
  0xa3   : > { %v573_v48 = vadd.s32 1, %v3071_v44  ;;  %v365_v50 = vadd.s32 1, %v3063_v46  ;;  %v3625_v56 = vshll.u32 %v571_v47, 8  ;;  %v3632_v61 = vshll.u32 %v363_v49, 8 }
  0xa4   : > { %v671_v54 = vshrl.u32 %v670_v51, 23 }
  0xa5   : > { %vm574_vm0 = vcmp.gt.s32.totalorder %v573_v48, 0  ;;  %vm366_vm1 = vcmp.gt.s32.totalorder %v365_v50, 0 }
  0xa6   : > { %v575_v53 = vsel %vm574_vm0, %v573_v48, 0  ;;  %v367_v57 = vsel %vm366_vm1, %v365_v50, 0  ;;  %v3642_v11 = vadd.s32 4294967169, %v671_v54  ;;  %vm3749_vm1 = vcmp.le.f32.partialorder %v563_v35, 0.7853982 }
  0xa7   : > { %v577_v55 = vand.u32 31, %v575_v53  ;;  %v576_v59 = vshrl.u32 %v575_v53, 5  ;;  %v3630_v60 = vand.u32 31, %v367_v57  ;;  %v3640_v10 = vshrl.u32 %v367_v57, 5 }
  0xa9   : > { %v578_v63 = vsub.s32 32, %v577_v55  ;;  %v580_v1 = vshll.u32 %v3491_v0, %v577_v55  ;;  %v583_v3 = vshll.u32 %v3492_v2, %v577_v55  ;;  %v586_v5 = vshll.u32 %v3493_v4, %v577_v55 }
  0xaa   : > { %v589_v7 = vshll.u32 %v3494_v6, %v577_v55  ;;  %v592_v9 = vshll.u32 %v3495_v8, %v577_v55  ;;  %vm595_vm2 = vcmp.lt.s32.totalorder %v576_v59, 1  ;;  %vm596_vm3 = vcmp.lt.s32.totalorder %v576_v59, 2 }
  0xab   : > { %v579_v12 = vshrl.u32 %v3491_v0, %v578_v63  ;;  %v581_v13 = vshrl.u32 %v3492_v2, %v578_v63  ;;  %v584_v14 = vshrl.u32 %v3493_v4, %v578_v63  ;;  %v587_v15 = vshrl.u32 %v3494_v6, %v578_v63 }
  0xac   : > { %v590_v16 = vshrl.u32 %v3495_v8, %v578_v63  ;;  %v593_v18 = vshrl.u32 %v3496_v17, %v578_v63  ;;  %v370_v22 = vsub.s32 32, %v3630_v60  ;;  %vm597_vm4 = vcmp.lt.s32.totalorder %v576_v59, 3 }
  0xad   : > { %v582_v19 = vor.u32 %v581_v13, %v580_v1  ;;  %v585_v20 = vor.u32 %v584_v14, %v583_v3  ;;  %v588_v21 = vor.u32 %v587_v15, %v586_v5  ;;  %vm598_vm5 = vcmp.lt.s32.totalorder %v576_v59, 4 }
  0xae   : > { %v591_v23 = vor.u32 %v590_v16, %v589_v7  ;;  %v594_v24 = vor.u32 %v593_v18, %v592_v9  ;;  %v372_v38 = vshll.u32 %v3491_v0, %v3630_v60  ;;  %v373_v41 = vshrl.u32 %v3492_v2, %v370_v22 }
  0xaf   : > { %v599_v25 = vsel %vm595_vm2, %v579_v12, %v582_v19  ;;  %v600_v28 = vsel %vm598_vm5, %v588_v21, 2102212464  ;;  %v603_v29 = vsel %vm595_vm2, %v582_v19, %v585_v20  ;;  %v607_v30 = vsel %vm595_vm2, %v585_v20, %v588_v21 }
  0xb0   : > { %v601_v31 = vsel %vm597_vm4, %v585_v20, %v600_v28  ;;  %v604_v34 = vsel %vm598_vm5, %v591_v23, 920167782  ;;  %v608_v36 = vsel %vm598_vm5, %v594_v24, 1326507024  ;;  %v375_v42 = vshll.u32 %v3492_v2, %v3630_v60 }
  0xb1   : > { %v605_v39 = vsel %vm597_vm4, %v588_v21, %v604_v34  ;;  %v609_v40 = vsel %vm597_vm4, %v591_v23, %v608_v36  ;;  %v602_v43 = vsel %vm596_vm3, %v599_v25, %v601_v31  ;;  %v376_v47 = vshrl.u32 %v3493_v4, %v370_v22 }
  0xb2   : > { %v606_v44 = vsel %vm596_vm3, %v603_v29, %v605_v39  ;;  %v610_v46 = vsel %vm596_vm3, %v607_v30, %v609_v40  ;;  %v374_v52 = vor.u32 %v373_v41, %v372_v38  ;;  %v378_v54 = vshll.u32 %v3493_v4, %v3630_v60 }
  0xb3   : > { %v3661_v48 = vmul.u32.u64.low %v3625_v56, %v610_v46  ;;  %v3662_v49 = vmul.u32.u64.high %v3625_v56, %v610_v46, %v3661_v48  ;;  %v3665_v50 = vmul.u32.u64.low %v3625_v56, %v606_v44  ;;  %v3666_v51 = vmul.u32.u64.high %v3625_v56, %v606_v44, %v3665_v50 }
  0xb4   : > { %v377_v53 = vor.u32 %v376_v47, %v375_v42  ;;  %v379_v55 = vshrl.u32 %v3494_v6, %v370_v22  ;;  %v371_v57 = vshrl.u32 %v3491_v0, %v370_v22  ;;  %v381_v59 = vshll.u32 %v3494_v6, %v3630_v60 }
  0xb5   : > { %v382_v63 = vshrl.u32 %v3495_v8, %v370_v22  ;;  %v385_v1 = vshrl.u32 %v3496_v17, %v370_v22  ;;  %v618_v3 = vmul.u32 %v3625_v56, %v602_v43  ;;  %v384_v7 = vshll.u32 %v3495_v8, %v3630_v60 }
  0xb6   : > { %v380_v5 = vor.u32 %v379_v55, %v378_v54  ;;  %vm387_vm6 = vcmp.lt.s32.totalorder %v3640_v10, 1  ;;  %vm620_vm7 = vc.u32 %v3662_v49, %v3665_v50  ;;  %v621_v9 = vadd.s32 1, %v3666_v51 }
  0xb7   : > { %v383_v12 = vor.u32 %v382_v63, %v381_v59  ;;  %vm388_vm8 = vcmp.lt.s32.totalorder %v3640_v10, 2  ;;  %v386_v13 = vor.u32 %v385_v1, %v384_v7  ;;  %vm389_vm9 = vcmp.lt.s32.totalorder %v3640_v10, 3 }
  0xb8   : > { %vm390_vm10 = vcmp.lt.s32.totalorder %v3640_v10, 4  ;;  %v395_v14 = vsel %vm387_vm6, %v374_v52, %v377_v53  ;;  %v622_v56 = vsel %vm620_vm7, %v621_v9, %v3666_v51  ;;  %v399_v60 = vsel %vm387_vm6, %v377_v53, %v380_v5  ;;  %v200_v51 = vpop.permute.xlu1 %199 }
  0xb9   : > { %v392_v15 = vsel %vm390_vm10, %v380_v5, 2102212464  ;;  %v396_v16 = vsel %vm390_vm10, %v383_v12, 920167782  ;;  %v623_v18 = vadd.s32 %v622_v56, %v618_v3  ;;  %v391_v19 = vsel %vm387_vm6, %v371_v57, %v374_v52 }
  0xba   : > { %v397_v20 = vsel %vm389_vm9, %v380_v5, %v396_v16  ;;  %v400_v21 = vsel %vm390_vm10, %v386_v13, 1326507024  ;;  %v393_v22 = vsel %vm389_vm9, %v377_v53, %v392_v15  ;;  %v677_v25 = vadd.s32 1, %v3642_v11 }
  0xbb   : > { %v398_v23 = vsel %vm388_vm8, %v395_v14, %v397_v20  ;;  %v401_v24 = vsel %vm389_vm9, %v383_v12, %v400_v21  ;;  %v624_v28 = vadd.s32 536870912, %v623_v18  ;;  %v674_v38 = vand.u32 8388607, %v667_v62 }
  0xbc   : > { %v402_v29 = vsel %vm388_vm8, %v399_v60, %v401_v24  ;;  %v3692_v30 = vmul.u32.u64.low %v3632_v61, %v398_v23  ;;  %v3693_v31 = vmul.u32.u64.high %v3632_v61, %v398_v23, %v3692_v30  ;;  %vm678_vm11 = vcmp.gt.s32.totalorder %v677_v25, 0 }
  0xbd   : > { %v3697_v34 = vmul.u32.u64.low %v3632_v61, %v402_v29  ;;  %v3698_v36 = vmul.u32.u64.high %v3632_v61, %v402_v29, %v3697_v34  ;;  %v625_v39 = vshrl.u32 %v624_v28, 30  ;;  %v394_v11 = vsel %vm388_vm8, %v391_v19, %v393_v22 }
  0xbe   : > { %v679_v40 = vsel %vm678_vm11, %v677_v25, 0  ;;  %v413_v43 = vadd.s32 1, %v3693_v31  ;;  %v3707_v44 = vadd.f32 %v3602_v27, %v3628_v58  ;;  %v410_v46 = vmul.u32 %v3632_v61, %v394_v11 }
  0xbf   : > { %v681_v41 = vand.u32 31, %v679_v40  ;;  %v626_v42 = vshll.u32 %v625_v39, 30  ;;  %vm412_vm12 = vc.u32 %v3698_v36, %v3692_v30  ;;  %v675_v47 = vor.u32 8388608, %v674_v38 }
  0xc0   : > { %v414_v10 = vsel %vm412_vm12, %v413_v43, %v3693_v31  ;;  %v619_v54 = vadd.s32 %v3665_v50, %v3662_v49  ;;  %v459_v55 = vand.u32 2147483647, %v3707_v44  ;;  %v3720_v61 = vmul.f32 %v3597_v26, %v200_v51 }
  0xc1   : > { %v682_v48 = vsub.s32 32, %v681_v41  ;;  %v3712_v52 = vsub.s32 %v623_v18, %v626_v42  ;;  %v415_v53 = vadd.s32 %v414_v10, %v410_v46  ;;  %v3723_v63 = vshll.u32 %v675_v47, 8 }
  0xc2   : > { %v462_v1 = vand.u32 2139095040, %v3707_v44  ;;  %v3727_v5 = vshrl.u32 %v679_v40, 5  ;;  %v649_v7 = vsub.s32 4, %v625_v39  ;;  %v684_v12 = vshll.u32 %v3491_v0, %v681_v41 }
  0xc3   : > { %v629_v58 = vsub.s32 0, %v3712_v52  ;;  %v416_v57 = vadd.s32 536870912, %v415_v53  ;;  %v685_v59 = vshrl.u32 %v3492_v2, %v682_v48  ;;  %v688_v49 = vshrl.u32 %v3493_v4, %v682_v48 }
  0xc4   : > { %v691_v50 = vshrl.u32 %v3494_v6, %v682_v48  ;;  %v694_v13 = vshrl.u32 %v3495_v8, %v682_v48  ;;  %v687_v56 = vshll.u32 %v3492_v2, %v681_v41  ;;  %v690_v15 = vshll.u32 %v3493_v4, %v681_v41 }
  0xc5   : > { %v3072_v3 = vmin.u32 %v629_v58, %v3712_v52  ;;  %v417_v9 = vshrl.u32 %v416_v57, 30  ;;  %v697_v16 = vshrl.u32 %v3496_v17, %v682_v48  ;;  %v686_v18 = vor.u32 %v685_v59, %v684_v12 }
  0xc6   : > { %v693_v19 = vshll.u32 %v3494_v6, %v681_v41  ;;  %v463_v20 = vshrl.u32 %v462_v1, 23  ;;  %v689_v22 = vor.u32 %v688_v49, %v687_v56  ;;  %v692_v23 = vor.u32 %v691_v50, %v690_v15 }
  0xc7   : > { %v631_v14 = vclz %v3072_v3  ;;  %v418_v60 = vshll.u32 %v417_v9, 30  ;;  %v696_v24 = vshll.u32 %v3495_v8, %v681_v41  ;;  %v3740_v25 = vsel %vm565_vm13, %v649_v7, %v625_v39 }
  0xc8   : > { %v683_v29 = vshrl.u32 %v3491_v0, %v682_v48  ;;  %v695_v31 = vor.u32 %v694_v13, %v693_v19  ;;  %v441_v34 = vsub.s32 4, %v417_v9  ;;  %vm699_vm0 = vcmp.lt.s32.totalorder %v3727_v5, 1 }
  0xc9   : > { %v3073_v21 = vadd.s32 4294967294, %v631_v14  ;;  %v3743_v28 = vsub.s32 %v415_v53, %v418_v60  ;;  %v698_v38 = vor.u32 %v697_v16, %v696_v24  ;;  %vm701_vm2 = vcmp.lt.s32.totalorder %v3727_v5, 3 }
  0xca   : > { %vm702_vm3 = vcmp.lt.s32.totalorder %v3727_v5, 4  ;;  %vm3758_vm4 = vcmp.le.f32.partialorder %v355_v37, 0.7853982  ;;  %v707_v35 = vsel %vm699_vm0, %v686_v18, %v689_v22  ;;  %v711_v10 = vsel %vm699_vm0, %v689_v22, %v692_v23 }
  0xcb   : > { %vm3074_vm15 = vcmp.lt.s32.totalorder %v3073_v21, 0  ;;  %v421_v40 = vsub.s32 0, %v3743_v28  ;;  %v704_v46 = vsel %vm702_vm3, %v692_v23, 2102212464  ;;  %v708_v51 = vsel %vm702_vm3, %v695_v31, 920167782 }
  0xcc   : > { %v634_v39 = vsel %vm3074_vm15, 0, %v3073_v21  ;;  %v709_v37 = vsel %vm701_vm2, %v692_v23, %v708_v51  ;;  %v712_v57 = vsel %vm702_vm3, %v698_v38, 1326507024  ;;  %vm700_vm5 = vcmp.lt.s32.totalorder %v3727_v5, 2 }
  0xcd   : > { %v635_v41 = vsub.s32 32, %v634_v39  ;;  %v639_v42 = vsub.s32 4294967266, %v634_v39  ;;  %v636_v47 = vshll.u32 %v3712_v52, %v634_v39  ;;  %v3064_v48 = vmin.u32 %v421_v40, %v3743_v28 }
  0xce   : > { %v703_v1 = vsel %vm699_vm0, %v683_v29, %v686_v18  ;;  %v705_v52 = vsel %vm701_vm2, %v689_v22, %v704_v46  ;;  %v710_v50 = vsel %vm700_vm5, %v707_v35, %v709_v37  ;;  %v442_v15 = vsel %vm357_vm14, %v441_v34, %v417_v9  ;;  %v195_v35 = vpop.permute.xlu0 %194 }
  0xcf   : > { %v637_v53 = vshrl.u32 %v619_v54, %v635_v41  ;;  %v640_v58 = vadd.s32 127, %v639_v42  ;;  %v423_v59 = vclz %v3064_v48  ;;  %v713_v54 = vsel %vm701_vm2, %v695_v31, %v712_v57 }
  0xd0   : > { %v714_v12 = vsel %vm700_vm5, %v711_v10, %v713_v54  ;;  %v3778_v13 = vmul.u32.u64.low %v3723_v63, %v710_v50  ;;  %v3779_v14 = vmul.u32.u64.high %v3723_v63, %v710_v50, %v3778_v13  ;;  %v411_v18 = vadd.s32 %v3692_v30, %v3698_v36 }
  0xd1   : > { %v638_v3 = vor.u32 %v637_v53, %v636_v47  ;;  %v641_v49 = vshll.u32 %v640_v58, 23  ;;  %v3065_v7 = vadd.s32 4294967294, %v423_v59  ;;  %v706_v5 = vsel %vm700_vm5, %v703_v1, %v705_v52 }
  0xd2   : > { %v3784_v16 = vmul.u32.u64.low %v3723_v63, %v714_v12  ;;  %v3785_v60 = vmul.u32.u64.high %v3723_v63, %v714_v12, %v3784_v16  ;;  %v3067_v19 = vadd.s32 4294967169, %v463_v20  ;;  %v652_v23 = vsel %vm3749_vm1, 0, %v3740_v25 }
  0xd3   : > { %v642_v56 = vor.u32 4788187, %v641_v49  ;;  %vm3066_vm6 = vcmp.lt.s32.totalorder %v3065_v7, 0  ;;  %v645_v22 = vcvt.s32.f32 %v638_v3  ;;  %v444_v9 = vsel %vm3758_vm4, 0, %v442_v15 }
  0xd4   : > { %v426_v24 = vsel %vm3066_vm6, 0, %v3065_v7  ;;  %v725_v34 = vadd.s32 1, %v3779_v14  ;;  %v722_v30 = vmul.u32 %v3723_v63, %v706_v5  ;;  %vm724_vm7 = vc.u32 %v3785_v60, %v3778_v13 }
  0xd5   : > { %v643_v21 = vand.u32 2147483647, %v642_v56  ;;  %v427_v29 = vsub.s32 32, %v426_v24  ;;  %v431_v31 = vsub.s32 4294967266, %v426_v24  ;;  %v469_v36 = vadd.s32 1, %v3067_v19 }
  0xd6   : > { %v428_v20 = vshll.u32 %v3743_v28, %v426_v24  ;;  %v726_v25 = vsel %vm724_vm7, %v725_v34, %v3779_v14  ;;  %v656_v42 = vadd.s32 3, %v652_v23  ;;  %v448_v51 = vadd.s32 3, %v444_v9 }
  0xd7   : > { %v646_v38 = vmul.f32 %v645_v22, %v643_v21  ;;  %v429_v39 = vshrl.u32 %v411_v18, %v427_v29  ;;  %v432_v40 = vadd.s32 127, %v431_v31  ;;  %v727_v46 = vadd.s32 %v726_v25, %v722_v30 }
  0xd8   : > { %vm470_vm8 = vcmp.gt.s32.totalorder %v469_v36, 0  ;;  %v466_v28 = vand.u32 8388607, %v459_v55  ;;  %v3807_v59 = vmul.f32 %v3597_v26, %v195_v35  ;;  %v3809_v1 = vand.u32 3, %v656_v42 }
  0xd9   : > { %v647_v41 = vxor.u32 2147483648, %v646_v38  ;;  %v430_v47 = vor.u32 %v429_v39, %v428_v20  ;;  %v433_v48 = vshll.u32 %v432_v40, 23  ;;  %v471_v10 = vsel %vm470_vm8, %v469_v36, 0 }
  0xda   : > { %v728_v53 = vadd.s32 536870912, %v727_v46  ;;  %v473_v58 = vand.u32 31, %v471_v10  ;;  %vm669_vm9 = vcmp.lt.s32.totalorder %v3622_v45, 0  ;;  %v3812_v54 = vand.u32 3, %v448_v51 }
  0xdb   : > { %v648_v63 = vsel %vm565_vm13, %v647_v41, %v646_v38  ;;  %v434_v57 = vor.u32 4788187, %v433_v48  ;;  %v437_v50 = vcvt.s32.f32 %v430_v47  ;;  %v467_v12 = vor.u32 8388608, %v466_v28 }
  0xdc   : > { %v651_v37 = vsel %vm3749_vm1, %v3607_v32, %v648_v63  ;;  %v729_v52 = vshrl.u32 %v728_v53, 30  ;;  %v474_v3 = vsub.s32 32, %v473_v58  ;;  %v3817_v14 = vadd.f32 %v3602_v27, %v3720_v61 }
  0xdd   : > { %3318 = vcosq.f32 %v651_v37  ;;  %v435_v49 = vand.u32 2147483647, %v434_v57  ;;  %v3820_v15 = vadd.s32 %v3778_v13, %v3785_v60  ;;  %vm662_vm10 = vcmp.eq.s32.totalorder %v3809_v1, 2 }
  0xde   : > { %3320 = vsinq.f32 %v651_v37  ;;  %v730_v7 = vshll.u32 %v729_v52, 30  ;;  %v477_v11 = vshrl.u32 %v3492_v2, %v474_v3  ;;  %v480_v16 = vshrl.u32 %v3493_v4, %v474_v3 }
  0xdf   : > { %v438_v56 = vmul.f32 %v437_v50, %v435_v49  ;;  %v483_v18 = vshrl.u32 %v3494_v6, %v474_v3  ;;  %v3827_v19 = vshrl.u32 %v471_v10, 5  ;;  %v476_v21 = vshll.u32 %v3491_v0, %v473_v58 }
  0xe0   : > { %v3825_v5 = vsub.s32 %v727_v46, %v730_v7  ;;  %v486_v61 = vshrl.u32 %v3495_v8, %v474_v3  ;;  %vm659_vm11 = vcmp.eq.s32.totalorder %v3809_v1, 0  ;;  %v753_v13 = vsub.s32 4, %v729_v52 }
  0xe1   : > { %v439_v22 = vxor.u32 2147483648, %v438_v56  ;;  %v479_v60 = vshll.u32 %v3492_v2, %v473_v58  ;;  %v482_v23 = vshll.u32 %v3493_v4, %v473_v58  ;;  %vm658_vm12 = vcmp.lt.s32.totalorder %v3809_v1, 2 }
  0xe2   : > { %v733_v24 = vsub.s32 0, %v3825_v5  ;;  %v478_v29 = vor.u32 %v477_v11, %v476_v21  ;;  %v485_v31 = vshll.u32 %v3494_v6, %v473_v58  ;;  %v3837_v9 = vshll.u32 %v467_v12, 8 }
  0xe3   : > { %vm655_vm13 = vweird.f32 %v3607_v32  ;;  %v440_v34 = vsel %vm357_vm14, %v439_v22, %v438_v56  ;;  %v481_v38 = vor.u32 %v480_v16, %v479_v60  ;;  %v484_v30 = vor.u32 %v483_v18, %v482_v23 }
  0xe4   : > { %v489_v36 = vshrl.u32 %v3496_v17, %v474_v3  ;;  %v443_v20 = vsel %vm3758_vm4, %v3610_v33, %v440_v34  ;;  %v3076_v39 = vmin.u32 %v733_v24, %v3825_v5  ;;  %v487_v40 = vor.u32 %v486_v61, %v485_v31 }
  0xe5   : > { %v488_v25 = vshll.u32 %v3495_v8, %v473_v58  ;;  %3322 = vcosq.f32 %v443_v20  ;;  %v3851_v41 = vsel %vm669_vm9, %v753_v13, %v729_v52  ;;  %v475_v42 = vshrl.u32 %v3491_v0, %v474_v3 }
  0xe6   : > { %vm491_vm14 = vcmp.lt.s32.totalorder %v3827_v19, 1  ;;  %3324 = vsinq.f32 %v443_v20  ;;  %vm3861_vm15 = vcmp.le.f32.partialorder %v667_v62, 0.7853982  ;;  %v735_v35 = vclz %v3076_v39 }
  0xe7   : > { %v3319_v46 = vpop.eup %3318  ;;  %v490_v47 = vor.u32 %v489_v36, %v488_v25  ;;  %vm492_vm0 = vcmp.lt.s32.totalorder %v3827_v19, 2  ;;  %vm493_vm1 = vcmp.lt.s32.totalorder %v3827_v19, 3  ;;  %vm494_vm2 = vcmp.lt.s32.totalorder %v3827_v19, 4 }
  0xe8   : > { %v3321_v48 = vpop.eup %3320  ;;  %v663_v51 = vxor.u32 2147483648, %v3319_v46  ;;  %v499_v10 = vsel %vm491_vm14, %v478_v29, %v481_v38  ;;  %v3077_v53 = vadd.s32 4294967294, %v735_v35  ;;  %v496_v28 = vsel %vm494_vm2, %v484_v30, 2102212464 }
  0xe9   : > { %v660_v63 = vxor.u32 2147483648, %v3321_v48  ;;  %v500_v62 = vsel %vm494_vm2, %v487_v40, 920167782  ;;  %v495_v37 = vsel %vm491_vm14, %v475_v42, %v478_v29  ;;  %v503_v52 = vsel %vm491_vm14, %v481_v38, %v484_v30 }
  0xea   : > { %v664_v58 = vsel %vm662_vm10, %v663_v51, %v3321_v48  ;;  %v501_v57 = vsel %vm493_vm1, %v484_v30, %v500_v62  ;;  %vm3078_vm3 = vcmp.lt.s32.totalorder %v3077_v53, 0  ;;  %v504_v50 = vsel %vm494_vm2, %v490_v47, 1326507024 }
  0xeb   : > { %v661_v3 = vsel %vm659_vm11, %v3319_v46, %v660_v63  ;;  %v502_v49 = vsel %vm492_vm0, %v499_v10, %v501_v57  ;;  %v738_v12 = vsel %vm3078_vm3, 0, %v3077_v53  ;;  %v497_v11 = vsel %vm493_vm1, %v481_v38, %v496_v28 }
  0xec   : > { %v665_v7 = vsel %vm658_vm12, %v661_v3, %v664_v58  ;;  %v505_v56 = vsel %vm493_vm1, %v487_v40, %v504_v50  ;;  %vm447_vm4 = vweird.f32 %v3610_v33  ;;  %v739_v18 = vsub.s32 32, %v738_v12 }
  0xed   : > { %v666_v16 = vsel %vm655_vm13, nan, %v665_v7  ;;  %v740_v21 = vshll.u32 %v3825_v5, %v738_v12  ;;  %v743_v61 = vsub.s32 4294967266, %v738_v12  ;;  %v506_v1 = vsel %vm492_vm0, %v503_v52, %v505_v56 }
  0xee   : > { %2957 = vst [vmem:[%s3893_s4 + $0x10] sm:$0xff] %v666_v16  ;;  %v3899_v22 = vmul.u32.u64.low %v3837_v9, %v502_v49  ;;  %v3900_v13 = vmul.u32.u64.high %v3837_v9, %v502_v49, %v3899_v22  ;;  %v878_v32 = vand.u32 2139095040, %v3817_v14  ;;  %v741_v60 = vshrl.u32 %v3820_v15, %v739_v18 }
  0xef   : > { %v744_v23 = vadd.s32 127, %v743_v61  ;;  %v3906_v5 = vmul.u32.u64.low %v3837_v9, %v506_v1  ;;  %v3907_v24 = vmul.u32.u64.high %v3837_v9, %v506_v1, %v3906_v5  ;;  %v3323_v29 = vpop.eup %3322  ;;  %vm450_vm5 = vcmp.lt.s32.totalorder %v3812_v54, 2 }
  0xf0   : > { %vm454_vm6 = vcmp.eq.s32.totalorder %v3812_v54, 2  ;;  %v756_v31 = vsel %vm3861_vm15, 0, %v3851_v41  ;;  %v879_v34 = vshrl.u32 %v878_v32, 23  ;;  %v3325_v38 = vpop.eup %3324  ;;  %v455_v30 = vxor.u32 2147483648, %v3323_v29 }
  0xf1   : > { %v742_v36 = vor.u32 %v741_v60, %v740_v21  ;;  %v745_v20 = vshll.u32 %v744_v23, 23  ;;  %v498_v15 = vsel %vm492_vm0, %v495_v37, %v497_v11  ;;  %v452_v39 = vxor.u32 2147483648, %v3325_v38 }
  0xf2   : > { %v517_v40 = vadd.s32 1, %v3900_v13  ;;  %v875_v25 = vand.u32 2147483647, %v3817_v14  ;;  %v3083_v42 = vadd.s32 4294967169, %v879_v34  ;;  %vm451_vm7 = vcmp.eq.s32.totalorder %v3812_v54, 0 }
  0xf3   : > { %v456_v46 = vsel %vm454_vm6, %v455_v30, %v3325_v38  ;;  %v746_v35 = vor.u32 4788187, %v745_v20  ;;  %v760_v41 = vadd.s32 3, %v756_v31  ;;  %v453_v47 = vsel %vm451_vm7, %v3323_v29, %v452_v39 }
  0xf4   : > { %v514_v48 = vmul.u32 %v3837_v9, %v498_v15  ;;  %vm516_vm8 = vc.u32 %v3907_v24, %v3899_v22  ;;  %v885_v19 = vadd.s32 1, %v3083_v42  ;;  %v457_v51 = vsel %vm450_vm5, %v453_v47, %v456_v46 }
  0xf5   : > { %v747_v10 = vand.u32 2147483647, %v746_v35  ;;  %v749_v63 = vcvt.s32.f32 %v742_v36  ;;  %v518_v53 = vsel %vm516_vm8, %v517_v40, %v3900_v13  ;;  %v458_v28 = vsel %vm447_vm4, nan, %v457_v51 }
  0xf6   : > { %v519_v62 = vadd.s32 %v518_v53, %v514_v48  ;;  %v882_v58 = vand.u32 8388607, %v875_v25  ;;  %vm886_vm10 = vcmp.gt.s32.totalorder %v885_v19, 0  ;;  %2955 = vst [vmem:[%s3893_s4] sm:$0xff] %v458_v28  ;;  %v3932_v57 = vadd.f32 %v3602_v27, %v3807_v59 }
  0xf7   : > { %v750_v9 = vmul.f32 %v749_v63, %v747_v10  ;;  %v887_v37 = vsel %vm886_vm10, %v885_v19, 0  ;;  %v3934_v49 = vand.u32 3, %v760_v41  ;;  %v515_v20 = vadd.s32 %v3899_v22, %v3907_v24 }
  0xf8   : > { %v520_v54 = vadd.s32 536870912, %v519_v62  ;;  %v889_v52 = vand.u32 31, %v887_v37  ;;  %v883_v33 = vor.u32 8388608, %v882_v58  ;;  %v3940_v11 = vshrl.u32 %v887_v37, 5 }
  0xf9   : > { %v751_v3 = vxor.u32 2147483648, %v750_v9  ;;  %v774_v16 = vand.u32 2139095040, %v3932_v57  ;;  %v771_v39 = vand.u32 2147483647, %v3932_v57  ;;  %vm763_vm11 = vcmp.eq.s32.totalorder %v3934_v49, 0 }
  0xfa   : > { %v3936_v50 = vshrl.u32 %v520_v54, 30  ;;  %v890_v7 = vsub.s32 32, %v889_v52  ;;  %v892_v56 = vshll.u32 %v3491_v0, %v889_v52  ;;  %v895_v21 = vshll.u32 %v3492_v2, %v889_v52 }
  0xfb   : > { %v752_v12 = vsel %vm669_vm9, %v751_v3, %v750_v9  ;;  %v898_v61 = vshll.u32 %v3493_v4, %v889_v52  ;;  %v901_v23 = vshll.u32 %v3494_v6, %v889_v52  ;;  %v904_v31 = vshll.u32 %v3495_v8, %v889_v52 }
  0xfc   : > { %v755_v59 = vsel %vm3861_vm15, %v3622_v45, %v752_v12  ;;  %v522_v18 = vshll.u32 %v3936_v50, 30  ;;  %v893_v1 = vshrl.u32 %v3492_v2, %v890_v7  ;;  %v896_v13 = vshrl.u32 %v3493_v4, %v890_v7 }
  0xfd   : > { %3326 = vcosq.f32 %v755_v59  ;;  %v899_v32 = vshrl.u32 %v3494_v6, %v890_v7  ;;  %v902_v43 = vshrl.u32 %v3495_v8, %v890_v7  ;;  %v905_v36 = vshrl.u32 %v3496_v17, %v890_v7 }
  0xfe   : > { %3328 = vsinq.f32 %v755_v59  ;;  %v3953_v60 = vsub.s32 %v519_v62, %v522_v18  ;;  %v894_v5 = vor.u32 %v893_v1, %v892_v56  ;;  %v897_v29 = vor.u32 %v896_v13, %v895_v21 }
  0xff   : > { %v900_v38 = vor.u32 %v899_v32, %v898_v61  ;;  %v903_v30 = vor.u32 %v902_v43, %v901_v23  ;;  %vm766_vm9 = vcmp.eq.s32.totalorder %v3934_v49, 2  ;;  %v3963_v15 = vshll.u32 %v883_v33, 8 }
 0x100   : > { %v525_v34 = vsub.s32 0, %v3953_v60  ;;  %v775_v40 = vshrl.u32 %v774_v16, 23  ;;  %vm461_vm12 = vcmp.lt.s32.totalorder %v3707_v44, 0  ;;  %v906_v46 = vor.u32 %v905_v36, %v904_v31 }
 0x101   : > { %vm907_vm13 = vcmp.lt.s32.totalorder %v3940_v11, 1  ;;  %vm910_vm14 = vcmp.lt.s32.totalorder %v3940_v11, 4  ;;  %vm762_vm15 = vcmp.lt.s32.totalorder %v3934_v49, 2  ;;  %v545_v22 = vsub.s32 4, %v3936_v50 }
 0x102   : > { %v3068_v42 = vmin.u32 %v525_v34, %v3953_v60  ;;  %v891_v24 = vshrl.u32 %v3491_v0, %v890_v7  ;;  %v915_v35 = vsel %vm907_vm13, %v894_v5, %v897_v29  ;;  %v916_v41 = vsel %vm910_vm14, %v903_v30, 920167782 }
 0x103   : > { %vm759_vm0 = vweird.f32 %v3622_v45  ;;  %vm909_vm1 = vcmp.lt.s32.totalorder %v3940_v11, 3  ;;  %v912_v48 = vsel %vm910_vm14, %v900_v38, 2102212464  ;;  %v919_v19 = vsel %vm907_vm13, %v897_v29, %v900_v38 }
 0x104   : > { %v527_v47 = vclz %v3068_v42  ;;  %vm908_vm2 = vcmp.lt.s32.totalorder %v3940_v11, 2  ;;  %v917_v51 = vsel %vm909_vm1, %v900_v38, %v916_v41  ;;  %v920_v10 = vsel %vm910_vm14, %v906_v46, 1326507024 }
 0x105   : > { %v3079_v63 = vadd.s32 4294967169, %v775_v40  ;;  %v911_v28 = vsel %vm907_vm13, %v891_v24, %v894_v5  ;;  %v918_v62 = vsel %vm908_vm2, %v915_v35, %v917_v51  ;;  %v921_v58 = vsel %vm909_vm1, %v903_v30, %v920_v10 }
 0x106   : > { %v3069_v53 = vadd.s32 4294967294, %v527_v47  ;;  %v913_v37 = vsel %vm909_vm1, %v897_v29, %v912_v48  ;;  %v922_v54 = vsel %vm908_vm2, %v919_v19, %v921_v58  ;;  %v3998_v18 = vand.u32 8388607, %v771_v39 }
 0x107   : > { %v3327_v9 = vpop.eup %3326  ;;  %v3988_v52 = vmul.u32.u64.low %v3963_v15, %v918_v62  ;;  %v3989_v3 = vmul.u32.u64.high %v3963_v15, %v918_v62, %v3988_v52  ;;  %v3993_v12 = vmul.u32.u64.low %v3963_v15, %v922_v54  ;;  %v3994_v56 = vmul.u32.u64.high %v3963_v15, %v922_v54, %v3993_v12 }
 0x108   : > { %v3329_v33 = vpop.eup %3328  ;;  %v767_v7 = vxor.u32 2147483648, %v3327_v9  ;;  %vm3070_vm3 = vcmp.lt.s32.totalorder %v3069_v53, 0  ;;  %v781_v21 = vadd.s32 1, %v3079_v63  ;;  %v914_v32 = vsel %vm908_vm2, %v911_v28, %v913_v37  ;;  %v205_v63 = vpop.permute.xlu0 %204 }
 0x109   : > { %v764_v16 = vxor.u32 2147483648, %v3329_v33  ;;  %v530_v59 = vsel %vm3070_vm3, 0, %v3069_v53  ;;  %v546_v43 = vsel %vm461_vm12, %v545_v22, %v3936_v50  ;;  %v933_v5 = vadd.s32 1, %v3989_v3  ;;  %v210_v50 = vpop.permute.xlu1 %209 }
 0x10a   : > { %v768_v61 = vsel %vm766_vm9, %v767_v7, %v3329_v33  ;;  %v531_v1 = vsub.s32 32, %v530_v59  ;;  %v535_v13 = vsub.s32 4294967266, %v530_v59  ;;  %vm782_vm4 = vcmp.gt.s32.totalorder %v781_v21, 0 }
 0x10b   : > { %v765_v23 = vsel %vm763_vm11, %v3327_v9, %v764_v16  ;;  %v532_v31 = vshll.u32 %v3953_v60, %v530_v59  ;;  %v930_v30 = vmul.u32 %v3963_v15, %v914_v32  ;;  %vm932_vm5 = vc.u32 %v3994_v56, %v3988_v52 }
 0x10c   : > { %v769_v29 = vsel %vm762_vm15, %v765_v23, %v768_v61  ;;  %v533_v34 = vshrl.u32 %v515_v20, %v531_v1  ;;  %v536_v38 = vadd.s32 127, %v535_v13  ;;  %v783_v36 = vsel %vm782_vm4, %v781_v21, 0 }
 0x10d   : > { %v770_v11 = vsel %vm759_vm0, nan, %v769_v29  ;;  %v934_v49 = vsel %vm932_vm5, %v933_v5, %v3989_v3  ;;  %vm4022_vm6 = vcmp.le.f32.partialorder %v459_v55, 0.7853982  ;;  %v785_v20 = vand.u32 31, %v783_v36 }
 0x10e   : > { %2958 = vst [vmem:[%s3893_s4 + $0x18] sm:$0xff] %v770_v11  ;;  %v534_v40 = vor.u32 %v533_v34, %v532_v31  ;;  %v537_v42 = vshll.u32 %v536_v38, 23  ;;  %v935_v45 = vadd.s32 %v934_v49, %v930_v30  ;;  %v548_v15 = vsel %vm4022_vm6, 0, %v546_v43 }
 0x10f   : > { %v779_v22 = vor.u32 8388608, %v3998_v18  ;;  %v308_v24 = vmul.f32 %v3597_v26, %v210_v50  ;;  %v784_v47 = vshrl.u32 %v783_v36, 5  ;;  %v786_v48 = vsub.s32 32, %v785_v20 }
 0x110   : > { %v538_v46 = vor.u32 4788187, %v537_v42  ;;  %v541_v35 = vcvt.s32.f32 %v534_v40  ;;  %v936_v41 = vadd.s32 536870912, %v935_v45  ;;  %v788_v55 = vshll.u32 %v3491_v0, %v785_v20 }
 0x111   : > { %v791_v51 = vshll.u32 %v3492_v2, %v785_v20  ;;  %v794_v10 = vshll.u32 %v3493_v4, %v785_v20  ;;  %v789_v28 = vshrl.u32 %v3492_v2, %v786_v48  ;;  %v792_v62 = vshrl.u32 %v3493_v4, %v786_v48 }
 0x112   : > { %v539_v19 = vand.u32 2147483647, %v538_v46  ;;  %v937_v53 = vshrl.u32 %v936_v41, 30  ;;  %v797_v58 = vshll.u32 %v3494_v6, %v785_v20  ;;  %v795_v37 = vshrl.u32 %v3494_v6, %v786_v48 }
 0x113   : > { %v798_v54 = vshrl.u32 %v3495_v8, %v786_v48  ;;  %v801_v3 = vshrl.u32 %v3496_v17, %v786_v48  ;;  %v790_v7 = vor.u32 %v789_v28, %v788_v55  ;;  %v800_v12 = vshll.u32 %v3495_v8, %v785_v20 }
 0x114   : > { %v542_v9 = vmul.f32 %v541_v35, %v539_v19  ;;  %v938_v33 = vshll.u32 %v937_v53, 30  ;;  %v4041_v16 = vmul.f32 %v3597_v26, %v205_v63  ;;  %vm877_vm7 = vcmp.lt.s32.totalorder %v3817_v14, 0 }
 0x115   : > { %v793_v18 = vor.u32 %v792_v62, %v791_v51  ;;  %v796_v21 = vor.u32 %v795_v37, %v794_v10  ;;  %v799_v61 = vor.u32 %v798_v54, %v797_v58  ;;  %v552_v1 = vadd.s32 3, %v548_v15 }
 0x116   : > { %v543_v59 = vxor.u32 2147483648, %v542_v9  ;;  %v4044_v13 = vsub.s32 %v935_v45, %v938_v33  ;;  %vm803_vm8 = vcmp.lt.s32.totalorder %v784_v47, 1  ;;  %v4047_v32 = vadd.f32 %v3602_v27, %v308_v24 }
 0x117   : > { %v787_v43 = vshrl.u32 %v3491_v0, %v786_v48  ;;  %v802_v26 = vor.u32 %v801_v3, %v800_v12  ;;  %vm804_vm10 = vcmp.lt.s32.totalorder %v784_v47, 2  ;;  %vm805_vm9 = vcmp.lt.s32.totalorder %v784_v47, 3 }
 0x118   : > { %v544_v23 = vsel %vm461_vm12, %v543_v59, %v542_v9  ;;  %v941_v29 = vsub.s32 0, %v4044_v13  ;;  %vm806_vm11 = vcmp.lt.s32.totalorder %v784_v47, 4  ;;  %vm4058_vm13 = vcmp.le.f32.partialorder %v875_v25, 0.7853982 }
 0x119   : > { %v547_v5 = vsel %vm4022_vm6, %v3707_v44, %v544_v23  ;;  %v808_v31 = vsel %vm806_vm11, %v796_v21, 2102212464  ;;  %v811_v34 = vsel %vm803_vm8, %v790_v7, %v793_v18  ;;  %v812_v38 = vsel %vm806_vm11, %v799_v61, 920167782 }
 0x11a   : > { %3330 = vcosq.f32 %v547_v5  ;;  %v3084_v11 = vmin.u32 %v941_v29, %v4044_v13  ;;  %v961_v30 = vsub.s32 4, %v937_v53  ;;  %v813_v36 = vsel %vm805_vm9, %v796_v21, %v812_v38 }
 0x11b   : > { %3332 = vsinq.f32 %v547_v5  ;;  %v814_v50 = vsel %vm804_vm10, %v811_v34, %v813_v36  ;;  %v815_v40 = vsel %vm803_vm8, %v793_v18, %v796_v21  ;;  %v816_v42 = vsel %vm806_vm11, %v802_v26, 1326507024 }
 0x11c   : > { %v819_v49 = vshll.u32 %v779_v22, 8  ;;  %v553_v25 = vand.u32 3, %v552_v1  ;;  %v943_v60 = vclz %v3084_v11  ;;  %v807_v45 = vsel %vm803_vm8, %v787_v43, %v790_v7 }
 0x11d   : > { %v809_v20 = vsel %vm805_vm9, %v793_v18, %v808_v31  ;;  %v817_v46 = vsel %vm805_vm9, %v799_v61, %v816_v42  ;;  %v1086_v35 = vand.u32 2139095040, %v4047_v32  ;;  %v962_v48 = vsel %vm877_vm7, %v961_v30, %v937_v53 }
 0x11e   : > { %v4070_v15 = vmul.u32.u64.low %v819_v49, %v814_v50  ;;  %v4071_v24 = vmul.u32.u64.high %v819_v49, %v814_v50, %v4070_v15  ;;  %v3085_v41 = vadd.s32 4294967294, %v943_v60  ;;  %v818_v22 = vsel %vm804_vm10, %v815_v40, %v817_v46 }
 0x11f   : > { %v1083_v19 = vand.u32 2147483647, %v4047_v32  ;;  %v810_v55 = vsel %vm804_vm10, %v807_v45, %v809_v20  ;;  %v4080_v51 = vmul.u32.u64.low %v819_v49, %v818_v22  ;;  %v4081_v10 = vmul.u32.u64.high %v819_v49, %v818_v22, %v4080_v51  ;;  %v4104_v45 = vld [vmem:[%s5672_s1 + $0x1] ss:$0 sm:$0xff] }
 0x120   : > { %v1087_v63 = vshrl.u32 %v1086_v35, 23  ;;  %vm554_vm12 = vcmp.lt.s32.totalorder %v553_v25, 2  ;;  %vm555_vm14 = vcmp.eq.s32.totalorder %v553_v25, 0  ;;  %vm558_vm15 = vcmp.eq.s32.totalorder %v553_v25, 2 }
 0x121   : > { %vm3086_vm0 = vcmp.lt.s32.totalorder %v3085_v41, 0  ;;  %v931_v28 = vadd.s32 %v3988_v52, %v3994_v56  ;;  %v829_v53 = vadd.s32 1, %v4071_v24  ;;  %v964_v47 = vsel %vm4058_vm13, 0, %v962_v48 }
 0x122   : > { %v946_v62 = vsel %vm3086_vm0, 0, %v3085_v41  ;;  %v3091_v58 = vadd.s32 4294967169, %v1087_v63  ;;  %v826_v54 = vmul.u32 %v819_v49, %v810_v55  ;;  %vm828_vm1 = vc.u32 %v4081_v10, %v4070_v15 }
 0x123   : > { %v947_v9 = vsub.s32 32, %v946_v62  ;;  %v951_v37 = vsub.s32 4294967266, %v946_v62  ;;  %v948_v33 = vshll.u32 %v4044_v13, %v946_v62  ;;  %v1090_v7 = vand.u32 8388607, %v1083_v19 }
 0x124   : > { %v3331_v3 = vpop.eup %3330  ;;  %v1093_v52 = vadd.s32 1, %v3091_v58  ;;  %v830_v21 = vsel %vm828_vm1, %v829_v53, %v4071_v24  ;;  %v968_v1 = vadd.s32 3, %v964_v47  ;;  %vm551_vm3 = vweird.f32 %v3707_v44 }
 0x125   : > { %v3333_v56 = vpop.eup %3332  ;;  %v559_v12 = vxor.u32 2147483648, %v3331_v3  ;;  %v949_v59 = vshrl.u32 %v931_v28, %v947_v9  ;;  %v952_v18 = vadd.s32 127, %v951_v37  ;;  %v831_v23 = vadd.s32 %v830_v21, %v826_v54 }
 0x126   : > { %v556_v61 = vxor.u32 2147483648, %v3333_v56  ;;  %vm1094_vm2 = vcmp.gt.s32.totalorder %v1093_v52, 0  ;;  %v1091_v34 = vor.u32 8388608, %v1090_v7  ;;  %v4099_v60 = vand.u32 3, %v968_v1 }
 0x127   : > { %v560_v13 = vsel %vm558_vm15, %v559_v12, %v3333_v56  ;;  %v950_v43 = vor.u32 %v949_v59, %v948_v33  ;;  %v953_v26 = vshll.u32 %v952_v18, 23  ;;  %v1095_v5 = vsel %vm1094_vm2, %v1093_v52, 0 }
 0x128   : > { %v557_v29 = vsel %vm555_vm14, %v3331_v3, %v556_v61  ;;  %v832_v31 = vadd.s32 536870912, %v831_v23  ;;  %v1097_v38 = vand.u32 31, %v1095_v5  ;;  %v4108_v20 = vadd.f32 %v4104_v45, %v4041_v16 }
 0x129   : > { %v561_v11 = vsel %vm554_vm12, %v557_v29, %v560_v13  ;;  %v954_v30 = vor.u32 4788187, %v953_v26  ;;  %v957_v49 = vcvt.s32.f32 %v950_v43  ;;  %v4112_v24 = vshll.u32 %v1091_v34, 8 }
 0x12a   : > { %v562_v36 = vsel %vm551_vm3, nan, %v561_v11  ;;  %v833_v50 = vshrl.u32 %v832_v31, 30  ;;  %v1098_v40 = vsub.s32 32, %v1097_v38  ;;  %v1100_v25 = vshll.u32 %v3491_v0, %v1097_v38 }
 0x12b   : > { %2956 = vst [vmem:[%s3893_s4 + $0x8] sm:$0xff] %v562_v36  ;;  %v955_v42 = vand.u32 2147483647, %v954_v30  ;;  %v827_v55 = vadd.s32 %v4070_v15, %v4081_v10  ;;  %v1096_v16 = vshrl.u32 %v1095_v5, 5  ;;  %v1103_v63 = vshll.u32 %v3492_v2, %v1097_v38 }
 0x12c   : > { %v834_v44 = vshll.u32 %v833_v50, 30  ;;  %v1101_v46 = vshrl.u32 %v3492_v2, %v1098_v40  ;;  %v1104_v41 = vshrl.u32 %v3493_v4, %v1098_v40  ;;  %v1107_v48 = vshrl.u32 %v3494_v6, %v1098_v40 }
 0x12d   : > { %v958_v35 = vmul.f32 %v957_v49, %v955_v42  ;;  %v1110_v22 = vshrl.u32 %v3495_v8, %v1098_v40  ;;  %v1106_v53 = vshll.u32 %v3493_v4, %v1097_v38  ;;  %v1109_v58 = vshll.u32 %v3494_v6, %v1097_v38 }
 0x12e   : > { %v4119_v51 = vsub.s32 %v831_v23, %v834_v44  ;;  %v1102_v62 = vor.u32 %v1101_v46, %v1100_v25  ;;  %vm773_vm4 = vcmp.lt.s32.totalorder %v3932_v57, 0  ;;  %v1105_v37 = vor.u32 %v1104_v41, %v1103_v63 }
 0x12f   : > { %v959_v28 = vxor.u32 2147483648, %v958_v35  ;;  %v1112_v47 = vshll.u32 %v3495_v8, %v1097_v38  ;;  %v1113_v15 = vshrl.u32 %v3496_v17, %v1098_v40  ;;  %v1108_v54 = vor.u32 %v1107_v48, %v1106_v53 }
 0x130   : > { %v837_v9 = vsub.s32 0, %v4119_v51  ;;  %v1111_v3 = vor.u32 %v1110_v22, %v1109_v58  ;;  %v982_v33 = vand.u32 2139095040, %v4108_v20  ;;  %v857_v56 = vsub.s32 4, %v833_v50 }
 0x131   : > { %v960_v10 = vsel %vm877_vm7, %v959_v28, %v958_v35  ;;  %v1114_v12 = vor.u32 %v1113_v15, %v1112_v47  ;;  %v1099_v59 = vshrl.u32 %v3491_v0, %v1098_v40  ;;  %vm1115_vm5 = vcmp.lt.s32.totalorder %v1096_v16, 1 }
 0x132   : > { %v963_v7 = vsel %vm4058_vm13, %v3817_v14, %v960_v10  ;;  %v3080_v52 = vmin.u32 %v837_v9, %v4119_v51  ;;  %vm1116_vm6 = vcmp.lt.s32.totalorder %v1096_v16, 2  ;;  %vm1118_vm7 = vcmp.lt.s32.totalorder %v1096_v16, 4 }
 0x133   : > { %3334 = vcosq.f32 %v963_v7  ;;  %v1123_v21 = vsel %vm1115_vm5, %v1102_v62, %v1105_v37  ;;  %vm1117_vm8 = vcmp.lt.s32.totalorder %v1096_v16, 3  ;;  %v1120_v61 = vsel %vm1118_vm7, %v1108_v54, 2102212464 }
 0x134   : > { %3336 = vsinq.f32 %v963_v7  ;;  %v839_v18 = vclz %v3080_v52  ;;  %v1124_v1 = vsel %vm1118_vm7, %v1111_v3, 920167782  ;;  %v1127_v23 = vsel %vm1115_vm5, %v1105_v37, %v1108_v54 }
 0x135   : > { %v1119_v27 = vsel %vm1115_vm5, %v1099_v59, %v1102_v62  ;;  %v1125_v43 = vsel %vm1117_vm8, %v1108_v54, %v1124_v1  ;;  %v1128_v26 = vsel %vm1118_vm7, %v1114_v12, 1326507024  ;;  %v1121_v5 = vsel %vm1117_vm8, %v1105_v37, %v1120_v61  ;;  %v220_v37 = vpop.permute.xlu1 %219  ;;  %v4173_v12 = vld [vmem:[%s5672_s1] ss:$0 sm:$0xff] }
 0x136   : > { %v3081_v13 = vadd.s32 4294967294, %v839_v18  ;;  %v1126_v29 = vsel %vm1116_vm6, %v1123_v21, %v1125_v43  ;;  %v1129_v31 = vsel %vm1117_vm8, %v1111_v3, %v1128_v26  ;;  %v983_v34 = vshrl.u32 %v982_v33, 23  ;;  %v215_v18 = vpop.permute.xlu0 %214 }
 0x137   : > { %v1130_v38 = vsel %vm1116_vm6, %v1127_v23, %v1129_v31  ;;  %v4139_v11 = vmul.u32.u64.low %v4112_v24, %v1126_v29  ;;  %v4140_v30 = vmul.u32.u64.high %v4112_v24, %v1126_v29, %v4139_v11  ;;  %v858_v40 = vsel %vm773_vm4, %v857_v56, %v833_v50 }
 0x138   : > { %vm3082_vm10 = vcmp.lt.s32.totalorder %v3081_v13, 0  ;;  %v4146_v42 = vmul.u32.u64.low %v4112_v24, %v1130_v38  ;;  %v4147_v49 = vmul.u32.u64.high %v4112_v24, %v1130_v38, %v4146_v42  ;;  %v1122_v46 = vsel %vm1116_vm6, %v1119_v27, %v1121_v5 }
 0x139   : > { %v842_v36 = vsel %vm3082_vm10, 0, %v3081_v13  ;;  %v3087_v35 = vadd.s32 4294967169, %v983_v34  ;;  %vm970_vm9 = vcmp.lt.s32.totalorder %v4099_v60, 2  ;;  %vm971_vm11 = vcmp.eq.s32.totalorder %v4099_v60, 0 }
 0x13a   : > { %v843_v44 = vsub.s32 32, %v842_v36  ;;  %v847_v25 = vsub.s32 4294967266, %v842_v36  ;;  %vm4154_vm13 = vcmp.le.f32.partialorder %v771_v39, 0.7853982  ;;  %v844_v50 = vshll.u32 %v4119_v51, %v842_v36 }
 0x13b   : > { %v1141_v63 = vadd.s32 1, %v4140_v30  ;;  %v989_v28 = vadd.s32 1, %v3087_v35  ;;  %vm974_vm12 = vcmp.eq.s32.totalorder %v4099_v60, 2  ;;  %v860_v62 = vsel %vm4154_vm13, 0, %v858_v40 }
 0x13c   : > { %v845_v48 = vshrl.u32 %v827_v55, %v843_v44  ;;  %v848_v22 = vadd.s32 127, %v847_v25  ;;  %v1138_v53 = vmul.u32 %v4112_v24, %v1122_v46  ;;  %vm1140_vm14 = vc.u32 %v4147_v49, %v4139_v11 }
 0x13d   : > { %v3335_v16 = vpop.eup %3334  ;;  %v1142_v55 = vsel %vm1140_vm14, %v1141_v63, %v4140_v30  ;;  %v979_v10 = vand.u32 2147483647, %v4108_v20  ;;  %vm990_vm15 = vcmp.gt.s32.totalorder %v989_v28, 0  ;;  %v864_v33 = vadd.s32 3, %v860_v62 }
 0x13e   : > { %v3337_v39 = vpop.eup %3336  ;;  %v975_v58 = vxor.u32 2147483648, %v3335_v16  ;;  %v846_v9 = vor.u32 %v845_v48, %v844_v50  ;;  %v849_v51 = vshll.u32 %v848_v22, 23  ;;  %v1143_v15 = vadd.s32 %v1142_v55, %v1138_v53 }
 0x13f   : > { %v972_v47 = vxor.u32 2147483648, %v3337_v39  ;;  %v991_v24 = vsel %vm990_vm15, %v989_v28, 0  ;;  %v310_v59 = vmul.f32 %v4173_v12, %v220_v37  ;;  %vm967_vm0 = vweird.f32 %v3817_v14 }
 0x140   : > { %v976_v54 = vsel %vm974_vm12, %v975_v58, %v3337_v39  ;;  %v850_v3 = vor.u32 4788187, %v849_v51  ;;  %v1144_v52 = vadd.s32 536870912, %v1143_v15  ;;  %v993_v56 = vand.u32 31, %v991_v24 }
 0x141   : > { %v973_v7 = vsel %vm971_vm11, %v3335_v16, %v972_v47  ;;  %v853_v1 = vcvt.s32.f32 %v846_v9  ;;  %v986_v27 = vand.u32 8388607, %v979_v10  ;;  %v4182_v5 = vand.u32 3, %v864_v33 }
 0x142   : > { %v977_v21 = vsel %vm970_vm9, %v973_v7, %v976_v54  ;;  %v851_v61 = vand.u32 2147483647, %v850_v3  ;;  %v1145_v13 = vshrl.u32 %v1144_v52, 30  ;;  %v994_v43 = vsub.s32 32, %v993_v56 }
 0x143   : > { %v978_v23 = vsel %vm967_vm0, nan, %v977_v21  ;;  %v4185_v29 = vmul.f32 %v4173_v12, %v215_v18  ;;  %v996_v14 = vshll.u32 %v3491_v0, %v993_v56  ;;  %v4190_v34 = vadd.f32 %v4104_v45, %v310_v59 }
 0x144   : > { %2960 = vst [vmem:[%s3893_s4 + $0x28] sm:$0xff] %v978_v23  ;;  %v854_v26 = vmul.f32 %v853_v1, %v851_v61  ;;  %v1146_v31 = vshll.u32 %v1145_v13, 30  ;;  %v997_v60 = vshrl.u32 %v3492_v2, %v994_v43  ;;  %v1000_v30 = vshrl.u32 %v3493_v4, %v994_v43 }
 0x145   : > { %v1003_v36 = vshrl.u32 %v3494_v6, %v994_v43  ;;  %v1006_v40 = vshrl.u32 %v3495_v8, %v994_v43  ;;  %v987_v44 = vor.u32 8388608, %v986_v27  ;;  %v992_v25 = vshrl.u32 %v991_v24, 5 }
 0x146   : > { %v855_v38 = vxor.u32 2147483648, %v854_v26  ;;  %v4195_v42 = vsub.s32 %v1143_v15, %v1146_v31  ;;  %v999_v46 = vshll.u32 %v3492_v2, %v993_v56  ;;  %vm1085_vm1 = vcmp.lt.s32.totalorder %v4047_v32, 0 }
 0x147   : > { %v998_v50 = vor.u32 %v997_v60, %v996_v14  ;;  %v1002_v48 = vshll.u32 %v3493_v4, %v993_v56  ;;  %v1005_v22 = vshll.u32 %v3494_v6, %v993_v56  ;;  %v1008_v62 = vshll.u32 %v3495_v8, %v993_v56 }
 0x148   : > { %v856_v35 = vsel %vm773_vm4, %v855_v38, %v854_v26  ;;  %v1149_v28 = vsub.s32 0, %v4195_v42  ;;  %v1001_v16 = vor.u32 %v1000_v30, %v999_v46  ;;  %v1009_v58 = vshrl.u32 %v3496_v17, %v994_v43 }
 0x149   : > { %v859_v63 = vsel %vm4154_vm13, %v3932_v57, %v856_v35  ;;  %v1004_v53 = vor.u32 %v1003_v36, %v1002_v48  ;;  %v1007_v39 = vor.u32 %v1006_v40, %v1005_v22  ;;  %vm4211_vm2 = vcmp.le.f32.partialorder %v1083_v19, 0.7853982 }
 0x14a   : > { %3338 = vcosq.f32 %v859_v63  ;;  %v3092_v41 = vmin.u32 %v1149_v28, %v4195_v42  ;;  %v1169_v51 = vsub.s32 4, %v1145_v13  ;;  %v1027_v55 = vshll.u32 %v987_v44, 8 }
 0x14b   : > { %3340 = vsinq.f32 %v859_v63  ;;  %v995_v37 = vshrl.u32 %v3491_v0, %v994_v43  ;;  %v1010_v47 = vor.u32 %v1009_v58, %v1008_v62  ;;  %vm1011_vm3 = vcmp.lt.s32.totalorder %v992_v25, 1 }
 0x14c   : > { %vm1012_vm4 = vcmp.lt.s32.totalorder %v992_v25, 2  ;;  %v1151_v15 = vclz %v3092_v41  ;;  %vm1013_vm5 = vcmp.lt.s32.totalorder %v992_v25, 3  ;;  %vm1014_vm6 = vcmp.lt.s32.totalorder %v992_v25, 4 }
 0x14d   : > { %v1019_v54 = vsel %vm1011_vm3, %v998_v50, %v1001_v16  ;;  %v1016_v3 = vsel %vm1014_vm6, %v1004_v53, 2102212464  ;;  %v1020_v33 = vsel %vm1014_vm6, %v1007_v39, 920167782  ;;  %v1023_v24 = vsel %vm1011_vm3, %v1001_v16, %v1004_v53 }
 0x14e   : > { %v1024_v19 = vsel %vm1014_vm6, %v1010_v47, 1326507024  ;;  %vm867_vm7 = vcmp.eq.s32.totalorder %v4182_v5, 0  ;;  %v3093_v7 = vadd.s32 4294967294, %v1151_v15  ;;  %v1015_v52 = vsel %vm1011_vm3, %v995_v37, %v998_v50 }
 0x14f   : > { %v1021_v56 = vsel %vm1013_vm5, %v1004_v53, %v1020_v33  ;;  %v1025_v59 = vsel %vm1013_vm5, %v1007_v39, %v1024_v19  ;;  %v1017_v18 = vsel %vm1013_vm5, %v1001_v16, %v1016_v3  ;;  %v1294_v1 = vand.u32 2139095040, %v4190_v34 }
 0x150   : > { %v1022_v21 = vsel %vm1012_vm4, %v1019_v54, %v1021_v56  ;;  %v1026_v61 = vsel %vm1012_vm4, %v1023_v24, %v1025_v59  ;;  %vm3094_vm8 = vcmp.lt.s32.totalorder %v3093_v7, 0  ;;  %v1170_v23 = vsel %vm1085_vm1, %v1169_v51, %v1145_v13 }
 0x151   : > { %v4223_v27 = vmul.u32.u64.low %v1027_v55, %v1026_v61  ;;  %v4224_v43 = vmul.u32.u64.high %v1027_v55, %v1026_v61, %v4223_v27  ;;  %v1154_v26 = vsel %vm3094_vm8, 0, %v3093_v7  ;;  %v1295_v60 = vshrl.u32 %v1294_v1, 23 }
 0x152   : > { %v4226_v31 = vmul.u32.u64.low %v1027_v55, %v1022_v21  ;;  %v4227_v14 = vmul.u32.u64.high %v1027_v55, %v1022_v21, %v4226_v31  ;;  %v1139_v38 = vadd.s32 %v4139_v11, %v4147_v49  ;;  %v1155_v30 = vsub.s32 32, %v1154_v26 }
 0x153   : > { %v1159_v36 = vsub.s32 4294967266, %v1154_v26  ;;  %v1018_v40 = vsel %vm1012_vm4, %v1015_v52, %v1017_v18  ;;  %vm870_vm10 = vcmp.eq.s32.totalorder %v4182_v5, 2  ;;  %v1172_v13 = vsel %vm4211_vm2, 0, %v1170_v23 }
 0x154   : > { %v3339_v44 = vpop.eup %3338  ;;  %v1291_v46 = vand.u32 2147483647, %v4190_v34  ;;  %v3099_v35 = vadd.s32 4294967169, %v1295_v60  ;;  %v1156_v22 = vshll.u32 %v4195_v42, %v1154_v26  ;;  %v1157_v63 = vshrl.u32 %v1139_v38, %v1155_v30 }
 0x155   : > { %v3341_v50 = vpop.eup %3340  ;;  %v871_v48 = vxor.u32 2147483648, %v3339_v44  ;;  %v1160_v28 = vadd.s32 127, %v1159_v36  ;;  %v1034_v49 = vmul.u32 %v1027_v55, %v1018_v40  ;;  %vm1036_vm9 = vc.u32 %v4224_v43, %v4226_v31 }
 0x156   : > { %v868_v11 = vxor.u32 2147483648, %v3341_v50  ;;  %v1037_v25 = vadd.s32 1, %v4227_v14  ;;  %v1158_v62 = vor.u32 %v1157_v63, %v1156_v22  ;;  %v1301_v39 = vadd.s32 1, %v3099_v35 }
 0x157   : > { %v872_v16 = vsel %vm870_vm10, %v871_v48, %v3341_v50  ;;  %v1161_v53 = vshll.u32 %v1160_v28, 23  ;;  %vm863_vm11 = vweird.f32 %v3932_v57  ;;  %vm866_vm13 = vcmp.lt.s32.totalorder %v4182_v5, 2 }
 0x158   : > { %v869_v42 = vsel %vm867_vm7, %v3339_v44, %v868_v11  ;;  %v1038_v58 = vsel %vm1036_vm9, %v1037_v25, %v4227_v14  ;;  %v4248_v37 = vadd.f32 %v4104_v45, %v4185_v29  ;;  %v1176_v15 = vadd.s32 3, %v1172_v13 }
 0x159   : > { %v873_v41 = vsel %vm866_vm13, %v869_v42, %v872_v16  ;;  %v1162_v51 = vor.u32 4788187, %v1161_v53  ;;  %v1039_v55 = vadd.s32 %v1038_v58, %v1034_v49  ;;  %v1298_v54 = vand.u32 8388607, %v1291_v46 }
 0x15a   : > { %v874_v47 = vsel %vm863_vm11, nan, %v873_v41  ;;  %vm1302_vm12 = vcmp.gt.s32.totalorder %v1301_v39, 0  ;;  %v1165_v3 = vcvt.s32.f32 %v1158_v62  ;;  %vm981_vm14 = vcmp.lt.s32.totalorder %v4108_v20, 0 }
 0x15b   : > { %2959 = vst [vmem:[%s3893_s4 + $0x20] sm:$0xff] %v874_v47  ;;  %v1163_v57 = vand.u32 2147483647, %v1162_v51  ;;  %v1040_v5 = vadd.s32 536870912, %v1039_v55  ;;  %v1303_v33 = vsel %vm1302_vm12, %v1301_v39, 0  ;;  %v4254_v52 = vand.u32 3, %v1176_v15 }
 0x15c   : > { %v1305_v24 = vand.u32 31, %v1303_v33  ;;  %v1299_v29 = vor.u32 8388608, %v1298_v54  ;;  %v1190_v59 = vand.u32 2139095040, %v4248_v37  ;;  %v1304_v61 = vshrl.u32 %v1303_v33, 5 }
 0x15d   : > { %v1166_v19 = vmul.f32 %v1165_v3, %v1163_v57  ;;  %v1041_v7 = vshrl.u32 %v1040_v5, 30  ;;  %vm4277_vm15 = vcmp.le.f32.partialorder %v979_v10, 0.7853982  ;;  %v1187_v16 = vand.u32 2147483647, %v4248_v37 }
 0x15e   : > { %v1306_v56 = vsub.s32 32, %v1305_v24  ;;  %v1308_v1 = vshll.u32 %v3491_v0, %v1305_v24  ;;  %v1311_v27 = vshll.u32 %v3492_v2, %v1305_v24  ;;  %v1314_v30 = vshll.u32 %v3493_v4, %v1305_v24 }
 0x15f   : > { %v1167_v18 = vxor.u32 2147483648, %v1166_v19  ;;  %v1042_v21 = vshll.u32 %v1041_v7, 30  ;;  %v1065_v44 = vsub.s32 4, %v1041_v7  ;;  %v1317_v35 = vshll.u32 %v3494_v6, %v1305_v24 }
 0x160   : > { %v1309_v23 = vshrl.u32 %v3492_v2, %v1306_v56  ;;  %v1312_v26 = vshrl.u32 %v3493_v4, %v1306_v56  ;;  %v1315_v14 = vshrl.u32 %v3494_v6, %v1306_v56  ;;  %v1318_v36 = vshrl.u32 %v3495_v8, %v1306_v56 }
 0x161   : > { %v1168_v60 = vsel %vm1085_vm1, %v1167_v18, %v1166_v19  ;;  %v4264_v38 = vsub.s32 %v1039_v55, %v1042_v21  ;;  %v1320_v28 = vshll.u32 %v3495_v8, %v1305_v24  ;;  %v1321_v11 = vshrl.u32 %v3496_v17, %v1306_v56 }
 0x162   : > { %v1171_v40 = vsel %vm4211_vm2, %v4047_v32, %v1168_v60  ;;  %v1310_v13 = vor.u32 %v1309_v23, %v1308_v1  ;;  %v1313_v48 = vor.u32 %v1312_v26, %v1311_v27  ;;  %v1316_v22 = vor.u32 %v1315_v14, %v1314_v30 }
 0x163   : > { %3342 = vcosq.f32 %v1171_v40  ;;  %v1045_v50 = vsub.s32 0, %v4264_v38  ;;  %v1319_v63 = vor.u32 %v1318_v36, %v1317_v35  ;;  %v1339_v25 = vshll.u32 %v1299_v29, 8 }
 0x164   : > { %3344 = vsinq.f32 %v1171_v40  ;;  %v1191_v62 = vshrl.u32 %v1190_v59, 23  ;;  %v1066_v53 = vsel %vm981_vm14, %v1065_v44, %v1041_v7  ;;  %v1307_v39 = vshrl.u32 %v3491_v0, %v1306_v56 }
 0x165   : > { %v3088_v49 = vmin.u32 %v1045_v50, %v4264_v38  ;;  %v1322_v42 = vor.u32 %v1321_v11, %v1320_v28  ;;  %vm1323_vm0 = vcmp.lt.s32.totalorder %v1304_v61, 1  ;;  %vm1182_vm1 = vcmp.eq.s32.totalorder %v4254_v52, 2 }
 0x166   : > { %vm1324_vm2 = vcmp.lt.s32.totalorder %v1304_v61, 2  ;;  %vm1325_vm3 = vcmp.lt.s32.totalorder %v1304_v61, 3  ;;  %vm1326_vm4 = vcmp.lt.s32.totalorder %v1304_v61, 4  ;;  %vm1179_vm5 = vcmp.eq.s32.totalorder %v4254_v52, 0 }
 0x167   : > { %v1047_v58 = vclz %v3088_v49  ;;  %v1328_v10 = vsel %vm1326_vm4, %v1316_v22, 2102212464  ;;  %v1331_v41 = vsel %vm1323_vm0, %v1310_v13, %v1313_v48  ;;  %v1332_v51 = vsel %vm1326_vm4, %v1319_v63, 920167782 }
 0x168   : > { %v1335_v55 = vsel %vm1323_vm0, %v1313_v48, %v1316_v22  ;;  %vm1178_vm6 = vcmp.lt.s32.totalorder %v4254_v52, 2  ;;  %v1327_v15 = vsel %vm1323_vm0, %v1307_v39, %v1310_v13  ;;  %v1333_v54 = vsel %vm1325_vm3, %v1316_v22, %v1332_v51 }
 0x169   : > { %v3089_v47 = vadd.s32 4294967294, %v1047_v58  ;;  %v1336_v57 = vsel %vm1326_vm4, %v1322_v42, 1326507024  ;;  %vm1175_vm7 = vweird.f32 %v4047_v32  ;;  %v1329_v3 = vsel %vm1325_vm3, %v1313_v48, %v1328_v10  ;;  %v225_v58 = vpop.permute.xlu0 %224 }
 0x16a   : > { %v1334_v5 = vsel %vm1324_vm2, %v1331_v41, %v1333_v54  ;;  %v1337_v33 = vsel %vm1325_vm3, %v1319_v63, %v1336_v57  ;;  %v3095_v24 = vadd.s32 4294967169, %v1191_v62  ;;  %v1035_v56 = vadd.s32 %v4226_v31, %v4224_v43 }
 0x16b   : > { %vm3090_vm8 = vcmp.lt.s32.totalorder %v3089_v47, 0  ;;  %v1338_v19 = vsel %vm1324_vm2, %v1335_v55, %v1337_v33  ;;  %v4292_v7 = vmul.u32.u64.low %v1339_v25, %v1334_v5  ;;  %v4293_v29 = vmul.u32.u64.high %v1339_v25, %v1334_v5, %v4292_v7 }
 0x16c   : > { %v1050_v59 = vsel %vm3090_vm8, 0, %v3089_v47  ;;  %v4298_v18 = vmul.u32.u64.low %v1339_v25, %v1338_v19  ;;  %v4299_v21 = vmul.u32.u64.high %v1339_v25, %v1338_v19, %v4298_v18  ;;  %v1330_v26 = vsel %vm1324_vm2, %v1327_v15, %v1329_v3 }
 0x16d   : > { %v3343_v1 = vpop.eup %3342  ;;  %v1051_v23 = vsub.s32 32, %v1050_v59  ;;  %v1055_v27 = vsub.s32 4294967266, %v1050_v59  ;;  %v1197_v14 = vadd.s32 1, %v3095_v24  ;;  %v1052_v36 = vshll.u32 %v4264_v38, %v1050_v59 }
 0x16e   : > { %v3345_v60 = vpop.eup %3344  ;;  %v1183_v30 = vxor.u32 2147483648, %v3343_v1  ;;  %v1068_v40 = vsel %vm4277_vm15, 0, %v1066_v53  ;;  %v1194_v43 = vand.u32 8388607, %v1187_v16  ;;  %v1349_v35 = vadd.s32 1, %v4293_v29  ;;  %v230_v53 = vpop.permute.xlu1 %229 }
 0x16f   : > { %v1180_v31 = vxor.u32 2147483648, %v3345_v60  ;;  %v1053_v44 = vshrl.u32 %v1035_v56, %v1051_v23  ;;  %v1056_v13 = vadd.s32 127, %v1055_v27  ;;  %v1346_v50 = vmul.u32 %v1339_v25, %v1330_v26 }
 0x170   : > { %v1184_v61 = vsel %vm1182_vm1, %v1183_v30, %v3345_v60  ;;  %vm1348_vm10 = vc.u32 %v4299_v21, %v4292_v7  ;;  %vm1198_vm9 = vcmp.gt.s32.totalorder %v1197_v14, 0  ;;  %v1072_v11 = vadd.s32 3, %v1068_v40 }
 0x171   : > { %v1181_v38 = vsel %vm1179_vm5, %v3343_v1, %v1180_v31  ;;  %v1054_v48 = vor.u32 %v1053_v44, %v1052_v36  ;;  %v1057_v22 = vshll.u32 %v1056_v13, 23  ;;  %v1350_v63 = vsel %vm1348_vm10, %v1349_v35, %v4293_v29 }
 0x172   : > { %v1185_v28 = vsel %vm1178_vm6, %v1181_v38, %v1184_v61  ;;  %v1351_v49 = vadd.s32 %v1350_v63, %v1346_v50  ;;  %v1199_v62 = vsel %vm1198_vm9, %v1197_v14, 0  ;;  %v1195_v42 = vor.u32 8388608, %v1194_v43 }
 0x173   : > { %v1186_v25 = vsel %vm1175_vm7, nan, %v1185_v28  ;;  %v1058_v39 = vor.u32 4788187, %v1057_v22  ;;  %v1201_v41 = vand.u32 31, %v1199_v62  ;;  %v1061_v55 = vcvt.s32.f32 %v1054_v48 }
 0x174   : > { %2962 = vst [vmem:[%s3893_s4 + $0x38] sm:$0xff] %v1186_v25  ;;  %v1352_v10 = vadd.s32 536870912, %v1351_v49  ;;  %v312_v47 = vmul.f32 %v4173_v12, %v230_v53  ;;  %v4321_v15 = vand.u32 3, %v1072_v11  ;;  %v4324_v57 = vmul.f32 %v4173_v12, %v225_v58 }
 0x175   : > { %v1059_v51 = vand.u32 2147483647, %v1058_v39  ;;  %v1202_v54 = vsub.s32 32, %v1201_v41  ;;  %vm1293_vm11 = vcmp.lt.s32.totalorder %v4190_v34, 0  ;;  %v4327_v32 = vshrl.u32 %v1199_v62, 5 }
 0x176   : > { %v1353_v52 = vshrl.u32 %v1352_v10, 30  ;;  %v1204_v5 = vshll.u32 %v3491_v0, %v1201_v41  ;;  %v4330_v33 = vshll.u32 %v1195_v42, 8  ;;  %v1207_v29 = vshll.u32 %v3492_v2, %v1201_v41 }
 0x177   : > { %v1062_v3 = vmul.f32 %v1061_v55, %v1059_v51  ;;  %v1205_v19 = vshrl.u32 %v3492_v2, %v1202_v54  ;;  %v1210_v56 = vshll.u32 %v3493_v4, %v1201_v41  ;;  %v1208_v18 = vshrl.u32 %v3493_v4, %v1202_v54 }
 0x178   : > { %v1354_v24 = vshll.u32 %v1353_v52, 30  ;;  %v1211_v1 = vshrl.u32 %v3494_v6, %v1202_v54  ;;  %v1214_v23 = vshrl.u32 %v3495_v8, %v1202_v54  ;;  %v1213_v26 = vshll.u32 %v3494_v6, %v1201_v41 }
 0x179   : > { %v1063_v59 = vxor.u32 2147483648, %v1062_v3  ;;  %v1216_v14 = vshll.u32 %v3495_v8, %v1201_v41  ;;  %v1217_v60 = vshrl.u32 %v3496_v17, %v1202_v54  ;;  %vm4347_vm13 = vcmp.le.f32.partialorder %v1291_v46, 0.7853982 }
 0x17a   : > { %v4338_v27 = vsub.s32 %v1351_v49, %v1354_v24  ;;  %v1206_v40 = vor.u32 %v1205_v19, %v1204_v5  ;;  %v1209_v43 = vor.u32 %v1208_v18, %v1207_v29  ;;  %v1212_v31 = vor.u32 %v1211_v1, %v1210_v56 }
 0x17b   : > { %v1064_v30 = vsel %vm981_vm14, %v1063_v59, %v1062_v3  ;;  %v1377_v35 = vsub.s32 4, %v1353_v52  ;;  %v1215_v61 = vor.u32 %v1214_v23, %v1213_v26  ;;  %v1218_v50 = vor.u32 %v1217_v60, %v1216_v14 }
 0x17c   : > { %v1067_v44 = vsel %vm4277_vm15, %v4108_v20, %v1064_v30  ;;  %v1357_v13 = vsub.s32 0, %v4338_v27  ;;  %vm1219_vm12 = vcmp.lt.s32.totalorder %v4327_v32, 1  ;;  %v4357_v46 = vadd.f32 %v4104_v45, %v312_v47 }
 0x17d   : > { %3346 = vcosq.f32 %v1067_v44  ;;  %vm1220_vm14 = vcmp.lt.s32.totalorder %v4327_v32, 2  ;;  %vm1222_vm0 = vcmp.lt.s32.totalorder %v4327_v32, 4  ;;  %v1203_v9 = vshrl.u32 %v3491_v0, %v1202_v54 }
 0x17e   : > { %3348 = vsinq.f32 %v1067_v44  ;;  %v3100_v38 = vmin.u32 %v1357_v13, %v4338_v27  ;;  %v1224_v48 = vsel %vm1222_vm0, %v1212_v31, 2102212464  ;;  %v1227_v22 = vsel %vm1219_vm12, %v1206_v40, %v1209_v43 }
 0x17f   : > { %v1228_v63 = vsel %vm1222_vm0, %v1215_v61, 920167782  ;;  %v1378_v11 = vsel %vm1293_vm11, %v1377_v35, %v1353_v52  ;;  %vm1221_vm15 = vcmp.lt.s32.totalorder %v4327_v32, 3  ;;  %v1231_v49 = vsel %vm1219_vm12, %v1209_v43, %v1212_v31 }
 0x180   : > { %v1359_v28 = vclz %v3100_v38  ;;  %v1223_v62 = vsel %vm1219_vm12, %v1203_v9, %v1206_v40  ;;  %v1229_v53 = vsel %vm1221_vm15, %v1212_v31, %v1228_v63  ;;  %v1232_v25 = vsel %vm1222_vm0, %v1218_v50, 1326507024 }
 0x181   : > { %v1502_v39 = vand.u32 2139095040, %v4357_v46  ;;  %vm1075_vm1 = vcmp.eq.s32.totalorder %v4321_v15, 0  ;;  %v1225_v58 = vsel %vm1221_vm15, %v1209_v43, %v1224_v48  ;;  %v1230_v10 = vsel %vm1220_vm14, %v1227_v22, %v1229_v53 }
 0x182   : > { %v3101_v42 = vadd.s32 4294967294, %v1359_v28  ;;  %v1233_v41 = vsel %vm1221_vm15, %v1215_v61, %v1232_v25  ;;  %vm1074_vm2 = vcmp.lt.s32.totalorder %v4321_v15, 2  ;;  %v1380_v54 = vsel %vm4347_vm13, 0, %v1378_v11 }
 0x183   : > { %v1234_v51 = vsel %vm1220_vm14, %v1231_v49, %v1233_v41  ;;  %v4374_v55 = vmul.u32.u64.low %v4330_v33, %v1230_v10  ;;  %v4375_v47 = vmul.u32.u64.high %v4330_v33, %v1230_v10, %v4374_v55  ;;  %v1503_v52 = vshrl.u32 %v1502_v39, 23 }
 0x184   : > { %vm3102_vm3 = vcmp.lt.s32.totalorder %v3101_v42, 0  ;;  %v4381_v3 = vmul.u32.u64.low %v4330_v33, %v1234_v51  ;;  %v4382_v5 = vmul.u32.u64.high %v4330_v33, %v1234_v51, %v4381_v3  ;;  %vm1078_vm4 = vcmp.eq.s32.totalorder %v4321_v15, 2 }
 0x185   : > { %v1362_v24 = vsel %vm3102_vm3, 0, %v3101_v42  ;;  %v3107_v19 = vadd.s32 4294967169, %v1503_v52  ;;  %v4387_v29 = vadd.f32 %v4104_v45, %v4324_v57  ;;  %v1347_v56 = vadd.s32 %v4292_v7, %v4299_v21 }
 0x186   : > { %v1363_v59 = vsub.s32 32, %v1362_v24  ;;  %v1367_v18 = vsub.s32 4294967266, %v1362_v24  ;;  %v1226_v1 = vsel %vm1220_vm14, %v1223_v62, %v1225_v58  ;;  %v1384_v26 = vadd.s32 3, %v1380_v54 }
 0x187   : > { %v3347_v23 = vpop.eup %3346  ;;  %v1245_v14 = vadd.s32 1, %v4375_v47  ;;  %v1499_v60 = vand.u32 2147483647, %v4357_v46  ;;  %v1509_v30 = vadd.s32 1, %v3107_v19  ;;  %v1364_v45 = vshll.u32 %v4338_v27, %v1362_v24 }
 0x188   : > { %v3349_v40 = vpop.eup %3348  ;;  %v1079_v43 = vxor.u32 2147483648, %v3347_v23  ;;  %v1365_v57 = vshrl.u32 %v1347_v56, %v1363_v59  ;;  %v1368_v31 = vadd.s32 127, %v1367_v18  ;;  %v1242_v7 = vmul.u32 %v4330_v33, %v1226_v1 }
 0x189   : > { %v1076_v44 = vxor.u32 2147483648, %v3349_v40  ;;  %vm1244_vm5 = vc.u32 %v4382_v5, %v4374_v55  ;;  %vm1510_vm6 = vcmp.gt.s32.totalorder %v1509_v30, 0  ;;  %v1506_v50 = vand.u32 8388607, %v1499_v60 }
 0x18a   : > { %v1080_v21 = vsel %vm1078_vm4, %v1079_v43, %v3349_v40  ;;  %v1366_v32 = vor.u32 %v1365_v57, %v1364_v45  ;;  %v1369_v13 = vshll.u32 %v1368_v31, 23  ;;  %v1246_v35 = vsel %vm1244_vm5, %v1245_v14, %v4375_v47 }
 0x18b   : > { %v1077_v27 = vsel %vm1075_vm1, %v3347_v23, %v1076_v44  ;;  %v1247_v61 = vadd.s32 %v1246_v35, %v1242_v7  ;;  %v1511_v33 = vsel %vm1510_vm6, %v1509_v30, 0  ;;  %vm1071_vm7 = vweird.f32 %v4108_v20 }
 0x18c   : > { %v1081_v38 = vsel %vm1074_vm2, %v1077_v27, %v1080_v21  ;;  %v1370_v9 = vor.u32 4788187, %v1369_v13  ;;  %v1398_v48 = vand.u32 2139095040, %v4387_v29  ;;  %v1513_v28 = vand.u32 31, %v1511_v33 }
 0x18d   : > { %v1082_v22 = vsel %vm1071_vm7, nan, %v1081_v38  ;;  %v1248_v63 = vadd.s32 536870912, %v1247_v61  ;;  %v1373_v49 = vcvt.s32.f32 %v1366_v32  ;;  %v4411_v62 = vand.u32 3, %v1384_v26 }
 0x18e   : > { %2961 = vst [vmem:[%s3893_s4 + $0x30] sm:$0xff] %v1082_v22  ;;  %v1371_v11 = vand.u32 2147483647, %v1370_v9  ;;  %v1507_v25 = vor.u32 8388608, %v1506_v50  ;;  %v1514_v39 = vsub.s32 32, %v1513_v28  ;;  %v1512_v58 = vshrl.u32 %v1511_v33, 5 }
 0x18f   : > { %v1249_v53 = vshrl.u32 %v1248_v63, 30  ;;  %v1516_v20 = vshll.u32 %v3491_v0, %v1513_v28  ;;  %v1399_v15 = vshrl.u32 %v1398_v48, 23  ;;  %v1519_v51 = vshll.u32 %v3492_v2, %v1513_v28 }
 0x190   : > { %v1374_v42 = vmul.f32 %v1373_v49, %v1371_v11  ;;  %v1517_v41 = vshrl.u32 %v3492_v2, %v1514_v39  ;;  %v1522_v47 = vshll.u32 %v3493_v4, %v1513_v28  ;;  %vm1189_vm8 = vcmp.lt.s32.totalorder %v4248_v37, 0 }
 0x191   : > { %v1250_v10 = vshll.u32 %v1249_v53, 30  ;;  %v1520_v54 = vshrl.u32 %v3493_v4, %v1514_v39  ;;  %v1523_v3 = vshrl.u32 %v3494_v6, %v1514_v39  ;;  %v1526_v24 = vshrl.u32 %v3495_v8, %v1514_v39 }
 0x192   : > { %v1375_v52 = vxor.u32 2147483648, %v1374_v42  ;;  %v1525_v56 = vshll.u32 %v3494_v6, %v1513_v28  ;;  %v1528_v59 = vshll.u32 %v3495_v8, %v1513_v28  ;;  %v1529_v18 = vshrl.u32 %v3496_v17, %v1514_v39 }
 0x193   : > { %v4421_v19 = vsub.s32 %v1247_v61, %v1250_v10  ;;  %v1518_v23 = vor.u32 %v1517_v41, %v1516_v20  ;;  %v1521_v26 = vor.u32 %v1520_v54, %v1519_v51  ;;  %v1524_v14 = vor.u32 %v1523_v3, %v1522_v47 }
 0x194   : > { %v1376_v1 = vsel %vm1293_vm11, %v1375_v52, %v1374_v42  ;;  %v1527_v43 = vor.u32 %v1526_v24, %v1525_v56  ;;  %vm1531_vm10 = vcmp.lt.s32.totalorder %v1512_v58, 1  ;;  %v1273_v45 = vsub.s32 4, %v1249_v53 }
 0x195   : > { %v1379_v30 = vsel %vm4347_vm13, %v4190_v34, %v1376_v1  ;;  %v1253_v40 = vsub.s32 0, %v4421_v19  ;;  %v1530_v57 = vor.u32 %v1529_v18, %v1528_v59  ;;  %vm1534_vm9 = vcmp.lt.s32.totalorder %v1512_v58, 4 }
 0x196   : > { %3350 = vcosq.f32 %v1379_v30  ;;  %vm4434_vm12 = vcmp.le.f32.partialorder %v1187_v16, 0.7853982  ;;  %v1515_v36 = vshrl.u32 %v3491_v0, %v1514_v39  ;;  %v1536_v7 = vsel %vm1534_vm9, %v1524_v14, 2102212464 }
 0x197   : > { %3352 = vsinq.f32 %v1379_v30  ;;  %v3096_v44 = vmin.u32 %v1253_v40, %v4421_v19  ;;  %vm1533_vm11 = vcmp.lt.s32.totalorder %v1512_v58, 3  ;;  %v1539_v21 = vsel %vm1531_vm10, %v1518_v23, %v1521_v26 }
 0x198   : > { %v1540_v32 = vsel %vm1534_vm9, %v1527_v43, 920167782  ;;  %v1547_v13 = vshll.u32 %v1507_v25, 8  ;;  %v1535_v27 = vsel %vm1531_vm10, %v1515_v36, %v1518_v23  ;;  %v1537_v61 = vsel %vm1533_vm11, %v1521_v26, %v1536_v7 }
 0x199   : > { %v1255_v35 = vclz %v3096_v44  ;;  %v1543_v16 = vsel %vm1531_vm10, %v1521_v26, %v1524_v14  ;;  %vm1532_vm13 = vcmp.lt.s32.totalorder %v1512_v58, 2  ;;  %v1541_v50 = vsel %vm1533_vm11, %v1524_v14, %v1540_v32 }
 0x19a   : > { %v1544_v33 = vsel %vm1534_vm9, %v1530_v57, 1326507024  ;;  %v3103_v38 = vadd.s32 4294967169, %v1399_v15  ;;  %v1274_v48 = vsel %vm1189_vm8, %v1273_v45, %v1249_v53  ;;  %v1542_v22 = vsel %vm1532_vm13, %v1539_v21, %v1541_v50  ;;  %v240_v57 = vpop.permute.xlu1 %239 }
 0x19b   : > { %v3097_v9 = vadd.s32 4294967294, %v1255_v35  ;;  %v1545_v63 = vsel %vm1533_vm11, %v1527_v43, %v1544_v33  ;;  %v1538_v28 = vsel %vm1532_vm13, %v1535_v27, %v1537_v61  ;;  %vm1387_vm0 = vcmp.eq.s32.totalorder %v4411_v62, 0 }
 0x19c   : > { %v1546_v11 = vsel %vm1532_vm13, %v1543_v16, %v1545_v63  ;;  %v4448_v49 = vmul.u32.u64.low %v1547_v13, %v1542_v22  ;;  %v4449_v25 = vmul.u32.u64.high %v1547_v13, %v1542_v22, %v4448_v49  ;;  %v1405_v20 = vadd.s32 1, %v3103_v38 }
 0x19d   : > { %vm3098_vm14 = vcmp.lt.s32.totalorder %v3097_v9, 0  ;;  %v4452_v39 = vmul.u32.u64.low %v1547_v13, %v1546_v11  ;;  %v4453_v42 = vmul.u32.u64.high %v1547_v13, %v1546_v11, %v4452_v39  ;;  %vm1390_vm15 = vcmp.eq.s32.totalorder %v4411_v62, 2 }
 0x19e   : > { %v1258_v58 = vsel %vm3098_vm14, 0, %v3097_v9  ;;  %v1395_v53 = vand.u32 2147483647, %v4387_v29  ;;  %v1243_v15 = vadd.s32 %v4374_v55, %v4382_v5  ;;  %vm1406_vm1 = vcmp.gt.s32.totalorder %v1405_v20, 0 }
 0x19f   : > { %v1259_v10 = vsub.s32 32, %v1258_v58  ;;  %v1263_v41 = vsub.s32 4294967266, %v1258_v58  ;;  %v1276_v47 = vsel %vm4434_vm12, 0, %v1274_v48  ;;  %v1554_v52 = vmul.u32 %v1547_v13, %v1538_v28 }
 0x1a0   : > { %v3351_v51 = vpop.eup %3350  ;;  %v1557_v54 = vadd.s32 1, %v4449_v25  ;;  %v1407_v3 = vsel %vm1406_vm1, %v1405_v20, 0  ;;  %v1260_v59 = vshll.u32 %v4421_v19, %v1258_v58  ;;  %vm1556_vm2 = vc.u32 %v4453_v42, %v4448_v49 }
 0x1a1   : > { %v3353_v24 = vpop.eup %3352  ;;  %v1391_v56 = vxor.u32 2147483648, %v3351_v51  ;;  %v1261_v18 = vshrl.u32 %v1243_v15, %v1259_v10  ;;  %v1264_v1 = vadd.s32 127, %v1263_v41  ;;  %v1402_v55 = vand.u32 8388607, %v1395_v53 }
 0x1a2   : > { %v1388_v23 = vxor.u32 2147483648, %v3353_v24  ;;  %v1409_v5 = vand.u32 31, %v1407_v3  ;;  %v1558_v40 = vsel %vm1556_vm2, %v1557_v54, %v4449_v25  ;;  %vm1386_vm3 = vcmp.lt.s32.totalorder %v4411_v62, 2 }
 0x1a3   : > { %v1392_v26 = vsel %vm1390_vm15, %v1391_v56, %v3353_v24  ;;  %v1262_v14 = vor.u32 %v1261_v18, %v1260_v59  ;;  %v1265_v30 = vshll.u32 %v1264_v1, 23  ;;  %v1559_v43 = vadd.s32 %v1558_v40, %v1554_v52 }
 0x1a4   : > { %v1389_v19 = vsel %vm1387_vm0, %v3351_v51, %v1388_v23  ;;  %v1410_v45 = vsub.s32 32, %v1409_v5  ;;  %vm1383_vm4 = vweird.f32 %v4190_v34  ;;  %v1280_v7 = vadd.s32 3, %v1276_v47  ;;  %v4494_v47 = vld [vmem:[%s5672_s1 + $0x1] ss:$0 sm:$0xff] }
 0x1a5   : > { %v1393_v44 = vsel %vm1386_vm3, %v1389_v19, %v1392_v26  ;;  %v1266_v36 = vor.u32 4788187, %v1265_v30  ;;  %v1560_v32 = vadd.s32 536870912, %v1559_v43  ;;  %v1403_v13 = vor.u32 8388608, %v1402_v55 }
 0x1a6   : > { %v1394_v21 = vsel %vm1383_vm4, nan, %v1393_v44  ;;  %v1413_v35 = vshrl.u32 %v3492_v2, %v1410_v45  ;;  %v1269_v61 = vcvt.s32.f32 %v1262_v14  ;;  %v1416_v16 = vshrl.u32 %v3493_v4, %v1410_v45 }
 0x1a7   : > { %2964 = vst [vmem:[%s3893_s4 + $0x48] sm:$0xff] %v1394_v21  ;;  %v1267_v27 = vand.u32 2147483647, %v1266_v36  ;;  %v314_v62 = vmul.f32 %v4173_v12, %v240_v57  ;;  %v1561_v50 = vshrl.u32 %v1560_v32, 30  ;;  %v1412_v33 = vshll.u32 %v3491_v0, %v1409_v5 }
 0x1a8   : > { %v1419_v34 = vshrl.u32 %v3494_v6, %v1410_v45  ;;  %v1422_v38 = vshrl.u32 %v3495_v8, %v1410_v45  ;;  %v1408_v48 = vshrl.u32 %v1407_v3, 5  ;;  %v1415_v22 = vshll.u32 %v3492_v2, %v1409_v5 }
 0x1a9   : > { %v1270_v9 = vmul.f32 %v1269_v61, %v1267_v27  ;;  %v1421_v63 = vshll.u32 %v3494_v6, %v1409_v5  ;;  %v1562_v28 = vshll.u32 %v1561_v50, 30  ;;  %v1414_v11 = vor.u32 %v1413_v35, %v1412_v33 }
 0x1aa   : > { %v1418_v25 = vshll.u32 %v3493_v4, %v1409_v5  ;;  %v1425_v39 = vshrl.u32 %v3496_v17, %v1410_v45  ;;  %v1417_v20 = vor.u32 %v1416_v16, %v1415_v22  ;;  %v1424_v15 = vshll.u32 %v3495_v8, %v1409_v5 }
 0x1ab   : > { %v1271_v12 = vxor.u32 2147483648, %v1270_v9  ;;  %v1423_v58 = vor.u32 %v1422_v38, %v1421_v63  ;;  %v4487_v10 = vsub.s32 %v1559_v43, %v1562_v28  ;;  %v4489_v51 = vshll.u32 %v1403_v13, 8 }
 0x1ac   : > { %v1420_v41 = vor.u32 %v1419_v34, %v1418_v25  ;;  %v4497_v52 = vadd.f32 %v4494_v47, %v314_v62  ;;  %v1411_v3 = vshrl.u32 %v3491_v0, %v1410_v45  ;;  %v1426_v24 = vor.u32 %v1425_v39, %v1424_v15 }
 0x1ad   : > { %v1272_v54 = vsel %vm1189_vm8, %v1271_v12, %v1270_v9  ;;  %vm1427_vm5 = vcmp.lt.s32.totalorder %v1408_v48, 1  ;;  %v1565_v59 = vsub.s32 0, %v4487_v10  ;;  %vm1428_vm6 = vcmp.lt.s32.totalorder %v1408_v48, 2 }
 0x1ae   : > { %v1275_v56 = vsel %vm4434_vm12, %v4248_v37, %v1272_v54  ;;  %vm1430_vm7 = vcmp.lt.s32.totalorder %v1408_v48, 4  ;;  %vm1429_vm10 = vcmp.lt.s32.totalorder %v1408_v48, 3  ;;  %v1435_v18 = vsel %vm1427_vm5, %v1414_v11, %v1417_v20 }
 0x1af   : > { %3354 = vcosq.f32 %v1275_v56  ;;  %v1436_v1 = vsel %vm1430_vm7, %v1423_v58, 920167782  ;;  %v3108_v23 = vmin.u32 %v1565_v59, %v4487_v10  ;;  %v1432_v55 = vsel %vm1430_vm7, %v1420_v41, 2102212464 }
 0x1b0   : > { %3356 = vsinq.f32 %v1275_v56  ;;  %v1437_v5 = vsel %vm1429_vm10, %v1420_v41, %v1436_v1  ;;  %v1585_v26 = vsub.s32 4, %v1561_v50  ;;  %v1439_v31 = vsel %vm1427_vm5, %v1417_v20, %v1420_v41 }
 0x1b1   : > { %v1438_v14 = vsel %vm1428_vm6, %v1435_v18, %v1437_v5  ;;  %v1440_v30 = vsel %vm1430_vm7, %v1426_v24, 1326507024  ;;  %v1281_v40 = vand.u32 3, %v1280_v7  ;;  %v1567_v19 = vclz %v3108_v23 }
 0x1b2   : > { %v1431_v43 = vsel %vm1427_vm5, %v1411_v3, %v1414_v11  ;;  %v1433_v45 = vsel %vm1429_vm10, %v1417_v20, %v1432_v55  ;;  %v1441_v57 = vsel %vm1429_vm10, %v1423_v58, %v1440_v30  ;;  %vm1501_vm8 = vcmp.lt.s32.totalorder %v4357_v46, 0 }
 0x1b3   : > { %v4512_v44 = vmul.u32.u64.low %v4489_v51, %v1438_v14  ;;  %v4513_v36 = vmul.u32.u64.high %v4489_v51, %v1438_v14, %v4512_v44  ;;  %v3109_v21 = vadd.s32 4294967294, %v1567_v19  ;;  %v1442_v32 = vsel %vm1428_vm6, %v1439_v31, %v1441_v57  ;;  %v4550_v14 = vld [vmem:[%s5672_s1] ss:$0 sm:$0xff] }
 0x1b4   : > { %v1710_v13 = vand.u32 2139095040, %v4497_v52  ;;  %v1586_v35 = vsel %vm1501_vm8, %v1585_v26, %v1561_v50  ;;  %v4521_v7 = vmul.u32.u64.low %v4489_v51, %v1442_v32  ;;  %v4522_v27 = vmul.u32.u64.high %v4489_v51, %v1442_v32, %v4521_v7 }
 0x1b5   : > { %vm1279_vm9 = vweird.f32 %v4248_v37  ;;  %vm4527_vm12 = vcmp.le.f32.partialorder %v1499_v60, 0.7853982  ;;  %vm3110_vm11 = vcmp.lt.s32.totalorder %v3109_v21, 0  ;;  %v1434_v16 = vsel %vm1428_vm6, %v1431_v43, %v1433_v45 }
 0x1b6   : > { %v1711_v62 = vshrl.u32 %v1710_v13, 23  ;;  %vm1282_vm13 = vcmp.lt.s32.totalorder %v1281_v40, 2  ;;  %v1555_v50 = vadd.s32 %v4448_v49, %v4453_v42  ;;  %v1570_v33 = vsel %vm3110_vm11, 0, %v3109_v21 }
 0x1b7   : > { %v1453_v34 = vadd.s32 1, %v4513_v36  ;;  %v1571_v38 = vsub.s32 32, %v1570_v33  ;;  %v1575_v9 = vsub.s32 4294967266, %v1570_v33  ;;  %v1588_v22 = vsel %vm4527_vm12, 0, %v1586_v35 }
 0x1b8   : > { %v3115_v60 = vadd.s32 4294967169, %v1711_v62  ;;  %v1572_v28 = vshll.u32 %v4487_v10, %v1570_v33  ;;  %v1450_v48 = vmul.u32 %v4489_v51, %v1434_v16  ;;  %vm1452_vm14 = vc.u32 %v4522_v27, %v4512_v44  ;;  %v235_v51 = vpop.permute.xlu0 %234 }
 0x1b9   : > { %v3355_v63 = vpop.eup %3354  ;;  %v1707_v11 = vand.u32 2147483647, %v4497_v52  ;;  %v1573_v42 = vshrl.u32 %v1555_v50, %v1571_v38  ;;  %v1576_v39 = vadd.s32 127, %v1575_v9  ;;  %v1454_v12 = vsel %vm1452_vm14, %v1453_v34, %v4513_v36 }
 0x1ba   : > { %v3357_v25 = vpop.eup %3356  ;;  %v1287_v49 = vxor.u32 2147483648, %v3355_v63  ;;  %vm1286_vm0 = vcmp.eq.s32.totalorder %v1281_v40, 2  ;;  %v1455_v58 = vadd.s32 %v1454_v12, %v1450_v48  ;;  %v1717_v15 = vadd.s32 1, %v3115_v60 }
 0x1bb   : > { %v1284_v20 = vxor.u32 2147483648, %v3357_v25  ;;  %vm1283_vm15 = vcmp.eq.s32.totalorder %v1281_v40, 0  ;;  %v1574_v54 = vor.u32 %v1573_v42, %v1572_v28  ;;  %v1577_v10 = vshll.u32 %v1576_v39, 23 }
 0x1bc   : > { %v1288_v41 = vsel %vm1286_vm0, %v1287_v49, %v3357_v25  ;;  %v1592_v24 = vadd.s32 3, %v1588_v22  ;;  %v1456_v56 = vadd.s32 536870912, %v1455_v58  ;;  %vm1718_vm1 = vcmp.gt.s32.totalorder %v1717_v15, 0 }
 0x1bd   : > { %v1285_v3 = vsel %vm1283_vm15, %v3355_v63, %v1284_v20  ;;  %v1578_v18 = vor.u32 4788187, %v1577_v10  ;;  %v1714_v1 = vand.u32 8388607, %v1707_v11  ;;  %v1719_v23 = vsel %vm1718_vm1, %v1717_v15, 0 }
 0x1be   : > { %v1289_v59 = vsel %vm1282_vm13, %v1285_v3, %v1288_v41  ;;  %v1457_v5 = vshrl.u32 %v1456_v56, 30  ;;  %v1721_v26 = vand.u32 31, %v1719_v23  ;;  %v313_v31 = vmul.f32 %v4550_v14, %v235_v51 }
 0x1bf   : > { %v1290_v55 = vsel %vm1279_vm9, nan, %v1289_v59  ;;  %v1579_v30 = vand.u32 2147483647, %v1578_v18  ;;  %v1581_v40 = vcvt.s32.f32 %v1574_v54  ;;  %vm1397_vm2 = vcmp.lt.s32.totalorder %v4387_v29, 0 }
 0x1c0   : > { %2963 = vst [vmem:[%s3893_s4 + $0x40] sm:$0xff] %v1290_v55  ;;  %v1458_v19 = vshll.u32 %v1457_v5, 30  ;;  %v1722_v43 = vsub.s32 32, %v1721_v26  ;;  %v4555_v57 = vand.u32 3, %v1592_v24  ;;  %v1451_v37 = vadd.s32 %v4512_v44, %v4522_v27 }
 0x1c1   : > { %v1582_v45 = vmul.f32 %v1581_v40, %v1579_v30  ;;  %v1715_v36 = vor.u32 8388608, %v1714_v1  ;;  %v4560_v32 = vshrl.u32 %v1719_v23, 5  ;;  %v4564_v35 = vadd.f32 %v4494_v47, %v313_v31 }
 0x1c2   : > { %v4558_v21 = vsub.s32 %v1455_v58, %v1458_v19  ;;  %v1725_v13 = vshrl.u32 %v3492_v2, %v1722_v43  ;;  %v1724_v16 = vshll.u32 %v3491_v0, %v1721_v26  ;;  %v1728_v62 = vshrl.u32 %v3493_v4, %v1722_v43 }
 0x1c3   : > { %v1583_v7 = vxor.u32 2147483648, %v1582_v45  ;;  %v1731_v50 = vshrl.u32 %v3494_v6, %v1722_v43  ;;  %v1727_v44 = vshll.u32 %v3492_v2, %v1721_v26  ;;  %v1730_v27 = vshll.u32 %v3493_v4, %v1721_v26 }
 0x1c4   : > { %v1461_v33 = vsub.s32 0, %v4558_v21  ;;  %v1734_v34 = vshrl.u32 %v3495_v8, %v1722_v43  ;;  %v1481_v9 = vsub.s32 4, %v1457_v5  ;;  %v1726_v22 = vor.u32 %v1725_v13, %v1724_v16 }
 0x1c5   : > { %v1584_v38 = vsel %vm1501_vm8, %v1583_v7, %v1582_v45  ;;  %v1733_v60 = vshll.u32 %v3494_v6, %v1721_v26  ;;  %v1729_v48 = vor.u32 %v1728_v62, %v1727_v44  ;;  %v1732_v25 = vor.u32 %v1731_v50, %v1730_v27 }
 0x1c6   : > { %v1587_v63 = vsel %vm4527_vm12, %v4357_v46, %v1584_v38  ;;  %v3104_v28 = vmin.u32 %v1461_v33, %v4558_v21  ;;  %v1736_v42 = vshll.u32 %v3495_v8, %v1721_v26  ;;  %v1737_v39 = vshrl.u32 %v3496_v17, %v1722_v43 }
 0x1c7   : > { %3358 = vcosq.f32 %v1587_v63  ;;  %v1735_v49 = vor.u32 %v1734_v34, %v1733_v60  ;;  %vm4584_vm3 = vcmp.le.f32.partialorder %v1395_v53, 0.7853982  ;;  %v4588_v61 = vshll.u32 %v1715_v36, 8 }
 0x1c8   : > { %3360 = vsinq.f32 %v1587_v63  ;;  %v1463_v20 = vclz %v3104_v28  ;;  %v1606_v58 = vand.u32 2139095040, %v4564_v35  ;;  %v1482_v15 = vsel %vm1397_vm2, %v1481_v9, %v1457_v5 }
 0x1c9   : > { %v1723_v41 = vshrl.u32 %v3491_v0, %v1722_v43  ;;  %v1738_v54 = vor.u32 %v1737_v39, %v1736_v42  ;;  %vm1739_vm4 = vcmp.lt.s32.totalorder %v4560_v32, 1  ;;  %vm1741_vm5 = vcmp.lt.s32.totalorder %v4560_v32, 3  ;;  %v250_v39 = vpop.permute.xlu1 %249 }
 0x1ca   : > { %v3105_v10 = vadd.s32 4294967294, %v1463_v20  ;;  %vm1742_vm6 = vcmp.lt.s32.totalorder %v4560_v32, 4  ;;  %v1747_v53 = vsel %vm1739_vm4, %v1726_v22, %v1729_v48  ;;  %v1751_v24 = vsel %vm1739_vm4, %v1729_v48, %v1732_v25 }
 0x1cb   : > { %v1744_v51 = vsel %vm1742_vm6, %v1732_v25, 2102212464  ;;  %v1748_v3 = vsel %vm1742_vm6, %v1735_v49, 920167782  ;;  %v1752_v56 = vsel %vm1742_vm6, %v1738_v54, 1326507024  ;;  %v1743_v23 = vsel %vm1739_vm4, %v1723_v41, %v1726_v22 }
 0x1cc   : > { %vm3106_vm7 = vcmp.lt.s32.totalorder %v3105_v10, 0  ;;  %vm1740_vm10 = vcmp.lt.s32.totalorder %v4560_v32, 2  ;;  %v1749_v59 = vsel %vm1741_vm5, %v1732_v25, %v1748_v3  ;;  %v1753_v18 = vsel %vm1741_vm5, %v1735_v49, %v1752_v56 }
 0x1cd   : > { %vm1594_vm8 = vcmp.lt.s32.totalorder %v4555_v57, 2  ;;  %v1466_v1 = vsel %vm3106_vm7, 0, %v3105_v10  ;;  %v1750_v55 = vsel %vm1740_vm10, %v1747_v53, %v1749_v59  ;;  %v1754_v5 = vsel %vm1740_vm10, %v1751_v24, %v1753_v18 }
 0x1ce   : > { %vm1591_vm9 = vweird.f32 %v4357_v46  ;;  %v1467_v26 = vsub.s32 32, %v1466_v1  ;;  %v1471_v31 = vsub.s32 4294967266, %v1466_v1  ;;  %v1745_v30 = vsel %vm1741_vm5, %v1729_v48, %v1744_v51 }
 0x1cf   : > { %v1607_v40 = vshrl.u32 %v1606_v58, 23  ;;  %v4611_v19 = vmul.u32.u64.low %v4588_v61, %v1754_v5  ;;  %v4612_v43 = vmul.u32.u64.high %v4588_v61, %v1754_v5, %v4611_v19  ;;  %v1468_v13 = vshll.u32 %v4558_v21, %v1466_v1 }
 0x1d0   : > { %v4615_v45 = vmul.u32.u64.low %v4588_v61, %v1750_v55  ;;  %v4616_v36 = vmul.u32.u64.high %v4588_v61, %v1750_v55, %v4615_v45  ;;  %v1469_v7 = vshrl.u32 %v1451_v37, %v1467_v26  ;;  %v1472_v16 = vadd.s32 127, %v1471_v31 }
 0x1d1   : > { %v3111_v62 = vadd.s32 4294967169, %v1607_v40  ;;  %v3359_v50 = vpop.eup %3358  ;;  %vm1595_vm12 = vcmp.eq.s32.totalorder %v4555_v57, 0  ;;  %vm1598_vm11 = vcmp.eq.s32.totalorder %v4555_v57, 2  ;;  %v1484_v33 = vsel %vm4584_vm3, 0, %v1482_v15 }
 0x1d2   : > { %v1746_v44 = vsel %vm1740_vm10, %v1743_v23, %v1745_v30  ;;  %v3361_v27 = vpop.eup %3360  ;;  %v1599_v34 = vxor.u32 2147483648, %v3359_v50  ;;  %v1470_v38 = vor.u32 %v1469_v7, %v1468_v13  ;;  %v1473_v9 = vshll.u32 %v1472_v16, 23 }
 0x1d3   : > { %v1613_v22 = vadd.s32 1, %v3111_v62  ;;  %v1596_v21 = vxor.u32 2147483648, %v3361_v27  ;;  %vm1764_vm13 = vc.u32 %v4612_v43, %v4615_v45  ;;  %v1765_v37 = vadd.s32 1, %v4616_v36 }
 0x1d4   : > { %v1603_v60 = vand.u32 2147483647, %v4564_v35  ;;  %v1600_v63 = vsel %vm1598_vm11, %v1599_v34, %v3361_v27  ;;  %v1474_v28 = vor.u32 4788187, %v1473_v9  ;;  %v1762_v48 = vmul.u32 %v4588_v61, %v1746_v44 }
 0x1d5   : > { %vm1614_vm14 = vcmp.gt.s32.totalorder %v1613_v22, 0  ;;  %v1597_v32 = vsel %vm1595_vm12, %v3359_v50, %v1596_v21  ;;  %v1488_v25 = vadd.s32 3, %v1484_v33  ;;  %v1766_v49 = vsel %vm1764_vm13, %v1765_v37, %v4616_v36 }
 0x1d6   : > { %v1615_v42 = vsel %vm1614_vm14, %v1613_v22, 0  ;;  %v1601_v20 = vsel %vm1594_vm8, %v1597_v32, %v1600_v63  ;;  %v1475_v58 = vand.u32 2147483647, %v1474_v28  ;;  %v1477_v15 = vcvt.s32.f32 %v1470_v38 }
 0x1d7   : > { %v1767_v41 = vadd.s32 %v1766_v49, %v1762_v48  ;;  %v1602_v54 = vsel %vm1591_vm9, nan, %v1601_v20  ;;  %v1617_v10 = vand.u32 31, %v1615_v42  ;;  %v316_v51 = vmul.f32 %v4550_v14, %v250_v39 }
 0x1d8   : > { %2966 = vst [vmem:[%s3893_s4 + $0x58] sm:$0xff] %v1602_v54  ;;  %v1478_v61 = vmul.f32 %v1477_v15, %v1475_v58  ;;  %v4640_v3 = vand.u32 3, %v1488_v25  ;;  %v1610_v24 = vand.u32 8388607, %v1603_v60  ;;  %v1616_v56 = vshrl.u32 %v1615_v42, 5  ;;  %v245_v15 = vpop.permute.xlu0 %244 }
 0x1d9   : > { %v1768_v53 = vadd.s32 536870912, %v1767_v41  ;;  %v1618_v57 = vsub.s32 32, %v1617_v10  ;;  %v1620_v1 = vshll.u32 %v3491_v0, %v1617_v10  ;;  %v1623_v46 = vshll.u32 %v3492_v2, %v1617_v10 }
 0x1da   : > { %v1479_v59 = vxor.u32 2147483648, %v1478_v61  ;;  %v1626_v5 = vshll.u32 %v3493_v4, %v1617_v10  ;;  %v1629_v40 = vshll.u32 %v3494_v6, %v1617_v10  ;;  %v1611_v50 = vor.u32 8388608, %v1610_v24 }
 0x1db   : > { %v4644_v18 = vshrl.u32 %v1768_v53, 30  ;;  %v1621_v23 = vshrl.u32 %v3492_v2, %v1618_v57  ;;  %v1624_v55 = vshrl.u32 %v3493_v4, %v1618_v57  ;;  %v1627_v26 = vshrl.u32 %v3494_v6, %v1618_v57 }
 0x1dc   : > { %v1480_v31 = vsel %vm1397_vm2, %v1479_v59, %v1478_v61  ;;  %v1630_v19 = vshrl.u32 %v3495_v8, %v1618_v57  ;;  %v1632_v44 = vshll.u32 %v3495_v8, %v1617_v10  ;;  %v1633_v27 = vshrl.u32 %v3496_v17, %v1618_v57 }
 0x1dd   : > { %v1770_v30 = vshll.u32 %v4644_v18, 30  ;;  %v1483_v36 = vsel %vm4584_vm3, %v4387_v29, %v1480_v31  ;;  %v1622_v13 = vor.u32 %v1621_v23, %v1620_v1  ;;  %v1625_v7 = vor.u32 %v1624_v55, %v1623_v46 }
 0x1de   : > { %v1628_v16 = vor.u32 %v1627_v26, %v1626_v5  ;;  %3362 = vcosq.f32 %v1483_v36  ;;  %v1631_v33 = vor.u32 %v1630_v19, %v1629_v40  ;;  %v4665_v34 = vadd.f32 %v4494_v47, %v316_v51 }
 0x1df   : > { %v4660_v62 = vsub.s32 %v1767_v41, %v1770_v30  ;;  %3364 = vsinq.f32 %v1483_v36  ;;  %vm1709_vm0 = vcmp.lt.s32.totalorder %v4497_v52, 0  ;;  %vm1635_vm15 = vcmp.lt.s32.totalorder %v1616_v56, 1 }
 0x1e0   : > { %vm1637_vm1 = vcmp.lt.s32.totalorder %v1616_v56, 3  ;;  %vm1638_vm2 = vcmp.lt.s32.totalorder %v1616_v56, 4  ;;  %v1634_v38 = vor.u32 %v1633_v27, %v1632_v44  ;;  %v1643_v22 = vsel %vm1635_vm15, %v1622_v13, %v1625_v7 }
 0x1e1   : > { %v1773_v12 = vsub.s32 0, %v4660_v62  ;;  %v1640_v9 = vsel %vm1638_vm2, %v1628_v16, 2102212464  ;;  %v1644_v21 = vsel %vm1638_vm2, %v1631_v33, 920167782  ;;  %v1619_v63 = vshrl.u32 %v3491_v0, %v1618_v57 }
 0x1e2   : > { %vm1636_vm3 = vcmp.lt.s32.totalorder %v1616_v56, 2  ;;  %v1645_v28 = vsel %vm1637_vm1, %v1628_v16, %v1644_v21  ;;  %v1647_v32 = vsel %vm1635_vm15, %v1625_v7, %v1628_v16  ;;  %v1648_v25 = vsel %vm1638_vm2, %v1634_v38, 1326507024 }
 0x1e3   : > { %v3116_v37 = vmin.u32 %v1773_v12, %v4660_v62  ;;  %v1646_v48 = vsel %vm1636_vm3, %v1643_v22, %v1645_v28  ;;  %v1651_v49 = vshll.u32 %v1611_v50, 8  ;;  %vm1490_vm4 = vcmp.lt.s32.totalorder %v4640_v3, 2 }
 0x1e4   : > { %vm1491_vm5 = vcmp.eq.s32.totalorder %v4640_v3, 0  ;;  %vm4679_vm6 = vcmp.le.f32.partialorder %v1707_v11, 0.7853982  ;;  %v1639_v20 = vsel %vm1635_vm15, %v1619_v63, %v1622_v13  ;;  %v1641_v58 = vsel %vm1637_vm1, %v1625_v7, %v1640_v9 }
 0x1e5   : > { %v1775_v39 = vclz %v3116_v37  ;;  %vm1487_vm7 = vweird.f32 %v4387_v29  ;;  %v1793_v41 = vsub.s32 4, %v4644_v18  ;;  %v1649_v54 = vsel %vm1637_vm1, %v1631_v33, %v1648_v25 }
 0x1e6   : > { %v4688_v10 = vmul.u32.u64.low %v1651_v49, %v1646_v48  ;;  %v4689_v61 = vmul.u32.u64.high %v1651_v49, %v1646_v48, %v4688_v10  ;;  %vm1494_vm10 = vcmp.eq.s32.totalorder %v4640_v3, 2  ;;  %v1650_v53 = vsel %vm1636_vm3, %v1647_v32, %v1649_v54 }
 0x1e7   : > { %v3117_v11 = vadd.s32 4294967294, %v1775_v39  ;;  %v1918_v51 = vand.u32 2139095040, %v4665_v34  ;;  %v1642_v24 = vsel %vm1636_vm3, %v1639_v20, %v1641_v58  ;;  %v315_v1 = vmul.f32 %v4550_v14, %v245_v15  ;;  %v260_v39 = vpop.permute.xlu1 %259 }
 0x1e8   : > { %v4695_v57 = vmul.u32.u64.low %v1651_v49, %v1650_v53  ;;  %v4696_v59 = vmul.u32.u64.high %v1651_v49, %v1650_v53, %v4695_v57  ;;  %v3363_v46 = vpop.eup %3362  ;;  %v1763_v23 = vadd.s32 %v4615_v45, %v4612_v43  ;;  %v1915_v55 = vand.u32 2147483647, %v4665_v34 }
 0x1e9   : > { %vm3118_vm8 = vcmp.lt.s32.totalorder %v3117_v11, 0  ;;  %v1919_v5 = vshrl.u32 %v1918_v51, 23  ;;  %v3365_v26 = vpop.eup %3364  ;;  %v1495_v31 = vxor.u32 2147483648, %v3363_v46  ;;  %v1794_v56 = vsel %vm1709_vm0, %v1793_v41, %v4644_v18 }
 0x1ea   : > { %v1778_v30 = vsel %vm3118_vm8, 0, %v3117_v11  ;;  %v1661_v40 = vadd.s32 1, %v4689_v61  ;;  %v1492_v19 = vxor.u32 2147483648, %v3365_v26  ;;  %v1658_v7 = vmul.u32 %v1651_v49, %v1642_v24 }
 0x1eb   : > { %v1779_v36 = vsub.s32 32, %v1778_v30  ;;  %v1783_v13 = vsub.s32 4294967266, %v1778_v30  ;;  %v1496_v43 = vsel %vm1494_vm10, %v1495_v31, %v3365_v26  ;;  %v1780_v45 = vshll.u32 %v4660_v62, %v1778_v30 }
 0x1ec   : > { %vm1660_vm9 = vc.u32 %v4696_v59, %v4688_v10  ;;  %v3123_v16 = vadd.s32 4294967169, %v1919_v5  ;;  %v1493_v50 = vsel %vm1491_vm5, %v3363_v46, %v1492_v19  ;;  %v1796_v12 = vsel %vm4679_vm6, 0, %v1794_v56 }
 0x1ed   : > { %v1781_v33 = vshrl.u32 %v1763_v23, %v1779_v36  ;;  %v1784_v18 = vadd.s32 127, %v1783_v13  ;;  %v1662_v44 = vsel %vm1660_vm9, %v1661_v40, %v4689_v61  ;;  %v1497_v27 = vsel %vm1490_vm4, %v1493_v50, %v1496_v43 }
 0x1ee   : > { %v1663_v38 = vadd.s32 %v1662_v44, %v1658_v7  ;;  %v1925_v9 = vadd.s32 1, %v3123_v16  ;;  %v1498_v62 = vsel %vm1487_vm7, nan, %v1497_v27  ;;  %v1800_v28 = vadd.s32 3, %v1796_v12 }
 0x1ef   : > { %v1782_v22 = vor.u32 %v1781_v33, %v1780_v45  ;;  %v1785_v21 = vshll.u32 %v1784_v18, 23  ;;  %2965 = vst [vmem:[%s3893_s4 + $0x50] sm:$0xff] %v1498_v62  ;;  %v1922_v48 = vand.u32 8388607, %v1915_v55  ;;  %v4725_v49 = vadd.f32 %v4494_v47, %v315_v1 }
 0x1f0   : > { %v1664_v37 = vadd.s32 536870912, %v1663_v38  ;;  %vm1926_vm12 = vcmp.gt.s32.totalorder %v1925_v9, 0  ;;  %v4728_v54 = vand.u32 3, %v1800_v28  ;;  %v4731_v11 = vmul.f32 %v4550_v14, %v260_v39 }
 0x1f1   : > { %v1786_v63 = vor.u32 4788187, %v1785_v21  ;;  %v1927_v3 = vsel %vm1926_vm12, %v1925_v9, 0  ;;  %v1789_v20 = vcvt.s32.f32 %v1782_v22  ;;  %v1923_v61 = vor.u32 8388608, %v1922_v48 }
 0x1f2   : > { %v4722_v32 = vshrl.u32 %v1664_v37, 30  ;;  %v1929_v25 = vand.u32 31, %v1927_v3  ;;  %v1659_v53 = vadd.s32 %v4688_v10, %v4696_v59  ;;  %v1814_v57 = vand.u32 2139095040, %v4725_v49 }
 0x1f3   : > { %v1787_v29 = vand.u32 2147483647, %v1786_v63  ;;  %v1928_v56 = vshrl.u32 %v1927_v3, 5  ;;  %vm1605_vm11 = vcmp.lt.s32.totalorder %v4564_v35, 0  ;;  %v4755_v18 = vshll.u32 %v1923_v61, 8 }
 0x1f4   : > { %v1666_v58 = vshll.u32 %v4722_v32, 30  ;;  %v1930_v15 = vsub.s32 32, %v1929_v25  ;;  %v1932_v46 = vshll.u32 %v3491_v0, %v1929_v25  ;;  %v1935_v31 = vshll.u32 %v3492_v2, %v1929_v25 }
 0x1f5   : > { %v1790_v41 = vmul.f32 %v1789_v20, %v1787_v29  ;;  %v1938_v30 = vshll.u32 %v3493_v4, %v1929_v25  ;;  %v1941_v19 = vshll.u32 %v3494_v6, %v1929_v25  ;;  %v1944_v16 = vshll.u32 %v3495_v8, %v1929_v25 }
 0x1f6   : > { %v4734_v51 = vsub.s32 %v1663_v38, %v1666_v58  ;;  %v1933_v24 = vshrl.u32 %v3492_v2, %v1930_v15  ;;  %v1936_v23 = vshrl.u32 %v3493_v4, %v1930_v15  ;;  %v1939_v5 = vshrl.u32 %v3494_v6, %v1930_v15 }
 0x1f7   : > { %v1791_v1 = vxor.u32 2147483648, %v1790_v41  ;;  %v1942_v10 = vshrl.u32 %v3495_v8, %v1930_v15  ;;  %v1945_v50 = vshrl.u32 %v3496_v17, %v1930_v15  ;;  %v1815_v44 = vshrl.u32 %v1814_v57, 23 }
 0x1f8   : > { %v1669_v26 = vsub.s32 0, %v4734_v51  ;;  %v1934_v40 = vor.u32 %v1933_v24, %v1932_v46  ;;  %v1937_v7 = vor.u32 %v1936_v23, %v1935_v31  ;;  %v1940_v43 = vor.u32 %v1939_v5, %v1938_v30 }
 0x1f9   : > { %v1792_v59 = vsel %vm1709_vm0, %v1791_v1, %v1790_v41  ;;  %v1943_v45 = vor.u32 %v1942_v10, %v1941_v19  ;;  %v1689_v42 = vsub.s32 4, %v4722_v32  ;;  %v1931_v27 = vshrl.u32 %v3491_v0, %v1930_v15 }
 0x1fa   : > { %v1795_v36 = vsel %vm4679_vm6, %v4497_v52, %v1792_v59  ;;  %v3112_v13 = vmin.u32 %v1669_v26, %v4734_v51  ;;  %v1946_v12 = vor.u32 %v1945_v50, %v1944_v16  ;;  %vm1947_vm13 = vcmp.lt.s32.totalorder %v1928_v56, 1 }
 0x1fb   : > { %3366 = vcosq.f32 %v1795_v36  ;;  %vm1949_vm14 = vcmp.lt.s32.totalorder %v1928_v56, 3  ;;  %vm1950_vm0 = vcmp.lt.s32.totalorder %v1928_v56, 4  ;;  %v1955_v9 = vsel %vm1947_vm13, %v1934_v40, %v1937_v7 }
 0x1fc   : > { %3368 = vsinq.f32 %v1795_v36  ;;  %v1671_v33 = vclz %v3112_v13  ;;  %v1952_v62 = vsel %vm1950_vm0, %v1940_v43, 2102212464  ;;  %v1956_v22 = vsel %vm1950_vm0, %v1943_v45, 920167782 }
 0x1fd   : > { %v1959_v21 = vsel %vm1947_vm13, %v1937_v7, %v1940_v43  ;;  %v1960_v37 = vsel %vm1950_vm0, %v1946_v12, 1326507024  ;;  %vm4763_vm15 = vcmp.le.f32.partialorder %v1603_v60, 0.7853982  ;;  %vm1948_vm2 = vcmp.lt.s32.totalorder %v1928_v56, 2 }
 0x1fe   : > { %v3113_v38 = vadd.s32 4294967294, %v1671_v33  ;;  %v1957_v28 = vsel %vm1949_vm14, %v1940_v43, %v1956_v22  ;;  %v1961_v48 = vsel %vm1949_vm14, %v1943_v45, %v1960_v37  ;;  %vm1802_vm3 = vcmp.lt.s32.totalorder %v4728_v54, 2 }
 0x1ff   : > { %v1951_v25 = vsel %vm1947_vm13, %v1931_v27, %v1934_v40  ;;  %v1958_v39 = vsel %vm1948_vm2, %v1955_v9, %v1957_v28  ;;  %v1962_v29 = vsel %vm1948_vm2, %v1959_v21, %v1961_v48  ;;  %vm1799_vm4 = vweird.f32 %v4497_v52 }
 0x200   : > { %vm3114_vm1 = vcmp.lt.s32.totalorder %v3113_v38, 0  ;;  %v1953_v58 = vsel %vm1949_vm14, %v1937_v7, %v1952_v62  ;;  %v3119_v15 = vadd.s32 4294967169, %v1815_v44  ;;  %vm1803_vm5 = vcmp.eq.s32.totalorder %v4728_v54, 0 }
 0x201   : > { %v1674_v3 = vsel %vm3114_vm1, 0, %v3113_v38  ;;  %v4776_v41 = vmul.u32.u64.low %v4755_v18, %v1962_v29  ;;  %v4777_v61 = vmul.u32.u64.high %v4755_v18, %v1962_v29, %v4776_v41  ;;  %vm1806_vm6 = vcmp.eq.s32.totalorder %v4728_v54, 2 }
 0x202   : > { %v1675_v60 = vsub.s32 32, %v1674_v3  ;;  %v1679_v20 = vsub.s32 4294967266, %v1674_v3  ;;  %v4780_v24 = vmul.u32.u64.low %v4755_v18, %v1958_v39  ;;  %v4781_v57 = vmul.u32.u64.high %v4755_v18, %v1958_v39, %v4780_v24 }
 0x203   : > { %v1676_v1 = vshll.u32 %v4734_v51, %v1674_v3  ;;  %v1821_v5 = vadd.s32 1, %v3119_v15  ;;  %v1690_v31 = vsel %vm1605_vm11, %v1689_v42, %v4722_v32  ;;  %v1954_v30 = vsel %vm1948_vm2, %v1951_v25, %v1953_v58 }
 0x204   : > { %v1677_v46 = vshrl.u32 %v1659_v53, %v1675_v60  ;;  %v1680_v23 = vadd.s32 127, %v1679_v20  ;;  %vm1972_vm10 = vc.u32 %v4777_v61, %v4780_v24  ;;  %v1973_v53 = vadd.s32 1, %v4781_v57 }
 0x205   : > { %v3367_v26 = vpop.eup %3366  ;;  %vm1822_vm7 = vcmp.gt.s32.totalorder %v1821_v5, 0  ;;  %v1811_v36 = vand.u32 2147483647, %v4725_v49  ;;  %v1970_v32 = vmul.u32 %v4755_v18, %v1954_v30  ;;  %v1692_v45 = vsel %vm4763_vm15, 0, %v1690_v31 }
 0x206   : > { %v3369_v10 = vpop.eup %3368  ;;  %v1807_v59 = vxor.u32 2147483648, %v3367_v26  ;;  %v1678_v40 = vor.u32 %v1677_v46, %v1676_v1  ;;  %v1681_v19 = vshll.u32 %v1680_v23, 23  ;;  %v1823_v56 = vsel %vm1822_vm7, %v1821_v5, 0 }
 0x207   : > { %v1804_v51 = vxor.u32 2147483648, %v3369_v10  ;;  %v1974_v16 = vsel %vm1972_vm10, %v1973_v53, %v4781_v57  ;;  %v1825_v50 = vand.u32 31, %v1823_v56  ;;  %v1818_v18 = vand.u32 8388607, %v1811_v36 }
 0x208   : > { %v1808_v13 = vsel %vm1806_vm6, %v1807_v59, %v3369_v10  ;;  %v1682_v7 = vor.u32 4788187, %v1681_v19  ;;  %v1685_v42 = vcvt.s32.f32 %v1678_v40  ;;  %v1975_v27 = vadd.s32 %v1974_v16, %v1970_v32 }
 0x209   : > { %v1805_v43 = vsel %vm1803_vm5, %v3367_v26, %v1804_v51  ;;  %v1826_v38 = vsub.s32 32, %v1825_v50  ;;  %v4809_v9 = vadd.f32 %v4494_v47, %v4731_v11  ;;  %v1696_v22 = vadd.s32 3, %v1692_v45 }
 0x20a   : > { %v1809_v33 = vsel %vm1802_vm3, %v1805_v43, %v1808_v13  ;;  %v1683_v44 = vand.u32 2147483647, %v1682_v7  ;;  %v1976_v21 = vadd.s32 536870912, %v1975_v27  ;;  %v1824_v54 = vshrl.u32 %v1823_v56, 5 }
 0x20b   : > { %v1810_v12 = vsel %vm1799_vm4, nan, %v1809_v33  ;;  %v1828_v37 = vshll.u32 %v3491_v0, %v1825_v50  ;;  %v1829_v28 = vshrl.u32 %v3492_v2, %v1826_v38  ;;  %v1832_v52 = vshrl.u32 %v3493_v4, %v1826_v38 }
 0x20c   : > { %2968 = vst [vmem:[%s3893_s4 + $0x68] sm:$0xff] %v1810_v12  ;;  %v1686_v62 = vmul.f32 %v1685_v42, %v1683_v44  ;;  %v1835_v48 = vshrl.u32 %v3494_v6, %v1826_v38  ;;  %v4816_v25 = vshrl.u32 %v1976_v21, 30  ;;  %v1831_v39 = vshll.u32 %v3492_v2, %v1825_v50 }
 0x20d   : > { %v1838_v47 = vshrl.u32 %v3495_v8, %v1826_v38  ;;  %v1834_v11 = vshll.u32 %v3493_v4, %v1825_v50  ;;  %v1837_v29 = vshll.u32 %v3494_v6, %v1825_v50  ;;  %v1840_v60 = vshll.u32 %v3495_v8, %v1825_v50 }
 0x20e   : > { %v1687_v3 = vxor.u32 2147483648, %v1686_v62  ;;  %v1841_v20 = vshrl.u32 %v3496_v17, %v1826_v38  ;;  %v1978_v15 = vshll.u32 %v4816_v25, 30  ;;  %v1830_v41 = vor.u32 %v1829_v28, %v1828_v37 }
 0x20f   : > { %v1833_v57 = vor.u32 %v1832_v52, %v1831_v39  ;;  %v1836_v46 = vor.u32 %v1835_v48, %v1834_v11  ;;  %v1839_v23 = vor.u32 %v1838_v47, %v1837_v29  ;;  %v4830_v26 = vand.u32 3, %v1696_v22 }
 0x210   : > { %v1688_v58 = vsel %vm1605_vm11, %v1687_v3, %v1686_v62  ;;  %v1842_v5 = vor.u32 %v1841_v20, %v1840_v60  ;;  %v4832_v31 = vsub.s32 %v1975_v27, %v1978_v15  ;;  %v1819_v30 = vor.u32 8388608, %v1818_v18 }
 0x211   : > { %v1691_v1 = vsel %vm4763_vm15, %v4564_v35, %v1688_v58  ;;  %vm1843_vm8 = vcmp.lt.s32.totalorder %v1824_v54, 1  ;;  %v2126_v10 = vand.u32 2139095040, %v4809_v9  ;;  %vm1845_vm9 = vcmp.lt.s32.totalorder %v1824_v54, 3 }
 0x212   : > { %3370 = vcosq.f32 %v1691_v1  ;;  %v1981_v59 = vsub.s32 0, %v4832_v31  ;;  %vm1846_vm12 = vcmp.lt.s32.totalorder %v1824_v54, 4  ;;  %v1851_v63 = vsel %vm1843_vm8, %v1830_v41, %v1833_v57 }
 0x213   : > { %3372 = vsinq.f32 %v1691_v1  ;;  %v1827_v40 = vshrl.u32 %v3491_v0, %v1826_v38  ;;  %v1848_v19 = vsel %vm1846_vm12, %v1836_v46, 2102212464  ;;  %v1852_v51 = vsel %vm1846_vm12, %v1839_v23, 920167782 }
 0x214   : > { %v1856_v53 = vsel %vm1846_vm12, %v1842_v5, 1326507024  ;;  %v3124_v13 = vmin.u32 %v1981_v59, %v4832_v31  ;;  %vm1844_vm11 = vcmp.lt.s32.totalorder %v1824_v54, 2  ;;  %v1853_v7 = vsel %vm1845_vm9, %v1836_v46, %v1852_v51  ;;  %v255_v5 = vpop.permute.xlu0 %254 }
 0x215   : > { %v1855_v32 = vsel %vm1843_vm8, %v1833_v57, %v1836_v46  ;;  %v1854_v56 = vsel %vm1844_vm11, %v1851_v63, %v1853_v7  ;;  %v1857_v43 = vsel %vm1845_vm9, %v1839_v23, %v1856_v53  ;;  %v1859_v45 = vshll.u32 %v1819_v30, 8 }
 0x216   : > { %v2127_v16 = vshrl.u32 %v2126_v10, 23  ;;  %vm1917_vm13 = vcmp.lt.s32.totalorder %v4665_v34, 0  ;;  %v1983_v50 = vclz %v3124_v13  ;;  %v1847_v33 = vsel %vm1843_vm8, %v1827_v40, %v1830_v41 }
 0x217   : > { %v1849_v44 = vsel %vm1845_vm9, %v1833_v57, %v1848_v19  ;;  %v2123_v42 = vand.u32 2147483647, %v4809_v9  ;;  %vm1695_vm14 = vweird.f32 %v4564_v35  ;;  %v1858_v27 = vsel %vm1844_vm11, %v1855_v32, %v1857_v43 }
 0x218   : > { %v4849_v12 = vmul.u32.u64.low %v1859_v45, %v1854_v56  ;;  %v4850_v18 = vmul.u32.u64.high %v1859_v45, %v1854_v56, %v4849_v12  ;;  %v3131_v38 = vadd.s32 4294967169, %v2127_v16  ;;  %vm1698_vm0 = vcmp.lt.s32.totalorder %v4830_v26, 2 }
 0x219   : > { %v3125_v62 = vadd.s32 4294967294, %v1983_v50  ;;  %v4854_v22 = vmul.u32.u64.low %v1859_v45, %v1858_v27  ;;  %v4855_v21 = vmul.u32.u64.high %v1859_v45, %v1858_v27, %v4854_v22  ;;  %vm1699_vm15 = vcmp.eq.s32.totalorder %v4830_v26, 0 }
 0x21a   : > { %vm1702_vm1 = vcmp.eq.s32.totalorder %v4830_v26, 2  ;;  %v1850_v37 = vsel %vm1844_vm11, %v1847_v33, %v1849_v44  ;;  %v2133_v28 = vadd.s32 1, %v3131_v38  ;;  %v1971_v48 = vadd.s32 %v4780_v24, %v4777_v61 }
 0x21b   : > { %vm3126_vm2 = vcmp.lt.s32.totalorder %v3125_v62, 0  ;;  %v2001_v3 = vsub.s32 4, %v4816_v25  ;;  %v4865_v39 = vand.u32 8388607, %v2123_v42  ;;  %v1869_v60 = vadd.s32 1, %v4850_v18 }
 0x21c   : > { %v3371_v52 = vpop.eup %3370  ;;  %v1986_v29 = vsel %vm3126_vm2, 0, %v3125_v62  ;;  %vm2134_vm3 = vcmp.gt.s32.totalorder %v2133_v28, 0  ;;  %v1866_v15 = vmul.u32 %v1859_v45, %v1850_v37  ;;  %vm1868_vm4 = vc.u32 %v4855_v21, %v4849_v12 }
 0x21d   : > { %v3373_v47 = vpop.eup %3372  ;;  %v1703_v11 = vxor.u32 2147483648, %v3371_v52  ;;  %v1987_v20 = vsub.s32 32, %v1986_v29  ;;  %v1991_v58 = vsub.s32 4294967266, %v1986_v29  ;;  %v1988_v24 = vshll.u32 %v4832_v31, %v1986_v29 }
 0x21e   : > { %v1700_v54 = vxor.u32 2147483648, %v3373_v47  ;;  %v2135_v41 = vsel %vm2134_vm3, %v2133_v28, 0  ;;  %v1870_v23 = vsel %vm1868_vm4, %v1869_v60, %v4850_v18  ;;  %v2002_v10 = vsel %vm1917_vm13, %v2001_v3, %v4816_v25  ;;  %v4910_v60 = vld [vmem:[%s5672_s1 + $0x1] ss:$0 sm:$0xff] }
 0x21f   : > { %v1704_v61 = vsel %vm1702_vm1, %v1703_v11, %v3373_v47  ;;  %v1989_v1 = vshrl.u32 %v1971_v48, %v1987_v20  ;;  %v1992_v46 = vadd.s32 127, %v1991_v58  ;;  %v1871_v31 = vadd.s32 %v1870_v23, %v1866_v15 }
 0x220   : > { %v1701_v57 = vsel %vm1699_vm15, %v3371_v52, %v1700_v54  ;;  %v2137_v59 = vand.u32 31, %v2135_v41  ;;  %vm4886_vm5 = vcmp.le.f32.partialorder %v1915_v55, 0.7853982  ;;  %v317_v13 = vmul.f32 %v4550_v14, %v255_v5 }
 0x221   : > { %v1705_v30 = vsel %vm1698_vm0, %v1701_v57, %v1704_v61  ;;  %v1990_v40 = vor.u32 %v1989_v1, %v1988_v24  ;;  %v1993_v19 = vshll.u32 %v1992_v46, 23  ;;  %v1872_v26 = vadd.s32 536870912, %v1871_v31 }
 0x222   : > { %v1706_v63 = vsel %vm1695_vm14, nan, %v1705_v30  ;;  %v2138_v53 = vsub.s32 32, %v2137_v59  ;;  %v2004_v25 = vsel %vm4886_vm5, 0, %v2002_v10  ;;  %v2131_v35 = vor.u32 8388608, %v4865_v39 }
 0x223   : > { %2967 = vst [vmem:[%s3893_s4 + $0x60] sm:$0xff] %v1706_v63  ;;  %v1994_v7 = vor.u32 4788187, %v1993_v19  ;;  %v2136_v32 = vshrl.u32 %v2135_v41, 5  ;;  %v1997_v56 = vcvt.s32.f32 %v1990_v40  ;;  %v1873_v43 = vshrl.u32 %v1872_v26, 30 }
 0x224   : > { %v2141_v45 = vshrl.u32 %v3492_v2, %v2138_v53  ;;  %v2144_v55 = vshrl.u32 %v3493_v4, %v2138_v53  ;;  %v2147_v50 = vshrl.u32 %v3494_v6, %v2138_v53  ;;  %v2149_v33 = vshll.u32 %v3494_v6, %v2137_v59 }
 0x225   : > { %v1995_v16 = vand.u32 2147483647, %v1994_v7  ;;  %v2150_v44 = vshrl.u32 %v3495_v8, %v2138_v53  ;;  %v1874_v27 = vshll.u32 %v1873_v43, 30  ;;  %v2140_v18 = vshll.u32 %v3491_v0, %v2137_v59 }
 0x226   : > { %v2143_v38 = vshll.u32 %v3492_v2, %v2137_v59  ;;  %v2146_v62 = vshll.u32 %v3493_v4, %v2137_v59  ;;  %v2153_v28 = vshrl.u32 %v3496_v17, %v2138_v53  ;;  %vm1813_vm6 = vcmp.lt.s32.totalorder %v4725_v49, 0 }
 0x227   : > { %v1998_v22 = vmul.f32 %v1997_v56, %v1995_v16  ;;  %v2151_v37 = vor.u32 %v2150_v44, %v2149_v33  ;;  %v4904_v52 = vsub.s32 %v1871_v31, %v1874_v27  ;;  %v2142_v48 = vor.u32 %v2141_v45, %v2140_v18 }
 0x228   : > { %v2145_v3 = vor.u32 %v2144_v55, %v2143_v38  ;;  %v2148_v39 = vor.u32 %v2147_v50, %v2146_v62  ;;  %v2008_v11 = vadd.s32 3, %v2004_v25  ;;  %v2152_v29 = vshll.u32 %v3495_v8, %v2137_v59 }
 0x229   : > { %v1999_v47 = vxor.u32 2147483648, %v1998_v22  ;;  %v4913_v54 = vadd.f32 %v4910_v60, %v317_v13  ;;  %v1877_v20 = vsub.s32 0, %v4904_v52  ;;  %vm2155_vm7 = vcmp.lt.s32.totalorder %v2136_v32, 1 }
 0x22a   : > { %vm2158_vm10 = vcmp.lt.s32.totalorder %v2136_v32, 4  ;;  %v2171_v58 = vshll.u32 %v2131_v35, 8  ;;  %v2154_v61 = vor.u32 %v2153_v28, %v2152_v29  ;;  %vm2157_vm8 = vcmp.lt.s32.totalorder %v2136_v32, 3 }
 0x22b   : > { %v2000_v15 = vsel %vm1917_vm13, %v1999_v47, %v1998_v22  ;;  %v2164_v24 = vsel %vm2158_vm10, %v2151_v37, 920167782  ;;  %v3120_v57 = vmin.u32 %v1877_v20, %v4904_v52  ;;  %v2160_v1 = vsel %vm2158_vm10, %v2148_v39, 2102212464 }
 0x22c   : > { %v2003_v41 = vsel %vm4886_vm5, %v4665_v34, %v2000_v15  ;;  %v2163_v46 = vsel %vm2155_vm7, %v2142_v48, %v2145_v3  ;;  %v1897_v23 = vsub.s32 4, %v1873_v43  ;;  %v2139_v5 = vshrl.u32 %v3491_v0, %v2138_v53  ;;  %v270_v53 = vpop.permute.xlu1 %269 }
 0x22d   : > { %3374 = vcosq.f32 %v2003_v41  ;;  %v2165_v30 = vsel %vm2157_vm8, %v2148_v39, %v2164_v24  ;;  %v1879_v10 = vclz %v3120_v57  ;;  %vm2156_vm9 = vcmp.lt.s32.totalorder %v2136_v32, 2 }
 0x22e   : > { %3376 = vsinq.f32 %v2003_v41  ;;  %v2167_v31 = vsel %vm2155_vm7, %v2145_v3, %v2148_v39  ;;  %v2159_v59 = vsel %vm2155_vm7, %v2139_v5, %v2142_v48  ;;  %v2161_v63 = vsel %vm2157_vm8, %v2145_v3, %v2160_v1 }
 0x22f   : > { %v2166_v40 = vsel %vm2156_vm9, %v2163_v46, %v2165_v30  ;;  %v2168_v19 = vsel %vm2158_vm10, %v2154_v61, 1326507024  ;;  %v3121_v51 = vadd.s32 4294967294, %v1879_v10  ;;  %vm4938_vm12 = vcmp.le.f32.partialorder %v1811_v36, 0.7853982  ;;  %v265_v46 = vpop.permute.xlu0 %264 }
 0x230   : > { %v2169_v26 = vsel %vm2157_vm8, %v2151_v37, %v2168_v19  ;;  %v4932_v13 = vmul.u32.u64.low %v2171_v58, %v2166_v40  ;;  %v4933_v7 = vmul.u32.u64.high %v2171_v58, %v2166_v40, %v4932_v13  ;;  %v1898_v35 = vsel %vm1813_vm6, %v1897_v23, %v1873_v43 }
 0x231   : > { %v2170_v56 = vsel %vm2156_vm9, %v2167_v31, %v2169_v26  ;;  %v2022_v45 = vand.u32 2139095040, %v4913_v54  ;;  %vm3122_vm11 = vcmp.lt.s32.totalorder %v3121_v51, 0  ;;  %v2162_v32 = vsel %vm2156_vm9, %v2159_v59, %v2161_v63 }
 0x232   : > { %v4945_v55 = vmul.u32.u64.low %v2171_v58, %v2170_v56  ;;  %v4946_v16 = vmul.u32.u64.high %v2171_v58, %v2170_v56, %v4945_v55  ;;  %v2009_v50 = vand.u32 3, %v2008_v11  ;;  %v1882_v33 = vsel %vm3122_vm11, 0, %v3121_v51  ;;  %v4972_v51 = vld [vmem:[%s5672_s1] ss:$0 sm:$0xff] }
 0x233   : > { %v2023_v44 = vshrl.u32 %v2022_v45, 23  ;;  %v320_v27 = vmul.f32 %v4550_v14, %v270_v53  ;;  %vm2007_vm13 = vweird.f32 %v4665_v34  ;;  %v1867_v36 = vadd.s32 %v4849_v12, %v4855_v21 }
 0x234   : > { %v1883_v18 = vsub.s32 32, %v1882_v33  ;;  %v1887_v43 = vsub.s32 4294967266, %v1882_v33  ;;  %v2181_v38 = vadd.s32 1, %v4933_v7  ;;  %v1900_v62 = vsel %vm4938_vm12, 0, %v1898_v35 }
 0x235   : > { %v2178_v22 = vmul.u32 %v2171_v58, %v2162_v32  ;;  %v2019_v37 = vand.u32 2147483647, %v4913_v54  ;;  %v3127_v28 = vadd.s32 4294967169, %v2023_v44  ;;  %v1884_v48 = vshll.u32 %v4904_v52, %v1882_v33 }
 0x236   : > { %v1885_v3 = vshrl.u32 %v1867_v36, %v1883_v18  ;;  %v1888_v14 = vadd.s32 127, %v1887_v43  ;;  %vm2180_vm14 = vc.u32 %v4946_v16, %v4932_v13  ;;  %vm2011_vm0 = vcmp.eq.s32.totalorder %v2009_v50, 0 }
 0x237   : > { %v3375_v39 = vpop.eup %3374  ;;  %v2182_v12 = vsel %vm2180_vm14, %v2181_v38, %v4933_v7  ;;  %v2029_v21 = vadd.s32 1, %v3127_v28  ;;  %v4961_v47 = vadd.f32 %v4910_v60, %v320_v27  ;;  %vm2014_vm15 = vcmp.eq.s32.totalorder %v2009_v50, 2 }
 0x238   : > { %v3377_v11 = vpop.eup %3376  ;;  %v2015_v29 = vxor.u32 2147483648, %v3375_v39  ;;  %v1886_v20 = vor.u32 %v1885_v3, %v1884_v48  ;;  %v1889_v58 = vshll.u32 %v1888_v14, 23  ;;  %v2183_v15 = vadd.s32 %v2182_v12, %v2178_v22 }
 0x239   : > { %v2012_v61 = vxor.u32 2147483648, %v3377_v11  ;;  %v1904_v52 = vadd.s32 3, %v1900_v62  ;;  %vm2030_vm1 = vcmp.gt.s32.totalorder %v2029_v21, 0  ;;  %v2026_v1 = vand.u32 8388607, %v2019_v37 }
 0x23a   : > { %v2016_v24 = vsel %vm2014_vm15, %v2015_v29, %v3377_v11  ;;  %v1890_v41 = vor.u32 4788187, %v1889_v58  ;;  %v2184_v57 = vadd.s32 536870912, %v2183_v15  ;;  %vm2010_vm2 = vcmp.lt.s32.totalorder %v2009_v50, 2 }
 0x23b   : > { %v2013_v23 = vsel %vm2011_vm0, %v3375_v39, %v2012_v61  ;;  %v2031_v5 = vsel %vm2030_vm1, %v2029_v21, 0  ;;  %v2334_v30 = vand.u32 2139095040, %v4961_v47  ;;  %v1893_v59 = vcvt.s32.f32 %v1886_v20 }
 0x23c   : > { %v2017_v10 = vsel %vm2010_vm2, %v2013_v23, %v2016_v24  ;;  %v1891_v31 = vand.u32 2147483647, %v1890_v41  ;;  %v2185_v63 = vshrl.u32 %v2184_v57, 30  ;;  %v2033_v19 = vand.u32 31, %v2031_v5 }
 0x23d   : > { %v2018_v40 = vsel %vm2007_vm13, nan, %v2017_v10  ;;  %v4975_v26 = vmul.f32 %v4972_v51, %v265_v46  ;;  %v4978_v53 = vand.u32 3, %v1904_v52  ;;  %vm2125_vm3 = vcmp.lt.s32.totalorder %v4809_v9, 0 }
 0x23e   : > { %2970 = vst [vmem:[%s3893_s4 + $0x78] sm:$0xff] %v2018_v40  ;;  %v1894_v7 = vmul.f32 %v1893_v59, %v1891_v31  ;;  %v2186_v35 = vshll.u32 %v2185_v63, 30  ;;  %v2027_v56 = vor.u32 8388608, %v2026_v1  ;;  %v4983_v34 = vadd.s32 %v4932_v13, %v4946_v16 }
 0x23f   : > { %v2034_v45 = vsub.s32 32, %v2033_v19  ;;  %v2331_v32 = vand.u32 2147483647, %v4961_v47  ;;  %v2335_v55 = vshrl.u32 %v2334_v30, 23  ;;  %v2209_v44 = vsub.s32 4, %v2185_v63 }
 0x240   : > { %v1895_v50 = vxor.u32 2147483648, %v1894_v7  ;;  %v4986_v33 = vsub.s32 %v2183_v15, %v2186_v35  ;;  %v4988_v27 = vshrl.u32 %v2031_v5, 5  ;;  %v2036_v36 = vshll.u32 %v3491_v0, %v2033_v19 }
 0x241   : > { %v2037_v18 = vshrl.u32 %v3492_v2, %v2034_v45  ;;  %v2039_v43 = vshll.u32 %v3492_v2, %v2033_v19  ;;  %v2040_v38 = vshrl.u32 %v3493_v4, %v2034_v45  ;;  %v2042_v62 = vshll.u32 %v3493_v4, %v2033_v19 }
 0x242   : > { %v1896_v13 = vsel %vm1813_vm6, %v1895_v50, %v1894_v7  ;;  %v2189_v16 = vsub.s32 0, %v4986_v33  ;;  %v2043_v22 = vshrl.u32 %v3494_v6, %v2034_v45  ;;  %v2045_v3 = vshll.u32 %v3494_v6, %v2033_v19 }
 0x243   : > { %v1899_v28 = vsel %vm4938_vm12, %v4725_v49, %v1896_v13  ;;  %v2038_v48 = vor.u32 %v2037_v18, %v2036_v36  ;;  %v2046_v14 = vshrl.u32 %v3495_v8, %v2034_v45  ;;  %v2041_v12 = vor.u32 %v2040_v38, %v2039_v43 }
 0x244   : > { %3378 = vcosq.f32 %v1899_v28  ;;  %v3132_v39 = vmin.u32 %v2189_v16, %v4986_v33  ;;  %v2044_v21 = vor.u32 %v2043_v22, %v2042_v62  ;;  %v2048_v29 = vshll.u32 %v3495_v8, %v2033_v19 }
 0x245   : > { %3380 = vsinq.f32 %v1899_v28  ;;  %v2047_v11 = vor.u32 %v2046_v14, %v2045_v3  ;;  %v2049_v20 = vshrl.u32 %v3496_v17, %v2034_v45  ;;  %v5007_v15 = vshll.u32 %v2027_v56, 8 }
 0x246   : > { %v2191_v58 = vclz %v3132_v39  ;;  %v3139_v25 = vadd.s32 4294967169, %v2335_v55  ;;  %v2338_v61 = vand.u32 8388607, %v2331_v32  ;;  %v5013_v52 = vsel %vm2125_vm3, %v2209_v44, %v2185_v63 }
 0x247   : > { %v2035_v24 = vshrl.u32 %v3491_v0, %v2034_v45  ;;  %v2050_v41 = vor.u32 %v2049_v20, %v2048_v29  ;;  %vm2051_vm4 = vcmp.lt.s32.totalorder %v4988_v27, 1  ;;  %vm5019_vm5 = vcmp.le.f32.partialorder %v2123_v42, 0.7853982 }
 0x248   : > { %v3133_v1 = vadd.s32 4294967294, %v2191_v58  ;;  %vm2053_vm6 = vcmp.lt.s32.totalorder %v4988_v27, 3  ;;  %vm2054_vm7 = vcmp.lt.s32.totalorder %v4988_v27, 4  ;;  %v2059_v46 = vsel %vm2051_vm4, %v2038_v48, %v2041_v12 }
 0x249   : > { %vm1907_vm10 = vcmp.eq.s32.totalorder %v4978_v53, 0  ;;  %v2056_v23 = vsel %vm2054_vm7, %v2044_v21, 2102212464  ;;  %v2060_v5 = vsel %vm2054_vm7, %v2047_v11, 920167782  ;;  %v2063_v30 = vsel %vm2051_vm4, %v2041_v12, %v2044_v21 }
 0x24a   : > { %v2064_v10 = vsel %vm2054_vm7, %v2050_v41, 1326507024  ;;  %vm1906_vm8 = vcmp.lt.s32.totalorder %v4978_v53, 2  ;;  %vm3134_vm9 = vcmp.lt.s32.totalorder %v3133_v1, 0  ;;  %vm2052_vm12 = vcmp.lt.s32.totalorder %v4988_v27, 2 }
 0x24b   : > { %v2061_v42 = vsel %vm2053_vm6, %v2044_v21, %v2060_v5  ;;  %v2065_v31 = vsel %vm2053_vm6, %v2047_v11, %v2064_v10  ;;  %vm1903_vm11 = vweird.f32 %v4725_v49  ;;  %v2194_v59 = vsel %vm3134_vm9, 0, %v3133_v1 }
 0x24c   : > { %v2055_v63 = vsel %vm2051_vm4, %v2035_v24, %v2038_v48  ;;  %v2062_v40 = vsel %vm2052_vm12, %v2059_v46, %v2061_v42  ;;  %v2066_v19 = vsel %vm2052_vm12, %v2063_v30, %v2065_v31  ;;  %v2195_v7 = vsub.s32 32, %v2194_v59 }
 0x24d   : > { %v2199_v35 = vsub.s32 4294967266, %v2194_v59  ;;  %v2057_v56 = vsel %vm2053_vm6, %v2041_v12, %v2056_v23  ;;  %v2341_v45 = vadd.s32 1, %v3139_v25  ;;  %v2196_v43 = vshll.u32 %v4986_v33, %v2194_v59 }
 0x24e   : > { %v5046_v55 = vmul.u32.u64.low %v5007_v15, %v2066_v19  ;;  %v5047_v50 = vmul.u32.u64.high %v5007_v15, %v2066_v19, %v5046_v55  ;;  %v5050_v44 = vmul.u32.u64.low %v5007_v15, %v2062_v40  ;;  %v5051_v36 = vmul.u32.u64.high %v5007_v15, %v2062_v40, %v5050_v44  ;;  %v3379_v18 = vpop.eup %3378 }
 0x24f   : > { %v2197_v38 = vshrl.u32 %v4983_v34, %v2195_v7  ;;  %v2200_v13 = vadd.s32 127, %v2199_v35  ;;  %vm2342_vm13 = vcmp.gt.s32.totalorder %v2341_v45, 0  ;;  %v3381_v16 = vpop.eup %3380  ;;  %v1911_v62 = vxor.u32 2147483648, %v3379_v18 }
 0x250   : > { %v2058_v22 = vsel %vm2052_vm12, %v2055_v63, %v2057_v56  ;;  %v2339_v28 = vor.u32 8388608, %v2338_v61  ;;  %v2343_v48 = vsel %vm2342_vm13, %v2341_v45, 0  ;;  %v1908_v3 = vxor.u32 2147483648, %v3381_v16 }
 0x251   : > { %vm1910_vm14 = vcmp.eq.s32.totalorder %v4978_v53, 2  ;;  %v2198_v14 = vor.u32 %v2197_v38, %v2196_v43  ;;  %v2201_v39 = vshll.u32 %v2200_v13, 23  ;;  %v2212_v34 = vsel %vm5019_vm5, 0, %v5013_v52 }
 0x252   : > { %v1912_v12 = vsel %vm1910_vm14, %v1911_v62, %v3381_v16  ;;  %vm2076_vm0 = vc.u32 %v5047_v50, %v5050_v44  ;;  %v2077_v33 = vadd.s32 1, %v5051_v36  ;;  %v1909_v27 = vsel %vm1907_vm10, %v3379_v18, %v1908_v3  ;;  %v280_v3 = vpop.permute.xlu1 %279 }
 0x253   : > { %v2202_v21 = vor.u32 4788187, %v2201_v39  ;;  %v2074_v11 = vmul.u32 %v5007_v15, %v2058_v22  ;;  %v2345_v29 = vand.u32 31, %v2343_v48  ;;  %v1913_v20 = vsel %vm1906_vm8, %v1909_v27, %v1912_v12 }
 0x254   : > { %v2205_v58 = vcvt.s32.f32 %v2198_v14  ;;  %v2078_v25 = vsel %vm2076_vm0, %v2077_v33, %v5051_v36  ;;  %v5071_v61 = vshll.u32 %v2339_v28, 8  ;;  %v1914_v52 = vsel %vm1903_vm11, nan, %v1913_v20 }
 0x255   : > { %v2203_v24 = vand.u32 2147483647, %v2202_v21  ;;  %v2079_v41 = vadd.s32 %v2078_v25, %v2074_v11  ;;  %v2346_v1 = vsub.s32 32, %v2345_v29  ;;  %2969 = vst [vmem:[%s3893_s4 + $0x70] sm:$0xff] %v1914_v52  ;;  %v2216_v46 = vadd.s32 3, %v2212_v34 }
 0x256   : > { %v2344_v23 = vshrl.u32 %v2343_v48, 5  ;;  %v2348_v15 = vshll.u32 %v3491_v0, %v2345_v29  ;;  %v2351_v5 = vshll.u32 %v3492_v2, %v2345_v29  ;;  %v2354_v42 = vshll.u32 %v3493_v4, %v2345_v29 }
 0x257   : > { %v2206_v53 = vmul.f32 %v2205_v58, %v2203_v24  ;;  %v2080_v30 = vadd.s32 536870912, %v2079_v41  ;;  %v2349_v10 = vshrl.u32 %v3492_v2, %v2346_v1  ;;  %v2352_v31 = vshrl.u32 %v3493_v4, %v2346_v1 }
 0x258   : > { %v2355_v49 = vshrl.u32 %v3494_v6, %v2346_v1  ;;  %v2357_v59 = vshll.u32 %v3494_v6, %v2345_v29  ;;  %v2358_v63 = vshrl.u32 %v3495_v8, %v2346_v1  ;;  %v2361_v35 = vshrl.u32 %v3496_v17, %v2346_v1 }
 0x259   : > { %v2207_v40 = vxor.u32 2147483648, %v2206_v53  ;;  %v2081_v19 = vshrl.u32 %v2080_v30, 30  ;;  %v2350_v7 = vor.u32 %v2349_v10, %v2348_v15  ;;  %v2353_v56 = vor.u32 %v2352_v31, %v2351_v5 }
 0x25a   : > { %v2356_v45 = vor.u32 %v2355_v49, %v2354_v42  ;;  %v2359_v55 = vor.u32 %v2358_v63, %v2357_v59  ;;  %v2360_v36 = vshll.u32 %v3495_v8, %v2345_v29  ;;  %vm2363_vm15 = vcmp.lt.s32.totalorder %v2344_v23, 1 }
 0x25b   : > { %v2208_v18 = vsel %vm2125_vm3, %v2207_v40, %v2206_v53  ;;  %v2082_v43 = vshll.u32 %v2081_v19, 30  ;;  %v5090_v38 = vadd.f32 %v4910_v60, %v4975_v26  ;;  %v2347_v16 = vshrl.u32 %v3491_v0, %v2346_v1 }
 0x25c   : > { %v2211_v13 = vsel %vm5019_vm5, %v4809_v9, %v2208_v18  ;;  %v2362_v62 = vor.u32 %v2361_v35, %v2360_v36  ;;  %vm2366_vm1 = vcmp.lt.s32.totalorder %v2344_v23, 4  ;;  %v2371_v48 = vsel %vm2363_vm15, %v2350_v7, %v2353_v56 }
 0x25d   : > { %3382 = vcosq.f32 %v2211_v13  ;;  %v5096_v22 = vsub.s32 %v2079_v41, %v2082_v43  ;;  %v2368_v28 = vsel %vm2366_vm1, %v2356_v45, 2102212464  ;;  %vm2364_vm2 = vcmp.lt.s32.totalorder %v2344_v23, 2 }
 0x25e   : > { %3384 = vsinq.f32 %v2211_v13  ;;  %vm2365_vm3 = vcmp.lt.s32.totalorder %v2344_v23, 3  ;;  %v2372_v26 = vsel %vm2366_vm1, %v2359_v55, 920167782  ;;  %v2105_v14 = vsub.s32 4, %v2081_v19 }
 0x25f   : > { %v2085_v57 = vsub.s32 0, %v5096_v22  ;;  %v2367_v39 = vsel %vm2363_vm15, %v2347_v16, %v2350_v7  ;;  %v2373_v12 = vsel %vm2365_vm3, %v2356_v45, %v2372_v26  ;;  %v2369_v34 = vsel %vm2365_vm3, %v2353_v56, %v2368_v28 }
 0x260   : > { %v2374_v33 = vsel %vm2364_vm2, %v2371_v48, %v2373_v12  ;;  %v2375_v27 = vsel %vm2363_vm15, %v2353_v56, %v2356_v45  ;;  %v2376_v21 = vsel %vm2366_vm1, %v2362_v62, 1326507024  ;;  %v2217_v11 = vand.u32 3, %v2216_v46 }
 0x261   : > { %v3128_v29 = vmin.u32 %v2085_v57, %v5096_v22  ;;  %v2377_v20 = vsel %vm2365_vm3, %v2359_v55, %v2376_v21  ;;  %v322_v58 = vmul.f32 %v4972_v51, %v280_v3  ;;  %vm2021_vm4 = vcmp.lt.s32.totalorder %v4913_v54, 0 }
 0x262   : > { %v2378_v25 = vsel %vm2364_vm2, %v2375_v27, %v2377_v20  ;;  %v5111_v52 = vmul.u32.u64.low %v5071_v61, %v2374_v33  ;;  %v5112_v24 = vmul.u32.u64.high %v5071_v61, %v2374_v33, %v5111_v52  ;;  %v2106_v1 = vsel %vm2021_vm4, %v2105_v14, %v2081_v19 }
 0x263   : > { %v2087_v41 = vclz %v3128_v29  ;;  %v2370_v15 = vsel %vm2364_vm2, %v2367_v39, %v2369_v34  ;;  %v5118_v46 = vmul.u32.u64.low %v5071_v61, %v2378_v25  ;;  %v5119_v5 = vmul.u32.u64.high %v5071_v61, %v2378_v25, %v5118_v46 }
 0x264   : > { %v2227_v53 = vand.u32 2147483647, %v5090_v38  ;;  %v2230_v30 = vand.u32 2139095040, %v5090_v38  ;;  %vm2218_vm5 = vcmp.lt.s32.totalorder %v2217_v11, 2  ;;  %vm5125_vm6 = vcmp.le.f32.partialorder %v2019_v37, 0.7853982 }
 0x265   : > { %v3129_v42 = vadd.s32 4294967294, %v2087_v41  ;;  %v5130_v31 = vadd.f32 %v4910_v60, %v322_v58  ;;  %vm2219_vm7 = vcmp.eq.s32.totalorder %v2217_v11, 0  ;;  %vm2222_vm10 = vcmp.eq.s32.totalorder %v2217_v11, 2 }
 0x266   : > { %v2389_v23 = vadd.s32 1, %v5112_v24  ;;  %v2231_v49 = vshrl.u32 %v2230_v30, 23  ;;  %v2075_v63 = vadd.s32 %v5050_v44, %v5047_v50  ;;  %v2108_v37 = vsel %vm5125_vm6, 0, %v2106_v1 }
 0x267   : > { %v3383_v59 = vpop.eup %3382  ;;  %vm3130_vm8 = vcmp.lt.s32.totalorder %v3129_v42, 0  ;;  %v2386_v40 = vmul.u32 %v5071_v61, %v2370_v15  ;;  %vm2388_vm9 = vc.u32 %v5119_v5, %v5111_v52  ;;  %v2234_v56 = vand.u32 8388607, %v2227_v53 }
 0x268   : > { %v3385_v19 = vpop.eup %3384  ;;  %v2223_v7 = vxor.u32 2147483648, %v3383_v59  ;;  %v2090_v35 = vsel %vm3130_vm8, 0, %v3129_v42  ;;  %v2542_v18 = vand.u32 2139095040, %v5130_v31  ;;  %v2390_v61 = vsel %vm2388_vm9, %v2389_v23, %v5112_v24 }
 0x269   : > { %v2220_v45 = vxor.u32 2147483648, %v3385_v19  ;;  %v2091_v55 = vsub.s32 32, %v2090_v35  ;;  %v2095_v36 = vsub.s32 4294967266, %v2090_v35  ;;  %v2092_v44 = vshll.u32 %v5096_v22, %v2090_v35 }
 0x26a   : > { %v2224_v50 = vsel %vm2222_vm10, %v2223_v7, %v3385_v19  ;;  %v3135_v43 = vadd.s32 4294967169, %v2231_v49  ;;  %v2391_v28 = vadd.s32 %v2390_v61, %v2386_v40  ;;  %vm2215_vm12 = vweird.f32 %v4809_v9 }
 0x26b   : > { %v2221_v13 = vsel %vm2219_vm7, %v3383_v59, %v2220_v45  ;;  %v2093_v16 = vshrl.u32 %v2075_v63, %v2091_v55  ;;  %v2096_v62 = vadd.s32 127, %v2095_v36  ;;  %v2112_v26 = vadd.s32 3, %v2108_v37 }
 0x26c   : > { %v2225_v48 = vsel %vm2218_vm5, %v2221_v13, %v2224_v50  ;;  %v2237_v3 = vadd.s32 1, %v3135_v43  ;;  %v2392_v12 = vadd.s32 536870912, %v2391_v28  ;;  %v2235_v22 = vor.u32 8388608, %v2234_v56 }
 0x26d   : > { %v2226_v57 = vsel %vm2215_vm12, nan, %v2225_v48  ;;  %v2094_v14 = vor.u32 %v2093_v16, %v2092_v44  ;;  %v2097_v39 = vshll.u32 %v2096_v62, 23  ;;  %v2539_v34 = vand.u32 2147483647, %v5130_v31 }
 0x26e   : > { %2972 = vst [vmem:[%s3893_s4 + $0x88] sm:$0xff] %v2226_v57  ;;  %vm2238_vm11 = vcmp.gt.s32.totalorder %v2237_v3, 0  ;;  %v2393_v27 = vshrl.u32 %v2392_v12, 30  ;;  %v2543_v29 = vshrl.u32 %v2542_v18, 23  ;;  %v5150_v11 = vand.u32 3, %v2112_v26 }
 0x26f   : > { %v2098_v33 = vor.u32 4788187, %v2097_v39  ;;  %v2239_v21 = vsel %vm2238_vm11, %v2237_v3, 0  ;;  %v2101_v9 = vcvt.s32.f32 %v2094_v14  ;;  %vm2333_vm13 = vcmp.lt.s32.totalorder %v4961_v47, 0 }
 0x270   : > { %v2241_v20 = vand.u32 31, %v2239_v21  ;;  %v2394_v25 = vshll.u32 %v2393_v27, 30  ;;  %v5154_v24 = vadd.s32 %v5111_v52, %v5119_v5  ;;  %v5156_v1 = vshll.u32 %v2235_v22, 8 }
 0x271   : > { %v2099_v58 = vand.u32 2147483647, %v2098_v33  ;;  %v5160_v15 = vand.u32 8388607, %v2539_v34  ;;  %v5164_v42 = vshrl.u32 %v2239_v21, 5  ;;  %v3147_v23 = vadd.s32 4294967169, %v2543_v29 }
 0x272   : > { %v2242_v41 = vsub.s32 32, %v2241_v20  ;;  %v5162_v30 = vsub.s32 %v2391_v28, %v2394_v25  ;;  %v2417_v49 = vsub.s32 4, %v2393_v27  ;;  %v2244_v59 = vshll.u32 %v3491_v0, %v2241_v20 }
 0x273   : > { %v2102_v46 = vmul.f32 %v2101_v9, %v2099_v58  ;;  %v2247_v40 = vshll.u32 %v3492_v2, %v2241_v20  ;;  %v2250_v35 = vshll.u32 %v3493_v4, %v2241_v20  ;;  %v2253_v56 = vshll.u32 %v3494_v6, %v2241_v20 }
 0x274   : > { %v2245_v63 = vshrl.u32 %v3492_v2, %v2242_v41  ;;  %v2248_v52 = vshrl.u32 %v3493_v4, %v2242_v41  ;;  %v2397_v37 = vsub.s32 0, %v5162_v30  ;;  %v2251_v19 = vshrl.u32 %v3494_v6, %v2242_v41 }
 0x275   : > { %v2103_v5 = vxor.u32 2147483648, %v2102_v46  ;;  %v2254_v45 = vshrl.u32 %v3495_v8, %v2242_v41  ;;  %v2256_v50 = vshll.u32 %v3495_v8, %v2241_v20  ;;  %v2257_v13 = vshrl.u32 %v3496_v17, %v2242_v41 }
 0x276   : > { %v2246_v7 = vor.u32 %v2245_v63, %v2244_v59  ;;  %v3140_v36 = vmin.u32 %v2397_v37, %v5162_v30  ;;  %v2249_v18 = vor.u32 %v2248_v52, %v2247_v40  ;;  %v2252_v61 = vor.u32 %v2251_v19, %v2250_v35 }
 0x277   : > { %v2104_v55 = vsel %vm2021_vm4, %v2103_v5, %v2102_v46  ;;  %v2255_v43 = vor.u32 %v2254_v45, %v2253_v56  ;;  %v2547_v62 = vor.u32 8388608, %v5160_v15  ;;  %v2549_v28 = vadd.s32 1, %v3147_v23  ;;  %v275_v5 = vpop.permute.xlu0 %274 }
 0x278   : > { %v2107_v44 = vsel %vm5125_vm6, %v4913_v54, %v2104_v55  ;;  %v2399_v16 = vclz %v3140_v36  ;;  %vm5186_vm14 = vcmp.le.f32.partialorder %v2331_v32, 0.7853982  ;;  %v2418_v10 = vsel %vm2333_vm13, %v2417_v49, %v2393_v27  ;;  %v290_v55 = vpop.permute.xlu1 %289 }
 0x279   : > { %3386 = vcosq.f32 %v2107_v44  ;;  %v2243_v26 = vshrl.u32 %v3491_v0, %v2242_v41  ;;  %v2258_v3 = vor.u32 %v2257_v13, %v2256_v50  ;;  %vm2259_vm0 = vcmp.lt.s32.totalorder %v5164_v42, 1 }
 0x27a   : > { %3388 = vsinq.f32 %v2107_v44  ;;  %v3141_v57 = vadd.s32 4294967294, %v2399_v16  ;;  %vm2261_vm15 = vcmp.lt.s32.totalorder %v5164_v42, 3  ;;  %vm2262_vm1 = vcmp.lt.s32.totalorder %v5164_v42, 4 }
 0x27b   : > { %v2264_v14 = vsel %vm2262_vm1, %v2252_v61, 2102212464  ;;  %v2267_v39 = vsel %vm2259_vm0, %v2246_v7, %v2249_v18  ;;  %v2268_v12 = vsel %vm2262_vm1, %v2255_v43, 920167782  ;;  %v2271_v32 = vsel %vm2259_vm0, %v2249_v18, %v2252_v61 }
 0x27c   : > { %vm3142_vm2 = vcmp.lt.s32.totalorder %v3141_v57, 0  ;;  %vm2260_vm3 = vcmp.lt.s32.totalorder %v5164_v42, 2  ;;  %v2269_v22 = vsel %vm2261_vm15, %v2252_v61, %v2268_v12  ;;  %v2272_v33 = vsel %vm2262_vm1, %v2258_v3, 1326507024 }
 0x27d   : > { %vm2115_vm4 = vcmp.eq.s32.totalorder %v5150_v11, 0  ;;  %v2402_v27 = vsel %vm3142_vm2, 0, %v3141_v57  ;;  %v2263_v21 = vsel %vm2259_vm0, %v2243_v26, %v2246_v7  ;;  %v2270_v29 = vsel %vm2260_vm3, %v2267_v39, %v2269_v22 }
 0x27e   : > { %v2273_v20 = vsel %vm2261_vm15, %v2255_v43, %v2272_v33  ;;  %vm2114_vm5 = vcmp.lt.s32.totalorder %v5150_v11, 2  ;;  %v2403_v58 = vsub.s32 32, %v2402_v27  ;;  %v2407_v9 = vsub.s32 4294967266, %v2402_v27 }
 0x27f   : > { %v2265_v25 = vsel %vm2261_vm15, %v2249_v18, %v2264_v14  ;;  %v2274_v41 = vsel %vm2260_vm3, %v2271_v32, %v2273_v20  ;;  %vm2111_vm6 = vweird.f32 %v4913_v54  ;;  %v2404_v59 = vshll.u32 %v5162_v30, %v2402_v27 }
 0x280   : > { %v5211_v15 = vmul.u32.u64.low %v5156_v1, %v2274_v41  ;;  %v5212_v46 = vmul.u32.u64.high %v5156_v1, %v2274_v41, %v5211_v15  ;;  %v5215_v23 = vmul.u32.u64.low %v5156_v1, %v2270_v29  ;;  %v5216_v49 = vmul.u32.u64.high %v5156_v1, %v2270_v29, %v5215_v23 }
 0x281   : > { %v2405_v63 = vshrl.u32 %v5154_v24, %v2403_v58  ;;  %v2408_v52 = vadd.s32 127, %v2407_v9  ;;  %vm2550_vm7 = vcmp.gt.s32.totalorder %v2549_v28, 0  ;;  %vm2118_vm10 = vcmp.eq.s32.totalorder %v5150_v11, 2 }
 0x282   : > { %v2266_v37 = vsel %vm2260_vm3, %v2263_v21, %v2265_v25  ;;  %v2551_v40 = vsel %vm2550_vm7, %v2549_v28, 0  ;;  %v5224_v19 = vshll.u32 %v2547_v62, 8  ;;  %v2420_v45 = vsel %vm5186_vm14, 0, %v2418_v10 }
 0x283   : > { %v3387_v7 = vpop.eup %3386  ;;  %v2406_v35 = vor.u32 %v2405_v63, %v2404_v59  ;;  %v2409_v56 = vshll.u32 %v2408_v52, 23  ;;  %v2553_v30 = vand.u32 31, %v2551_v40  ;;  %vm2284_vm8 = vc.u32 %v5212_v46, %v5215_v23 }
 0x284   : > { %v3389_v24 = vpop.eup %3388  ;;  %v2119_v36 = vxor.u32 2147483648, %v3387_v7  ;;  %v2285_v18 = vadd.s32 1, %v5216_v49  ;;  %v321_v42 = vmul.f32 %v4972_v51, %v275_v5  ;;  %v2282_v61 = vmul.u32 %v5156_v1, %v2266_v37 }
 0x285   : > { %v2116_v50 = vxor.u32 2147483648, %v3389_v24  ;;  %v2410_v44 = vor.u32 4788187, %v2409_v56  ;;  %v2554_v43 = vsub.s32 32, %v2553_v30  ;;  %v2424_v16 = vadd.s32 3, %v2420_v45 }
 0x286   : > { %v2120_v13 = vsel %vm2118_vm10, %v2119_v36, %v3389_v24  ;;  %v2286_v62 = vsel %vm2284_vm8, %v2285_v18, %v5216_v49  ;;  %v5237_v28 = vmul.f32 %v4972_v51, %v290_v55  ;;  %v2413_v3 = vcvt.s32.f32 %v2406_v35 }
 0x287   : > { %v2117_v10 = vsel %vm2115_vm4, %v3387_v7, %v2116_v50  ;;  %v2411_v26 = vand.u32 2147483647, %v2410_v44  ;;  %v2287_v57 = vadd.s32 %v2286_v62, %v2282_v61  ;;  %v2556_v14 = vshll.u32 %v3491_v0, %v2553_v30 }
 0x288   : > { %v2121_v1 = vsel %vm2114_vm5, %v2117_v10, %v2120_v13  ;;  %v2557_v39 = vshrl.u32 %v3492_v2, %v2554_v43  ;;  %v2560_v12 = vshrl.u32 %v3493_v4, %v2554_v43  ;;  %v2563_v27 = vshrl.u32 %v3494_v6, %v2554_v43 }
 0x289   : > { %v2122_v32 = vsel %vm2111_vm6, nan, %v2121_v1  ;;  %v2414_v22 = vmul.f32 %v2413_v3, %v2411_v26  ;;  %v2288_v33 = vadd.s32 536870912, %v2287_v57  ;;  %v2552_v21 = vshrl.u32 %v2551_v40, 5 }
 0x28a   : > { %2971 = vst [vmem:[%s3893_s4 + $0x80] sm:$0xff] %v2122_v32  ;;  %v2559_v29 = vshll.u32 %v3492_v2, %v2553_v30  ;;  %v2562_v11 = vshll.u32 %v3493_v4, %v2553_v30  ;;  %v2566_v20 = vshrl.u32 %v3495_v8, %v2554_v43  ;;  %v2558_v25 = vor.u32 %v2557_v39, %v2556_v14 }
 0x28b   : > { %v2415_v58 = vxor.u32 2147483648, %v2414_v22  ;;  %v2289_v9 = vshrl.u32 %v2288_v33, 30  ;;  %v2565_v41 = vshll.u32 %v3494_v6, %v2553_v30  ;;  %v2568_v49 = vshll.u32 %v3495_v8, %v2553_v30 }
 0x28c   : > { %v2561_v15 = vor.u32 %v2560_v12, %v2559_v29  ;;  %v2564_v54 = vor.u32 %v2563_v27, %v2562_v11  ;;  %v2569_v59 = vshrl.u32 %v3496_v17, %v2554_v43  ;;  %v5258_v52 = vand.u32 3, %v2424_v16 }
 0x28d   : > { %v2416_v63 = vsel %vm2333_vm13, %v2415_v58, %v2414_v22  ;;  %v2290_v5 = vshll.u32 %v2289_v9, 30  ;;  %v2567_v37 = vor.u32 %v2566_v20, %v2565_v41  ;;  %v2555_v7 = vshrl.u32 %v3491_v0, %v2554_v43 }
 0x28e   : > { %v2419_v40 = vsel %vm5186_vm14, %v4961_v47, %v2416_v63  ;;  %v2570_v35 = vor.u32 %v2569_v59, %v2568_v49  ;;  %v5265_v56 = vadd.f32 %v4910_v60, %v321_v42  ;;  %vm2571_vm9 = vcmp.lt.s32.totalorder %v2552_v21, 1 }
 0x28f   : > { %3390 = vcosq.f32 %v2419_v40  ;;  %v5267_v45 = vsub.s32 %v2287_v57, %v2290_v5  ;;  %vm2574_vm12 = vcmp.lt.s32.totalorder %v2552_v21, 4  ;;  %vm2572_vm11 = vcmp.lt.s32.totalorder %v2552_v21, 2 }
 0x290   : > { %3392 = vsinq.f32 %v2419_v40  ;;  %v2576_v30 = vsel %vm2574_vm12, %v2564_v54, 2102212464  ;;  %v2579_v55 = vsel %vm2571_vm9, %v2558_v25, %v2561_v15  ;;  %v2313_v36 = vsub.s32 4, %v2289_v9 }
 0x291   : > { %v2293_v24 = vsub.s32 0, %v5267_v45  ;;  %vm2573_vm13 = vcmp.lt.s32.totalorder %v2552_v21, 3  ;;  %v2580_v48 = vsel %vm2574_vm12, %v2567_v37, 920167782  ;;  %v2575_v18 = vsel %vm2571_vm9, %v2555_v7, %v2558_v25 }
 0x292   : > { %v2581_v50 = vsel %vm2573_vm13, %v2564_v54, %v2580_v48  ;;  %v2583_v44 = vsel %vm2571_vm9, %v2561_v15, %v2564_v54  ;;  %v2584_v61 = vsel %vm2574_vm12, %v2570_v35, 1326507024  ;;  %v2577_v43 = vsel %vm2573_vm13, %v2561_v15, %v2576_v30 }
 0x293   : > { %v3136_v42 = vmin.u32 %v2293_v24, %v5267_v45  ;;  %v2582_v13 = vsel %vm2572_vm11, %v2579_v55, %v2581_v50  ;;  %v2585_v16 = vsel %vm2573_vm13, %v2567_v37, %v2584_v61  ;;  %vm5279_vm14 = vcmp.le.f32.partialorder %v2227_v53, 0.7853982 }
 0x294   : > { %v2586_v62 = vsel %vm2572_vm11, %v2583_v44, %v2585_v16  ;;  %v5274_v10 = vmul.u32.u64.low %v5224_v19, %v2582_v13  ;;  %v5275_v26 = vmul.u32.u64.high %v5224_v19, %v2582_v13, %v5274_v10  ;;  %vm2229_vm0 = vcmp.lt.s32.totalorder %v5090_v38, 0 }
 0x295   : > { %v2295_v57 = vclz %v3136_v42  ;;  %v2314_v1 = vsel %vm2229_vm0, %v2313_v36, %v2289_v9  ;;  %v2578_v14 = vsel %vm2572_vm11, %v2575_v18, %v2577_v43  ;;  %vm2426_vm15 = vcmp.lt.s32.totalorder %v5258_v52, 2  ;;  %v285_v36 = vpop.permute.xlu0 %284 }
 0x296   : > { %v5288_v39 = vmul.u32.u64.low %v5224_v19, %v2586_v62  ;;  %v5289_v12 = vmul.u32.u64.high %v5224_v19, %v2586_v62, %v5288_v39  ;;  %v2438_v53 = vand.u32 2139095040, %v5265_v56  ;;  %v5295_v22 = vadd.f32 %v4910_v60, %v5237_v28 }
 0x297   : > { %v3137_v32 = vadd.s32 4294967294, %v2295_v57  ;;  %vm2427_vm1 = vcmp.eq.s32.totalorder %v5258_v52, 0  ;;  %vm2430_vm2 = vcmp.eq.s32.totalorder %v5258_v52, 2  ;;  %v2283_v33 = vadd.s32 %v5215_v23, %v5212_v46 }
 0x298   : > { %v2597_v27 = vadd.s32 1, %v5275_v26  ;;  %v2316_v29 = vsel %vm5279_vm14, 0, %v2314_v1  ;;  %v2594_v11 = vmul.u32 %v5224_v19, %v2578_v14  ;;  %v2439_v20 = vshrl.u32 %v2438_v53, 23 }
 0x299   : > { %v3391_v21 = vpop.eup %3390  ;;  %vm3138_vm3 = vcmp.lt.s32.totalorder %v3137_v32, 0  ;;  %vm2596_vm4 = vc.u32 %v5289_v12, %v5274_v10  ;;  %v2435_v9 = vand.u32 2147483647, %v5265_v56  ;;  %v2750_v23 = vand.u32 2139095040, %v5295_v22 }
 0x29a   : > { %v3393_v58 = vpop.eup %3392  ;;  %v2431_v60 = vxor.u32 2147483648, %v3391_v21  ;;  %v2298_v28 = vsel %vm3138_vm3, 0, %v3137_v32  ;;  %v2598_v19 = vsel %vm2596_vm4, %v2597_v27, %v5275_v26  ;;  %v3143_v49 = vadd.s32 4294967169, %v2439_v20 }
 0x29b   : > { %v2428_v25 = vxor.u32 2147483648, %v3393_v58  ;;  %v2299_v41 = vsub.s32 32, %v2298_v28  ;;  %v2303_v46 = vsub.s32 4294967266, %v2298_v28  ;;  %v2300_v54 = vshll.u32 %v5267_v45, %v2298_v28 }
 0x29c   : > { %v2432_v15 = vsel %vm2430_vm2, %v2431_v60, %v3393_v58  ;;  %v2599_v37 = vadd.s32 %v2598_v19, %v2594_v11  ;;  %vm2423_vm5 = vweird.f32 %v4961_v47  ;;  %v2320_v7 = vadd.s32 3, %v2316_v29 }
 0x29d   : > { %v2429_v59 = vsel %vm2427_vm1, %v3391_v21, %v2428_v25  ;;  %v2301_v63 = vshrl.u32 %v2283_v33, %v2299_v41  ;;  %v2304_v5 = vadd.s32 127, %v2303_v46  ;;  %v2445_v35 = vadd.s32 1, %v3143_v49 }
 0x29e   : > { %v2433_v40 = vsel %vm2426_vm15, %v2429_v59, %v2432_v15  ;;  %v2600_v24 = vadd.s32 536870912, %v2599_v37  ;;  %v2442_v48 = vand.u32 8388607, %v2435_v9  ;;  %v2751_v61 = vshrl.u32 %v2750_v23, 23 }
 0x29f   : > { %v2434_v30 = vsel %vm2423_vm5, nan, %v2433_v40  ;;  %v2302_v55 = vor.u32 %v2301_v63, %v2300_v54  ;;  %v2305_v45 = vshll.u32 %v2304_v5, 23  ;;  %vm2446_vm6 = vcmp.gt.s32.totalorder %v2445_v35, 0 }
 0x2a0   : > { %2974 = vst [vmem:[%s3893_s4 + $0x98] sm:$0xff] %v2434_v30  ;;  %v2601_v50 = vshrl.u32 %v2600_v24, 30  ;;  %v2447_v44 = vsel %vm2446_vm6, %v2445_v35, 0  ;;  %v5321_v52 = vmul.f32 %v4972_v51, %v285_v36  ;;  %v5323_v13 = vand.u32 3, %v2320_v7 }
 0x2a1   : > { %v2306_v18 = vor.u32 4788187, %v2305_v45  ;;  %v2449_v47 = vand.u32 31, %v2447_v44  ;;  %v2309_v43 = vcvt.s32.f32 %v2302_v55  ;;  %vm2541_vm7 = vcmp.lt.s32.totalorder %v5130_v31, 0 }
 0x2a2   : > { %v2602_v16 = vshll.u32 %v2601_v50, 30  ;;  %v5327_v62 = vadd.s32 %v5274_v10, %v5289_v12  ;;  %v2443_v26 = vor.u32 8388608, %v2442_v48  ;;  %v2747_v1 = vand.u32 2147483647, %v5295_v22 }
 0x2a3   : > { %v2307_v42 = vand.u32 2147483647, %v2306_v18  ;;  %v2450_v57 = vsub.s32 32, %v2449_v47  ;;  %v5332_v32 = vshrl.u32 %v2447_v44, 5  ;;  %v3155_v51 = vadd.s32 4294967169, %v2751_v61 }
 0x2a4   : > { %v5330_v39 = vsub.s32 %v2599_v37, %v2602_v16  ;;  %v2625_v53 = vsub.s32 4, %v2601_v50  ;;  %v2452_v33 = vshll.u32 %v3491_v0, %v2449_v47  ;;  %v2455_v12 = vshll.u32 %v3492_v2, %v2449_v47 }
 0x2a5   : > { %v2310_v14 = vmul.f32 %v2309_v43, %v2307_v42  ;;  %v2453_v27 = vshrl.u32 %v3492_v2, %v2450_v57  ;;  %v2456_v21 = vshrl.u32 %v3493_v4, %v2450_v57  ;;  %v2459_v11 = vshrl.u32 %v3494_v6, %v2450_v57 }
 0x2a6   : > { %v2605_v10 = vsub.s32 0, %v5330_v39  ;;  %v2458_v58 = vshll.u32 %v3493_v4, %v2449_v47  ;;  %v2461_v60 = vshll.u32 %v3494_v6, %v2449_v47  ;;  %v2462_v28 = vshrl.u32 %v3495_v8, %v2450_v57 }
 0x2a7   : > { %v2311_v29 = vxor.u32 2147483648, %v2310_v14  ;;  %v2454_v20 = vor.u32 %v2453_v27, %v2452_v33  ;;  %v2457_v46 = vor.u32 %v2456_v21, %v2455_v12  ;;  %v2464_v23 = vshll.u32 %v3495_v8, %v2449_v47 }
 0x2a8   : > { %v3148_v41 = vmin.u32 %v2605_v10, %v5330_v39  ;;  %v2460_v54 = vor.u32 %v2459_v11, %v2458_v58  ;;  %v2463_v19 = vor.u32 %v2462_v28, %v2461_v60  ;;  %v2465_v49 = vshrl.u32 %v3496_v17, %v2450_v57 }
 0x2a9   : > { %v2312_v25 = vsel %vm2229_vm0, %v2311_v29, %v2310_v14  ;;  %v5351_v63 = vshll.u32 %v2443_v26, 8  ;;  %v2757_v5 = vadd.s32 1, %v3155_v51  ;;  %vm5355_vm10 = vcmp.le.f32.partialorder %v2539_v34, 0.7853982 }
 0x2aa   : > { %v2315_v15 = vsel %vm5279_vm14, %v5090_v38, %v2312_v25  ;;  %v2607_v59 = vclz %v3148_v41  ;;  %v2626_v3 = vsel %vm2541_vm7, %v2625_v53, %v2601_v50  ;;  %v2451_v40 = vshrl.u32 %v3491_v0, %v2450_v57 }
 0x2ab   : > { %3394 = vcosq.f32 %v2315_v15  ;;  %v2466_v7 = vor.u32 %v2465_v49, %v2464_v23  ;;  %vm2467_vm8 = vcmp.lt.s32.totalorder %v5332_v32, 1  ;;  %vm2469_vm9 = vcmp.lt.s32.totalorder %v5332_v32, 3 }
 0x2ac   : > { %3396 = vsinq.f32 %v2315_v15  ;;  %v3149_v35 = vadd.s32 4294967294, %v2607_v59  ;;  %vm2470_vm12 = vcmp.lt.s32.totalorder %v5332_v32, 4  ;;  %v2475_v55 = vsel %vm2467_vm8, %v2454_v20, %v2457_v46 }
 0x2ad   : > { %v2472_v30 = vsel %vm2470_vm12, %v2460_v54, 2102212464  ;;  %v2476_v45 = vsel %vm2470_vm12, %v2463_v19, 920167782  ;;  %v2479_v34 = vsel %vm2467_vm8, %v2457_v46, %v2460_v54  ;;  %vm2468_vm13 = vcmp.lt.s32.totalorder %v5332_v32, 2 }
 0x2ae   : > { %vm3150_vm11 = vcmp.lt.s32.totalorder %v3149_v35, 0  ;;  %v2477_v24 = vsel %vm2469_vm9, %v2460_v54, %v2476_v45  ;;  %v2480_v36 = vsel %vm2470_vm12, %v2466_v7, 1326507024  ;;  %vm2323_vm14 = vcmp.eq.s32.totalorder %v5323_v13, 0  ;;  %v5403_v32 = vld [vmem:[%s5672_s1 + $0x1] ss:$0 sm:$0xff] }
 0x2af   : > { %v2610_v48 = vsel %vm3150_vm11, 0, %v3149_v35  ;;  %v2471_v18 = vsel %vm2467_vm8, %v2451_v40, %v2454_v20  ;;  %v2478_v50 = vsel %vm2468_vm13, %v2475_v55, %v2477_v24  ;;  %v2481_v44 = vsel %vm2469_vm9, %v2463_v19, %v2480_v36 }
 0x2b0   : > { %vm2322_vm0 = vcmp.lt.s32.totalorder %v5323_v13, 2  ;;  %v2611_v61 = vsub.s32 32, %v2610_v48  ;;  %v2615_v47 = vsub.s32 4294967266, %v2610_v48  ;;  %v2473_v42 = vsel %vm2469_vm9, %v2457_v46, %v2472_v30 }
 0x2b1   : > { %v2482_v43 = vsel %vm2468_vm13, %v2479_v34, %v2481_v44  ;;  %vm2319_vm15 = vweird.f32 %v5090_v38  ;;  %v5384_v57 = vmul.u32.u64.low %v5351_v63, %v2478_v50  ;;  %v5385_v14 = vmul.u32.u64.high %v5351_v63, %v2478_v50, %v5384_v57 }
 0x2b2   : > { %v5380_v16 = vmul.u32.u64.low %v5351_v63, %v2482_v43  ;;  %v5381_v26 = vmul.u32.u64.high %v5351_v63, %v2482_v43, %v5380_v16  ;;  %v2612_v51 = vshll.u32 %v5330_v39, %v2610_v48  ;;  %v2613_v53 = vshrl.u32 %v5327_v62, %v2611_v61 }
 0x2b3   : > { %v2616_v33 = vadd.s32 127, %v2615_v47  ;;  %vm2758_vm1 = vcmp.gt.s32.totalorder %v2757_v5, 0  ;;  %vm2326_vm2 = vcmp.eq.s32.totalorder %v5323_v13, 2  ;;  %v2474_v27 = vsel %vm2468_vm13, %v2471_v18, %v2473_v42 }
 0x2b4   : > { %v2754_v21 = vand.u32 8388607, %v2747_v1  ;;  %v2759_v29 = vsel %vm2758_vm1, %v2757_v5, 0  ;;  %v2614_v12 = vor.u32 %v2613_v53, %v2612_v51  ;;  %v2628_v20 = vsel %vm5355_vm10, 0, %v2626_v3 }
 0x2b5   : > { %v3395_v10 = vpop.eup %3394  ;;  %v2617_v11 = vshll.u32 %v2616_v33, 23  ;;  %v2761_v39 = vand.u32 31, %v2759_v29  ;;  %vm2492_vm3 = vc.u32 %v5381_v26, %v5384_v57  ;;  %v2493_v60 = vadd.s32 1, %v5385_v14 }
 0x2b6   : > { %v3397_v58 = vpop.eup %3396  ;;  %v2327_v62 = vxor.u32 2147483648, %v3395_v10  ;;  %v5407_v28 = vadd.f32 %v5403_v32, %v5321_v52  ;;  %v2490_v46 = vmul.u32 %v5351_v63, %v2474_v27  ;;  %v2632_v54 = vadd.s32 3, %v2628_v20 }
 0x2b7   : > { %v2324_v25 = vxor.u32 2147483648, %v3397_v58  ;;  %v2618_v41 = vor.u32 4788187, %v2617_v11  ;;  %v2762_v23 = vsub.s32 32, %v2761_v39  ;;  %v2494_v19 = vsel %vm2492_vm3, %v2493_v60, %v5385_v14 }
 0x2b8   : > { %v2328_v15 = vsel %vm2326_vm2, %v2327_v62, %v3397_v58  ;;  %v2755_v49 = vor.u32 8388608, %v2754_v21  ;;  %v2621_v3 = vcvt.s32.f32 %v2614_v12  ;;  %v2495_v52 = vadd.s32 %v2494_v19, %v2490_v46 }
 0x2b9   : > { %v2325_v59 = vsel %vm2323_vm14, %v3395_v10, %v2324_v25  ;;  %v2619_v5 = vand.u32 2147483647, %v2618_v41  ;;  %v2764_v63 = vshll.u32 %v3491_v0, %v2761_v39  ;;  %v2765_v7 = vshrl.u32 %v3492_v2, %v2762_v23 }
 0x2ba   : > { %v2329_v40 = vsel %vm2322_vm0, %v2325_v59, %v2328_v15  ;;  %v2768_v35 = vshrl.u32 %v3493_v4, %v2762_v23  ;;  %v2496_v45 = vadd.s32 536870912, %v2495_v52  ;;  %v2771_v34 = vshrl.u32 %v3494_v6, %v2762_v23 }
 0x2bb   : > { %v2330_v30 = vsel %vm2319_vm15, nan, %v2329_v40  ;;  %v2622_v55 = vmul.f32 %v2621_v3, %v2619_v5  ;;  %v2760_v24 = vshrl.u32 %v2759_v29, 5  ;;  %v2767_v36 = vshll.u32 %v3492_v2, %v2761_v39 }
 0x2bc   : > { %2973 = vst [vmem:[%s3893_s4 + $0x90] sm:$0xff] %v2330_v30  ;;  %v2770_v13 = vshll.u32 %v3493_v4, %v2761_v39  ;;  %v2774_v48 = vshrl.u32 %v3495_v8, %v2762_v23  ;;  %v2497_v50 = vshrl.u32 %v2496_v45, 30  ;;  %v2766_v44 = vor.u32 %v2765_v7, %v2764_v63 }
 0x2bd   : > { %v2623_v18 = vxor.u32 2147483648, %v2622_v55  ;;  %v2773_v61 = vshll.u32 %v3494_v6, %v2761_v39  ;;  %v2769_v47 = vor.u32 %v2768_v35, %v2767_v36  ;;  %v2776_v42 = vshll.u32 %v3495_v8, %v2761_v39  ;;  %v295_v36 = vpop.permute.xlu0 %294 }
 0x2be   : > { %v2772_v38 = vor.u32 %v2771_v34, %v2770_v13  ;;  %v2777_v43 = vshrl.u32 %v3496_v17, %v2762_v23  ;;  %v5432_v14 = vand.u32 3, %v2632_v54  ;;  %v2498_v51 = vshll.u32 %v2497_v50, 30 }
 0x2bf   : > { %v2624_v16 = vsel %vm2541_vm7, %v2623_v18, %v2622_v55  ;;  %v2775_v53 = vor.u32 %v2774_v48, %v2773_v61  ;;  %v2763_v27 = vshrl.u32 %v3491_v0, %v2762_v23  ;;  %v5438_v29 = vshll.u32 %v2755_v49, 8 }
 0x2c0   : > { %v2627_v33 = vsel %vm5355_vm10, %v5130_v31, %v2624_v16  ;;  %v2778_v21 = vor.u32 %v2777_v43, %v2776_v42  ;;  %v5440_v10 = vsub.s32 %v2495_v52, %v2498_v51  ;;  %vm2779_vm4 = vcmp.lt.s32.totalorder %v2760_v24, 1  ;;  %v3425_v42 = vld [vmem:[%s5672_s1] ss:$0 sm:$0xff] }
 0x2c1   : > { %3398 = vcosq.f32 %v2627_v33  ;;  %vm2782_vm5 = vcmp.lt.s32.totalorder %v2760_v24, 4  ;;  %vm2780_vm6 = vcmp.lt.s32.totalorder %v2760_v24, 2  ;;  %v2787_v11 = vsel %vm2779_vm4, %v2766_v44, %v2769_v47 }
 0x2c2   : > { %3400 = vsinq.f32 %v2627_v33  ;;  %v2784_v12 = vsel %vm2782_vm5, %v2772_v38, 2102212464  ;;  %v2501_v20 = vsub.s32 0, %v5440_v10  ;;  %v2521_v39 = vsub.s32 4, %v2497_v50 }
 0x2c3   : > { %vm2781_vm7 = vcmp.lt.s32.totalorder %v2760_v24, 3  ;;  %v2788_v37 = vsel %vm2782_vm5, %v2775_v53, 920167782  ;;  %v2783_v58 = vsel %vm2779_vm4, %v2763_v27, %v2766_v44  ;;  %v2791_v60 = vsel %vm2779_vm4, %v2769_v47, %v2772_v38 }
 0x2c4   : > { %v2789_v62 = vsel %vm2781_vm7, %v2772_v38, %v2788_v37  ;;  %v2792_v25 = vsel %vm2782_vm5, %v2778_v21, 1326507024  ;;  %v3144_v41 = vmin.u32 %v2501_v20, %v5440_v10  ;;  %v2785_v46 = vsel %vm2781_vm7, %v2769_v47, %v2784_v12 }
 0x2c5   : > { %v2790_v23 = vsel %vm2780_vm6, %v2787_v11, %v2789_v62  ;;  %v2793_v15 = vsel %vm2781_vm7, %v2775_v53, %v2792_v25  ;;  %v2646_v59 = vand.u32 2139095040, %v5407_v28  ;;  %vm2437_vm10 = vcmp.lt.s32.totalorder %v5265_v56, 0 }
 0x2c6   : > { %v2794_v54 = vsel %vm2780_vm6, %v2791_v60, %v2793_v15  ;;  %v5447_v19 = vmul.u32.u64.low %v5438_v29, %v2790_v23  ;;  %v5448_v49 = vmul.u32.u64.high %v5438_v29, %v2790_v23, %v5447_v19  ;;  %v2503_v5 = vclz %v3144_v41 }
 0x2c7   : > { %v2522_v3 = vsel %vm2437_vm10, %v2521_v39, %v2497_v50  ;;  %v5456_v52 = vmul.u32.u64.low %v5438_v29, %v2794_v54  ;;  %v5457_v40 = vmul.u32.u64.high %v5438_v29, %v2794_v54, %v5456_v52  ;;  %v2647_v63 = vshrl.u32 %v2646_v59, 23 }
 0x2c8   : > { %vm5461_vm8 = vcmp.le.f32.partialorder %v2435_v9, 0.7853982  ;;  %v3145_v35 = vadd.s32 4294967294, %v2503_v5  ;;  %v2786_v30 = vsel %vm2780_vm6, %v2783_v58, %v2785_v46  ;;  %v2643_v55 = vand.u32 2147483647, %v5407_v28 }
 0x2c9   : > { %vm2634_vm9 = vcmp.lt.s32.totalorder %v5432_v14, 2  ;;  %vm2635_vm12 = vcmp.eq.s32.totalorder %v5432_v14, 0  ;;  %v2805_v45 = vadd.s32 1, %v5448_v49  ;;  %v3151_v34 = vadd.s32 4294967169, %v2647_v63 }
 0x2ca   : > { %vm2638_vm11 = vcmp.eq.s32.totalorder %v5432_v14, 2  ;;  %v2491_v9 = vadd.s32 %v5384_v57, %v5381_v26  ;;  %vm3146_vm13 = vcmp.lt.s32.totalorder %v3145_v35, 0  ;;  %v2524_v24 = vsel %vm5461_vm8, 0, %v2522_v3 }
 0x2cb   : > { %v3399_v13 = vpop.eup %3398  ;;  %v2506_v50 = vsel %vm3146_vm13, 0, %v3145_v35  ;;  %v2802_v44 = vmul.u32 %v5438_v29, %v2786_v30  ;;  %vm2804_vm14 = vc.u32 %v5457_v40, %v5447_v19  ;;  %v325_v26 = vmul.f32 %v3425_v42, %v295_v36 }
 0x2cc   : > { %v3401_v48 = vpop.eup %3400  ;;  %v2639_v18 = vxor.u32 2147483648, %v3399_v13  ;;  %v2507_v47 = vsub.s32 32, %v2506_v50  ;;  %v2511_v38 = vsub.s32 4294967266, %v2506_v50  ;;  %v2508_v43 = vshll.u32 %v5440_v10, %v2506_v50 }
 0x2cd   : > { %v2636_v61 = vxor.u32 2147483648, %v3401_v48  ;;  %v2806_v16 = vsel %vm2804_vm14, %v2805_v45, %v5448_v49  ;;  %v2653_v51 = vadd.s32 1, %v3151_v34  ;;  %vm2631_vm0 = vweird.f32 %v5130_v31 }
 0x2ce   : > { %v2640_v57 = vsel %vm2638_vm11, %v2639_v18, %v3401_v48  ;;  %v2509_v33 = vshrl.u32 %v2491_v9, %v2507_v47  ;;  %v2512_v27 = vadd.s32 127, %v2511_v38  ;;  %v2807_v21 = vadd.s32 %v2806_v16, %v2802_v44 }
 0x2cf   : > { %v2637_v53 = vsel %vm2635_vm12, %v3399_v13, %v2636_v61  ;;  %vm2654_vm15 = vcmp.gt.s32.totalorder %v2653_v51, 0  ;;  %v2528_v10 = vadd.s32 3, %v2524_v24  ;;  %v2650_v60 = vand.u32 8388607, %v2643_v55 }
 0x2d0   : > { %v2641_v29 = vsel %vm2634_vm9, %v2637_v53, %v2640_v57  ;;  %v2510_v11 = vor.u32 %v2509_v33, %v2508_v43  ;;  %v2513_v20 = vshll.u32 %v2512_v27, 23  ;;  %v2808_v39 = vadd.s32 536870912, %v2807_v21 }
 0x2d1   : > { %v2642_v12 = vsel %vm2631_vm0, nan, %v2641_v29  ;;  %v2655_v37 = vsel %vm2654_vm15, %v2653_v51, 0  ;;  %v5494_v25 = vadd.f32 %v5403_v32, %v325_v26  ;;  %v5497_v23 = vand.u32 3, %v2528_v10 }
 0x2d2   : > { %2976 = vst [vmem:[%s3893_s4 + $0xa8] sm:$0xff] %v2642_v12  ;;  %v2514_v58 = vor.u32 4788187, %v2513_v20  ;;  %v5489_v62 = vshrl.u32 %v2808_v39, 30  ;;  %v2657_v31 = vand.u32 31, %v2655_v37  ;;  %v2517_v41 = vcvt.s32.f32 %v2510_v11 }
 0x2d3   : > { %v2651_v59 = vor.u32 8388608, %v2650_v60  ;;  %v2854_v5 = vand.u32 2139095040, %v5494_v25  ;;  %v2656_v3 = vshrl.u32 %v2655_v37, 5  ;;  %v2803_v26 = vadd.s32 %v5447_v19, %v5457_v40 }
 0x2d4   : > { %v2515_v14 = vand.u32 2147483647, %v2514_v58  ;;  %v2810_v46 = vshll.u32 %v5489_v62, 30  ;;  %v2658_v15 = vsub.s32 32, %v2657_v31  ;;  %v2660_v52 = vshll.u32 %v3491_v0, %v2657_v31 }
 0x2d5   : > { %v2663_v45 = vshll.u32 %v3492_v2, %v2657_v31  ;;  %v2666_v13 = vshll.u32 %v3493_v4, %v2657_v31  ;;  %v2669_v9 = vshll.u32 %v3494_v6, %v2657_v31  ;;  %v2672_v44 = vshll.u32 %v3495_v8, %v2657_v31 }
 0x2d6   : > { %v2518_v54 = vmul.f32 %v2517_v41, %v2515_v14  ;;  %v5499_v49 = vsub.s32 %v2807_v21, %v2810_v46  ;;  %v2661_v32 = vshrl.u32 %v3492_v2, %v2658_v15  ;;  %v2664_v63 = vshrl.u32 %v3493_v4, %v2658_v15 }
 0x2d7   : > { %v2667_v34 = vshrl.u32 %v3494_v6, %v2658_v15  ;;  %v2670_v24 = vshrl.u32 %v3495_v8, %v2658_v15  ;;  %v2673_v42 = vshrl.u32 %v3496_v17, %v2658_v15  ;;  %v2855_v43 = vshrl.u32 %v2854_v5, 23 }
 0x2d8   : > { %v2519_v35 = vxor.u32 2147483648, %v2518_v54  ;;  %v2813_v30 = vsub.s32 0, %v5499_v49  ;;  %v2662_v36 = vor.u32 %v2661_v32, %v2660_v52  ;;  %v2665_v50 = vor.u32 %v2664_v63, %v2663_v45 }
 0x2d9   : > { %v2668_v47 = vor.u32 %v2667_v34, %v2666_v13  ;;  %v2671_v38 = vor.u32 %v2670_v24, %v2669_v9  ;;  %v2659_v16 = vshrl.u32 %v3491_v0, %v2658_v15  ;;  %v2674_v51 = vor.u32 %v2673_v42, %v2672_v44 }
 0x2da   : > { %v2520_v48 = vsel %vm2437_vm10, %v2519_v35, %v2518_v54  ;;  %v3156_v18 = vmin.u32 %v2813_v30, %v5499_v49  ;;  %vm2675_vm1 = vcmp.lt.s32.totalorder %v2656_v3, 1  ;;  %vm2677_vm2 = vcmp.lt.s32.totalorder %v2656_v3, 3 }
 0x2db   : > { %v2523_v61 = vsel %vm5461_vm8, %v5265_v56, %v2520_v48  ;;  %vm2678_vm3 = vcmp.lt.s32.totalorder %v2656_v3, 4  ;;  %v2683_v7 = vsel %vm2675_vm1, %v2662_v36, %v2665_v50  ;;  %v2687_v21 = vsel %vm2675_vm1, %v2665_v50, %v2668_v47 }
 0x2dc   : > { %3402 = vcosq.f32 %v2523_v61  ;;  %v2815_v57 = vclz %v3156_v18  ;;  %v2680_v33 = vsel %vm2678_vm3, %v2668_v47, 2102212464  ;;  %v2684_v27 = vsel %vm2678_vm3, %v2671_v38, 920167782 }
 0x2dd   : > { %3404 = vsinq.f32 %v2523_v61  ;;  %v2688_v29 = vsel %vm2678_vm3, %v2674_v51, 1326507024  ;;  %vm2749_vm4 = vcmp.lt.s32.totalorder %v5295_v22, 0  ;;  %vm2676_vm6 = vcmp.lt.s32.totalorder %v2656_v3, 2 }
 0x2de   : > { %v3157_v53 = vadd.s32 4294967294, %v2815_v57  ;;  %v2685_v19 = vsel %vm2677_vm2, %v2668_v47, %v2684_v27  ;;  %v2689_v40 = vsel %vm2677_vm2, %v2671_v38, %v2688_v29  ;;  %v2691_v39 = vshll.u32 %v2651_v59, 8 }
 0x2df   : > { %v2686_v11 = vsel %vm2676_vm6, %v2683_v7, %v2685_v19  ;;  %v2690_v20 = vsel %vm2676_vm6, %v2687_v21, %v2689_v40  ;;  %v2679_v58 = vsel %vm2675_vm1, %v2659_v16, %v2662_v36  ;;  %v2681_v60 = vsel %vm2677_vm2, %v2665_v50, %v2680_v33 }
 0x2e0   : > { %vm3158_vm5 = vcmp.lt.s32.totalorder %v3157_v53, 0  ;;  %v5531_v31 = vmul.u32.u64.low %v2691_v39, %v2690_v20  ;;  %v5532_v14 = vmul.u32.u64.high %v2691_v39, %v2690_v20, %v5531_v31  ;;  %v3159_v52 = vadd.s32 4294967169, %v2855_v43 }
 0x2e1   : > { %v2818_v12 = vsel %vm3158_vm5, 0, %v3157_v53  ;;  %v5534_v41 = vmul.u32.u64.low %v2691_v39, %v2686_v11  ;;  %v5535_v46 = vmul.u32.u64.high %v2691_v39, %v2686_v11, %v5534_v41  ;;  %vm2530_vm7 = vcmp.lt.s32.totalorder %v5497_v23, 2 }
 0x2e2   : > { %v2819_v10 = vsub.s32 32, %v2818_v12  ;;  %v2823_v37 = vsub.s32 4294967266, %v2818_v12  ;;  %v2820_v15 = vshll.u32 %v5499_v49, %v2818_v12  ;;  %vm2531_vm10 = vcmp.eq.s32.totalorder %v5497_v23, 0 }
 0x2e3   : > { %v2833_v59 = vsub.s32 4, %v5489_v62  ;;  %v2682_v32 = vsel %vm2676_vm6, %v2679_v58, %v2681_v60  ;;  %vm2534_vm8 = vcmp.eq.s32.totalorder %v5497_v23, 2  ;;  %v2861_v45 = vadd.s32 1, %v3159_v52 }
 0x2e4   : > { %v2821_v54 = vshrl.u32 %v2803_v26, %v2819_v10  ;;  %v2824_v5 = vadd.s32 127, %v2823_v37  ;;  %vm2700_vm9 = vc.u32 %v5532_v14, %v5534_v41  ;;  %v2701_v49 = vadd.s32 1, %v5535_v46 }
 0x2e5   : > { %v2851_v13 = vand.u32 2147483647, %v5494_v25  ;;  %v2698_v48 = vmul.u32 %v2691_v39, %v2682_v32  ;;  %vm2862_vm12 = vcmp.gt.s32.totalorder %v2861_v45, 0  ;;  %v2834_v18 = vsel %vm2749_vm4, %v2833_v59, %v5489_v62 }
 0x2e6   : > { %v3403_v63 = vpop.eup %3402  ;;  %v2822_v35 = vor.u32 %v2821_v54, %v2820_v15  ;;  %v2825_v30 = vshll.u32 %v2824_v5, 23  ;;  %v2702_v50 = vsel %vm2700_vm9, %v2701_v49, %v5535_v46  ;;  %v2863_v44 = vsel %vm2862_vm12, %v2861_v45, 0 }
 0x2e7   : > { %v3405_v34 = vpop.eup %3404  ;;  %v2535_v36 = vxor.u32 2147483648, %v3403_v63  ;;  %v2703_v42 = vadd.s32 %v2702_v50, %v2698_v48  ;;  %vm2527_vm11 = vweird.f32 %v5265_v56  ;;  %v2865_v57 = vand.u32 31, %v2863_v44 }
 0x2e8   : > { %v2532_v9 = vxor.u32 2147483648, %v3405_v34  ;;  %v2826_v24 = vor.u32 4788187, %v2825_v30  ;;  %v2829_v38 = vcvt.s32.f32 %v2822_v35  ;;  %vm5559_vm13 = vcmp.le.f32.partialorder %v2747_v1, 0.7853982 }
 0x2e9   : > { %v2536_v3 = vsel %vm2534_vm8, %v2535_v36, %v3405_v34  ;;  %v2704_v51 = vadd.s32 536870912, %v2703_v42  ;;  %v2836_v53 = vsel %vm5559_vm13, 0, %v2834_v18  ;;  %v2858_v56 = vand.u32 8388607, %v2851_v13 }
 0x2ea   : > { %v2533_v61 = vsel %vm2531_vm10, %v3403_v63, %v2532_v9  ;;  %v2827_v47 = vand.u32 2147483647, %v2826_v24  ;;  %v2866_v7 = vsub.s32 32, %v2865_v57  ;;  %v2868_v27 = vshll.u32 %v3491_v0, %v2865_v57 }
 0x2eb   : > { %v2537_v26 = vsel %vm2530_vm7, %v2533_v61, %v2536_v3  ;;  %v5568_v33 = vshrl.u32 %v2704_v51, 30  ;;  %v2871_v1 = vshll.u32 %v3492_v2, %v2865_v57  ;;  %v2874_v19 = vshll.u32 %v3493_v4, %v2865_v57 }
 0x2ec   : > { %v2538_v43 = vsel %vm2527_vm11, nan, %v2537_v26  ;;  %v2830_v16 = vmul.f32 %v2829_v38, %v2827_v47  ;;  %v2869_v21 = vshrl.u32 %v3492_v2, %v2866_v7  ;;  %v2872_v29 = vshrl.u32 %v3493_v4, %v2866_v7 }
 0x2ed   : > { %2975 = vst [vmem:[%s3893_s4 + $0xa0] sm:$0xff] %v2538_v43  ;;  %v2875_v40 = vshrl.u32 %v3494_v6, %v2866_v7  ;;  %v2706_v11 = vshll.u32 %v5568_v33, 30  ;;  %v2877_v20 = vshll.u32 %v3494_v6, %v2865_v57  ;;  %v2878_v39 = vshrl.u32 %v3495_v8, %v2866_v7 }
 0x2ee   : > { %v2831_v23 = vxor.u32 2147483648, %v2830_v16  ;;  %v2864_v2 = vshrl.u32 %v2863_v44, 5  ;;  %v2870_v37 = vor.u32 %v2869_v21, %v2868_v27  ;;  %v2873_v58 = vor.u32 %v2872_v29, %v2871_v1 }
 0x2ef   : > { %v2707_v4 = vsub.s32 %v2703_v42, %v2706_v11  ;;  %v2876_v60 = vor.u32 %v2875_v40, %v2874_v19  ;;  %v2879_v31 = vor.u32 %v2878_v39, %v2877_v20  ;;  %v2880_v46 = vshll.u32 %v3495_v8, %v2865_v57 }
 0x2f0   : > { %v2832_v12 = vsel %vm2749_vm4, %v2831_v23, %v2830_v16  ;;  %v2881_v15 = vshrl.u32 %v3496_v17, %v2866_v7  ;;  %v2840_v54 = vadd.s32 3, %v2836_v53  ;;  %v2859_v5 = vor.u32 8388608, %v2858_v56 }
 0x2f1   : > { %v2835_v10 = vsel %vm5559_vm13, %v5295_v22, %v2832_v12  ;;  %v2709_v6 = vsub.s32 0, %v2707_v4  ;;  %vm2883_vm14 = vcmp.lt.s32.totalorder %v2864_v2, 1  ;;  %vm2885_vm0 = vcmp.lt.s32.totalorder %v2864_v2, 3 }
 0x2f2   : > { %3406 = vcosq.f32 %v2835_v10  ;;  %v2882_v52 = vor.u32 %v2881_v15, %v2880_v46  ;;  %vm2886_vm15 = vcmp.lt.s32.totalorder %v2864_v2, 4  ;;  %v2891_v63 = vsel %vm2883_vm14, %v2870_v37, %v2873_v58 }
 0x2f3   : > { %3408 = vsinq.f32 %v2835_v10  ;;  %v3152_v59 = vmin.u32 %v2709_v6, %v2707_v4  ;;  %v2888_v32 = vsel %vm2886_vm15, %v2876_v60, 2102212464  ;;  %v2892_v35 = vsel %vm2886_vm15, %v2879_v31, 920167782 }
 0x2f4   : > { %v2867_v30 = vshrl.u32 %v3491_v0, %v2866_v7  ;;  %v2893_v45 = vsel %vm2885_vm0, %v2876_v60, %v2892_v35  ;;  %v2895_v34 = vsel %vm2883_vm14, %v2873_v58, %v2876_v60  ;;  %v2896_v36 = vsel %vm2886_vm15, %v2882_v52, 1326507024 }
 0x2f5   : > { %v2841_v8 = vand.u32 3, %v2840_v54  ;;  %v2711_v49 = vclz %v3152_v59  ;;  %vm2884_vm1 = vcmp.lt.s32.totalorder %v2864_v2, 2  ;;  %v2899_v17 = vshll.u32 %v2859_v5, 8 }
 0x2f6   : > { %v2887_v9 = vsel %vm2883_vm14, %v2867_v30, %v2870_v37  ;;  %v2889_v24 = vsel %vm2885_vm0, %v2873_v58, %v2888_v32  ;;  %v2894_v48 = vsel %vm2884_vm1, %v2891_v63, %v2893_v45  ;;  %v2897_v3 = vsel %vm2885_vm0, %v2879_v31, %v2896_v36 }
 0x2f7   : > { %v3153_v18 = vadd.s32 4294967294, %v2711_v49  ;;  %v2898_v50 = vsel %vm2884_vm1, %v2895_v34, %v2897_v3  ;;  %v5590_v44 = vmul.u32.u64.low %v2899_v17, %v2894_v48  ;;  %v5591_v61 = vmul.u32.u64.high %v2899_v17, %v2894_v48, %v5590_v44 }
 0x2f8   : > { %v5593_v0 = vmul.u32.u64.low %v2899_v17, %v2898_v50  ;;  %v5594_v47 = vmul.u32.u64.high %v2899_v17, %v2898_v50, %v5593_v0  ;;  %vm2842_vm2 = vcmp.lt.s32.totalorder %v2841_v8, 2  ;;  %v2890_v42 = vsel %vm2884_vm1, %v2887_v9, %v2889_v24 }
 0x2f9   : > { %vm3154_vm3 = vcmp.lt.s32.totalorder %v3153_v18, 0  ;;  %vm2843_vm4 = vcmp.eq.s32.totalorder %v2841_v8, 0  ;;  %vm2846_vm5 = vcmp.eq.s32.totalorder %v2841_v8, 2  ;;  %v2699_v16 = vadd.s32 %v5534_v41, %v5532_v14 }
 0x2fa   : > { %v2714_v43 = vsel %vm3154_vm3, 0, %v3153_v18  ;;  %v2906_v7 = vmul.u32 %v2899_v17, %v2890_v42  ;;  %vm2908_vm6 = vc.u32 %v5594_v47, %v5590_v44  ;;  %v2909_v23 = vadd.s32 1, %v5591_v61 }
 0x2fb   : > { %v2715_v51 = vsub.s32 32, %v2714_v43  ;;  %v2719_v53 = vsub.s32 4294967266, %v2714_v43  ;;  %v2716_v1 = vshll.u32 %v2707_v4, %v2714_v43  ;;  %vm2839_vm7 = vweird.f32 %v5295_v22 }
 0x2fc   : > { %v3407_v38 = vpop.eup %3406  ;;  %v2910_v40 = vsel %vm2908_vm6, %v2909_v23, %v5591_v61  ;;  %v2729_v4 = vsub.s32 4, %v5568_v33  ;;  %vm2645_vm10 = vcmp.lt.s32.totalorder %v5407_v28, 0  ;;  %vm2644_vm8 = vcmp.le.f32.partialorder %v2643_v55, 0.7853982 }
 0x2fd   : > { %v3409_v26 = vpop.eup %3408  ;;  %v2847_v57 = vxor.u32 2147483648, %v3407_v38  ;;  %v2717_v21 = vshrl.u32 %v2699_v16, %v2715_v51  ;;  %v2720_v29 = vadd.s32 127, %v2719_v53  ;;  %v2911_v11 = vadd.s32 %v2910_v40, %v2906_v7 }
 0x2fe   : > { %v2844_v62 = vxor.u32 2147483648, %v3409_v26  ;;  %v2730_v15 = vsel %vm2645_vm10, %v2729_v4, %v5568_v33  ;;  %v2907_v45 = vadd.s32 %v5590_v44, %v5594_v47  ;;  %vm2735_vm14 = vweird.f32 %v5407_v28 }
 0x2ff   : > { %v2848_v56 = vsel %vm2846_vm5, %v2847_v57, %v3409_v26  ;;  %v2718_v41 = vor.u32 %v2717_v21, %v2716_v1  ;;  %v2721_v12 = vshll.u32 %v2720_v29, 23  ;;  %v2912_v39 = vadd.s32 536870912, %v2911_v11 }
 0x300   : > { %v2845_v27 = vsel %vm2843_vm4, %v3407_v38, %v2844_v62  ;;  %v2732_v52 = vsel %vm2644_vm8, 0, %v2730_v15  ;;  %vm2853_vm0 = vcmp.lt.s32.totalorder %v5494_v25, 0  ;;  %vm2852_vm15 = vcmp.le.f32.partialorder %v2851_v13, 0.7853982 }
 0x301   : > { %v2849_v19 = vsel %vm2842_vm2, %v2845_v27, %v2848_v56  ;;  %v2722_v20 = vor.u32 4788187, %v2721_v12  ;;  %v2725_v2 = vcvt.s32.f32 %v2718_v41  ;;  %v2913_v37 = vshrl.u32 %v2912_v39, 30 }
 0x302   : > { %v2850_v14 = vsel %vm2839_vm7, nan, %v2849_v19  ;;  %v2736_v32 = vadd.s32 3, %v2732_v52  ;;  %vm2943_vm4 = vweird.f32 %v5494_v25 }
 0x303   : > { %2978 = vst [vmem:[%s3893_s4 + $0xb8] sm:$0xff] %v2850_v14  ;;  %v2723_v10 = vand.u32 2147483647, %v2722_v20  ;;  %v2914_v60 = vshll.u32 %v2913_v37, 30  ;;  %v2937_v26 = vsub.s32 4, %v2913_v37 }
 0x304   : > { %v2737_v30 = vand.u32 3, %v2736_v32 }
 0x305   : > { %v2726_v58 = vmul.f32 %v2725_v2, %v2723_v10  ;;  %v2915_v22 = vsub.s32 %v2911_v11, %v2914_v60  ;;  %v2938_v62 = vsel %vm2853_vm0, %v2937_v26, %v2913_v37 }
 0x306   : > { %vm2742_vm12 = vcmp.eq.s32.totalorder %v2737_v30, 2  ;;  %vm2739_vm11 = vcmp.eq.s32.totalorder %v2737_v30, 0  ;;  %vm2738_vm13 = vcmp.lt.s32.totalorder %v2737_v30, 2 }
 0x307   : > { %v2727_v31 = vxor.u32 2147483648, %v2726_v58  ;;  %v2917_v54 = vsub.s32 0, %v2915_v22 }
 0x309   : > { %v2728_v46 = vsel %vm2645_vm10, %v2727_v31, %v2726_v58  ;;  %v3160_v5 = vmin.u32 %v2917_v54, %v2915_v22 }
 0x30a   : > { %v2731_v6 = vsel %vm2644_vm8, %v5407_v28, %v2728_v46  ;;  %v2940_v28 = vsel %vm2852_vm15, 0, %v2938_v62 }
 0x30b   : > { %3410 = vcosq.f32 %v2731_v6  ;;  %v2919_v59 = vclz %v3160_v5  ;;  %v2944_v51 = vadd.s32 3, %v2940_v28 }
 0x30c   : > { %3412 = vsinq.f32 %v2731_v6 }
 0x30d   : > { %v3161_v63 = vadd.s32 4294967294, %v2919_v59  ;;  %v2945_v53 = vand.u32 3, %v2944_v51 }
 0x30f   : > { %vm3162_vm9 = vcmp.lt.s32.totalorder %v3161_v63, 0  ;;  %vm2950_vm1 = vcmp.eq.s32.totalorder %v2945_v53, 2  ;;  %vm2947_vm2 = vcmp.eq.s32.totalorder %v2945_v53, 0  ;;  %vm2946_vm3 = vcmp.lt.s32.totalorder %v2945_v53, 2 }
 0x310   : > { %v2922_v35 = vsel %vm3162_vm9, 0, %v3161_v63 }
 0x311   : > { %v2923_v34 = vsub.s32 32, %v2922_v35  ;;  %v2927_v55 = vsub.s32 4294967266, %v2922_v35  ;;  %v2924_v8 = vshll.u32 %v2915_v22, %v2922_v35 }
 0x313   : > { %v2925_v33 = vshrl.u32 %v2907_v45, %v2923_v34  ;;  %v2928_v49 = vadd.s32 127, %v2927_v55 }
 0x315   : > { %v3411_v36 = vpop.eup %3410  ;;  %v2926_v48 = vor.u32 %v2925_v33, %v2924_v8  ;;  %v2929_v3 = vshll.u32 %v2928_v49, 23 }
 0x316   : > { %v3413_v17 = vpop.eup %3412  ;;  %v2743_v9 = vxor.u32 2147483648, %v3411_v36 }
 0x317   : > { %v2740_v24 = vxor.u32 2147483648, %v3413_v17  ;;  %v2930_v61 = vor.u32 4788187, %v2929_v3  ;;  %v2933_v38 = vcvt.s32.f32 %v2926_v48 }
 0x318   : > { %v2744_v18 = vsel %vm2742_vm12, %v2743_v9, %v3413_v17 }
 0x319   : > { %v2741_v50 = vsel %vm2739_vm11, %v3411_v36, %v2740_v24  ;;  %v2931_v47 = vand.u32 2147483647, %v2930_v61 }
 0x31a   : > { %v2745_v44 = vsel %vm2738_vm13, %v2741_v50, %v2744_v18 }
 0x31b   : > { %v2746_v0 = vsel %vm2735_vm14, nan, %v2745_v44  ;;  %v2934_v42 = vmul.f32 %v2933_v38, %v2931_v47 }
 0x31c   : > { %2977 = vst [vmem:[%s3893_s4 + $0xb0] sm:$0xff] %v2746_v0 }
 0x31d   : > { %v2935_v57 = vxor.u32 2147483648, %v2934_v42 }
 0x31f   : > { %v2936_v43 = vsel %vm2853_vm0, %v2935_v57, %v2934_v42 }
 0x320   : > { %v2939_v16 = vsel %vm2852_vm15, %v5494_v25, %v2936_v43 }
 0x321   : > { %3414 = vcosq.f32 %v2939_v16 }
 0x322   : > { %3416 = vsinq.f32 %v2939_v16 }
 0x32b   : > { %v3415_v56 = vpop.eup %3414 }
 0x32c   : > { %v3417_v7 = vpop.eup %3416  ;;  %v2951_v23 = vxor.u32 2147483648, %v3415_v56 }
 0x32d   : > { %v2948_v27 = vxor.u32 2147483648, %v3417_v7 }
 0x32e   : > { %v2952_v13 = vsel %vm2950_vm1, %v2951_v23, %v3417_v7 }
 0x32f   : > { %v2949_v1 = vsel %vm2947_vm2, %v3415_v56, %v2948_v27 }
 0x330   : > { %v2953_v21 = vsel %vm2946_vm3, %v2949_v1, %v2952_v13 }
 0x331   : > { %v2954_v29 = vsel %vm2943_vm4, nan, %v2953_v21 }
 0x332   : > { %2979 = vst [vmem:[%s3893_s4 + $0xc0] sm:$0xff] %v2954_v29 }
 0x333   : > { %3439 = shalt.err (!%p3436_p3)
}
 0x334   : > { %s3440_s30 = scalar_lea.hbm %s5622_s8, 3200  ;;  %s3444_s23 = scalar_lea.hbm %s5673_s2, 6400 }
 0x335   : > { %p3441_p4 = scmp.ne.s32.totalorder %s5622_s8, %s3440_s30  ;;  %p3445_p9 = scmp.lt.u32.totalorder %s5622_s8, %s5673_s2 }
 0x336   : > { %p3446_p10 = scmp.lt.u32.totalorder %s3444_s23, %s3440_s30  ;;  %p3448_p12 = scmp.lt.u32.totalorder %s3440_s30, %s5622_s8 }
 0x337   : > { %p3442_p7 = pnand %p3441_p4, %p3553_p5 }
 0x338   : > { %p3447_p11 = por %p3446_p10, %p3445_p9 }
 0x339   : > { %p3443_p8 = pneg %p3442_p7 }
 0x33a   : > { %p3449_p13 = por %p3448_p12, %p3447_p11 }
 0x33c   : > { %p3450_p0 = pnand %p3449_p13, %p3443_p8 }
 0x33e   : > { %3453 = shalt.err (!%p3450_p0)
}
 0x33f   : > { %s3498_s26 = smov 128   ;;  %s3499_s27 = smov 8  }
 0x340   : > { %3268 = dma.vmem_to_hbm [thread:$0]  (%p3553_p5), %s5625_s5, 3200, %s5622_s8, %s5630_s13, %s3498_s26, %s3498_s26, %s3499_s27  }
 0x341 PF: > { %p3274_p1 = scmp.ge.s32.totalorder %s3488_s12, 2  ;;  %s3009_s28 = sand.u32 1, %s3476_s9  }
 0x342   : > { %s3010_s29 = scalar_lea.sflag [#allocation3], %s3009_s28 }
 0x343   : > { %p3271_p2 = pnand %p3274_p1, %p3557_p6 }
 0x345   : > { %3471 = dma.done.wait (!%p3271_p2), %s3010_s29, 3200  }
 0x346   : > { %3473 = vsyncadd (!%p3271_p2), %s3010_s29, 4294964096  ;;  %p12_p3 = scmp.ge.s32.totalorder %s3540_s15, 4   ;;  %s5722_s9 = smov %s3480_s10 }
 0x347   : > { %s5723_s10 = smov %s3484_s11  ;;  %s5724_s11 = smov %s3551_s18 }
 0x348   : > { %s5725_s12 = smov %s3540_s15  ;;  %14 = sbr.rel (!%p12_p3) target bundleno = 3 (0x3), region = 63 }
 0x34f   :  { %3015 = vsyncpa [#allocation3], 1 }
 0x350   :  { %3017 = vsyncpa [#allocation3 + $0x1], 1 }

</bundles_post_ra>
